<compile_context>
chip_gen: v7x
topology: tpu7x:2x2x1
jax: 0.10.0
libtpu: 0.0.40
codegen_flags: <defaults>
</compile_context>

<pallas_src>
import functools

import numpy as np
import jax
import jax.numpy as jnp
from jax.experimental import pallas as pl
from jax.experimental.pallas import tpu as pltpu


# ---------------------------------------------------------------------------
# Fused Pallas kernel: conv1+pool1 -> conv2+pool2 -> (avgpool-folded) MLP head
# ---------------------------------------------------------------------------

def _audio_cnn_kernel(xph_ref, w1_ref, b1_ref, w2_ref, b2_ref, selz_ref,
                      w1fc_ref, b1fc_ref, w2fc_ref, b2fc_ref,
                      out_ref, feat_ref, *, H1, W1):
    """One grid step == one batch element, everything resident in VMEM.

    xph_ref : (1, 8, (H1+1)*W1) conv1 pool-phase matrices (idx = a*4+b*2+ox,
              row r of matrix idx holds xpad[2*(r//W1)+a, 2*(ox + r%W1)+b]).
    w1_ref  : (16, 9)  conv1 weights, column = dy*3+dx.
    b1_ref  : (16, 1)
    w2_ref  : (32, 144) conv2 weights, column = (dy*3+dx)*16 + ci.
    b2_ref  : (32, 1)
    selz_ref: (4, 4, H1*W1, H2*W2) bf16 0/1 selectors; selz[s,t] maps z1's flat
              (ho*W1+wo) lanes to the conv2 pool-phase positions z1pad[2e+s, 2f+t].
    w1fc_ref: (32*H2*W2, 256) bf16 (AdaptiveAvgPool(8,8)+flatten folded in).
    b1fc_ref: (1, 256)
    w2fc_ref: (256, NC) bf16,  b2fc_ref: (1, NC)
    out_ref : (1, 1, NC) logits.
    feat_ref: (1, 32*H2*W2) f32 VMEM scratch (flattened conv features).
    """
    H2, W2 = H1 // 2, W1 // 2
    n1, n2 = H1 * W1, H2 * W2
    C1 = w1_ref.shape[0]
    C2 = w2_ref.shape[0]

    # ---- conv1 (Cin=1) + bias + ReLU + 2x2 max-pool, pool-phase form -------
    # relu(max(conv)+b) == max(relu(conv+b)): bias constant over the window,
    # relu monotone.  Cin==1 -> VPU broadcast-FMA (an MXU K=1 matmul would be
    # pure padding); accumulator is lane-dense (C1, n1).
    z1 = None
    for p in range(2):
        for q in range(2):
            acc = jnp.zeros((C1, n1), jnp.float32)
            for dy in range(3):
                for dx in range(3):
                    s, t = p + dy, q + dx
                    a, oy = s & 1, s >> 1
                    b, ox = t & 1, t >> 1
                    idx = a * 4 + b * 2 + ox
                    row = xph_ref[0, idx:idx + 1, oy * W1: oy * W1 + n1]  # (1, n1)
                    wcol = w1_ref[:, dy * 3 + dx: dy * 3 + dx + 1]        # (C1, 1)
                    acc = acc + wcol * row
            z1 = acc if z1 is None else jnp.maximum(z1, acc)
    z1 = jnp.maximum(z1 + b1_ref[...], 0.0)                               # (C1, n1)

    # ---- conv2 + bias + ReLU + 2x2 max-pool --------------------------------
    # Phase split of the VMEM-resident z1 via exact 0/1 selection matmuls:
    # zsel[s][t][ci, e*W2+f] == z1pad[ci, 2e+s, 2f+t]  (zero padding implicit).
    zsel = [[None] * 4 for _ in range(4)]
    for s in range(4):
        for t in range(4):
            sel = selz_ref[s, t].astype(jnp.float32)                      # (n1, n2)
            zsel[s][t] = jnp.dot(z1, sel, preferred_element_type=jnp.float32)

    w2m = w2_ref[...]                                                     # (C2, 9*C1)
    z2 = None
    for p in range(2):
        for q in range(2):
            # Tap-concatenated feature block: one K=144 matmul per pool phase.
            g = jnp.concatenate(
                [zsel[p + dy][q + dx] for dy in range(3) for dx in range(3)],
                axis=0)                                                   # (9*C1, n2)
            y = jnp.dot(w2m, g, preferred_element_type=jnp.float32)      # (C2, n2)
            z2 = y if z2 is None else jnp.maximum(z2, y)
    z2 = jnp.maximum(z2 + b2_ref[...], 0.0)                               # (C2, n2)

    # ---- flatten (channel-major, PyTorch order) + fc1 + ReLU + fc2 ---------
    for c in range(C2):
        feat_ref[:, c * n2:(c + 1) * n2] = z2[c:c + 1, :]
    feat = feat_ref[...].astype(jnp.bfloat16)                             # (1, C2*n2)
    h = jnp.dot(feat, w1fc_ref[...], preferred_element_type=jnp.float32)
    h = jnp.maximum(h + b1fc_ref[...], 0.0)
    out = jnp.dot(h.astype(jnp.bfloat16), w2fc_ref[...],
                  preferred_element_type=jnp.float32) + b2fc_ref[...]
    out_ref[0] = out.astype(out_ref.dtype)


# ---------------------------------------------------------------------------
# One-time parameter preparation (hoisted out of the forward path)
# ---------------------------------------------------------------------------

def _build_pool_selectors(H1, W1, dtype=jnp.bfloat16):
    """0/1 selectors mapping z1's flat lanes to conv2 pool-phase positions."""
    H2, W2 = H1 // 2, W1 // 2
    sel = np.zeros((4, 4, H1 * W1, H2 * W2), np.float32)
    for s in range(4):
        for t in range(4):
            for e in range(H2):
                ho = 2 * e + s - 1
                if not 0 <= ho < H1:
                    continue
                for f in range(W2):
                    wo = 2 * f + t - 1
                    if not 0 <= wo < W1:
                        continue
                    sel[s, t, ho * W1 + wo, e * W2 + f] = 1.0
    return jnp.asarray(sel, dtype)


def prepare_params(params, H, W, fc_dtype=jnp.bfloat16):
    """Pack PyTorch-layout params into kernel-ready layouts (called once)."""
    assert H % 4 == 0 and W % 4 == 0
    H1, W1 = H // 2, W // 2
    H2, W2 = H1 // 2, W1 // 2
    # TODO(synk): AdaptiveAvgPool2d with H/4 or W/4 not divisible by 8
    # (variable-size windows) is not implemented; asserted instead.
    assert H2 % 8 == 0 and W2 % 8 == 0
    C1, C2 = 16, 32
    kh, kw = H2 // 8, W2 // 8

    w1 = params["conv1_w"].reshape(C1, 9)                                   # (16, 9)
    w2 = jnp.transpose(params["conv2_w"], (0, 2, 3, 1)).reshape(C2, 9 * C1)  # (32,144)
    b1 = params["conv1_b"].reshape(C1, 1)
    b2 = params["conv2_b"].reshape(C2, 1)

    # Fold AdaptiveAvgPool2d((8,8)) + flatten into fc1 (pure reshape/repeat;
    # identity permutation when H2 == W2 == 8).
    f1 = params["fc1_w"].reshape(256, C2, 8, 8)
    f1 = jnp.repeat(jnp.repeat(f1, kh, axis=2), kw, axis=3) / float(kh * kw)
    w1fc = f1.reshape(256, C2 * H2 * W2).T.astype(fc_dtype)                 # (F, 256)
    b1fc = params["fc1_b"].reshape(1, 256)
    w2fc = params["fc2_w"].T.astype(fc_dtype)                               # (256, NC)
    b2fc = params["fc2_b"].reshape(1, -1)

    selz = _build_pool_selectors(H1, W1)

    return dict(w1=w1, b1=b1, w2=w2, b2=b2, selz=selz,
                w1fc=w1fc, b1fc=b1fc, w2fc=w2fc, b2fc=b2fc)


# ---------------------------------------------------------------------------
# Forward pass (minimal XLA glue: pad + 8-way phase split of the tiny input)
# ---------------------------------------------------------------------------

def _conv1_phase_mats(x, H1, W1):
    """Zero-pad by 1 and build conv1's 8 pool-phase matrices, (B, 8, (H1+1)*W1)."""
    B = x.shape[0]
    xp = jnp.pad(x, ((0, 0), (1, 1), (1, 1)))
    mats = []
    for a in range(2):
        for b in range(2):
            ph = xp[:, a::2, b::2]                         # (B, H1+1, W1+1)
            for ox in range(2):
                mats.append(ph[:, :, ox:ox + W1].reshape(B, (H1 + 1) * W1))
    return jnp.stack(mats, axis=1)


def audio_cnn_forward(x_nchw, kp):
    B, C, H, W = x_nchw.shape
    assert C == 1
    x = x_nchw.astype(jnp.float32).reshape(B, H, W)
    H1, W1 = H // 2, W // 2
    H2, W2 = H1 // 2, W1 // 2
    F = 32 * H2 * W2
    NC = kp["b2fc"].shape[-1]
    assert kp["w1fc"].shape[0] == F
    assert kp["selz"].shape == (4, 4, H1 * W1, H2 * W2)

    xph = _conv1_phase_mats(x, H1, W1)

    kernel = functools.partial(_audio_cnn_kernel, H1=H1, W1=W1)
    out = pl.pallas_call(
        kernel,
        out_shape=jax.ShapeDtypeStruct((B, 1, NC), jnp.float32),
        grid=(B,),
        in_specs=[
            pl.BlockSpec((1, 8, (H1 + 1) * W1), lambda i: (i, 0, 0)),
            # Constant index maps: weights / selectors are fetched once and
            # stay VMEM-resident across the batch grid steps.
            pl.BlockSpec((16, 9), lambda i: (0, 0)),
            pl.BlockSpec((16, 1), lambda i: (0, 0)),
            pl.BlockSpec((32, 144), lambda i: (0, 0)),
            pl.BlockSpec((32, 1), lambda i: (0, 0)),
            pl.BlockSpec((4, 4, H1 * W1, H2 * W2), lambda i: (0, 0, 0, 0)),
            pl.BlockSpec((F, 256), lambda i: (0, 0)),
            pl.BlockSpec((1, 256), lambda i: (0, 0)),
            pl.BlockSpec((256, NC), lambda i: (0, 0)),
            pl.BlockSpec((1, NC), lambda i: (0, 0)),
        ],
        out_specs=pl.BlockSpec((1, 1, NC), lambda i: (i, 0, 0)),
        scratch_shapes=[pltpu.VMEM((1, F), jnp.float32)],
        compiler_params=pltpu.CompilerParams(
            dimension_semantics=("parallel",)),
    )(xph, kp["w1"], kp["b1"], kp["w2"], kp["b2"], kp["selz"],
      kp["w1fc"], kp["b1fc"], kp["w2fc"], kp["b2fc"])
    return out.reshape(B, NC)


# ---------------------------------------------------------------------------
# Params / reference / test
# ---------------------------------------------------------------------------

def init_params(key, num_classes):
    ks = jax.random.split(key, 8)
    s = 0.05
    return {
        "conv1_w": s * jax.random.normal(ks[0], (16, 1, 3, 3), jnp.float32),
        "conv1_b": s * jax.random.normal(ks[1], (16,), jnp.float32),
        "conv2_w": s * jax.random.normal(ks[2], (32, 16, 3, 3), jnp.float32),
        "conv2_b": s * jax.random.normal(ks[3], (32,), jnp.float32),
        "fc1_w":   s * jax.random.normal(ks[4], (256, 32 * 8 * 8), jnp.float32),
        "fc1_b":   s * jax.random.normal(ks[5], (256,), jnp.float32),
        "fc2_w":   s * jax.random.normal(ks[6], (num_classes, 256), jnp.float32),
        "fc2_b":   s * jax.random.normal(ks[7], (num_classes,), jnp.float32),
    }


def _reference_forward(x_nchw, params):
    """Pure-XLA reference with PyTorch f32 semantics (correctness check only)."""
    x = x_nchw.astype(jnp.float32)

    def conv_block(x, w, b):
        y = jax.lax.conv_general_dilated(
            x, w, window_strides=(1, 1), padding=((1, 1), (1, 1)),
            dimension_numbers=("NCHW", "OIHW", "NCHW"))
        return jax.nn.relu(y + b[None, :, None, None])

    def maxpool2(x):
        return jax.lax.reduce_window(x, -jnp.inf, jax.lax.max,
                                     (1, 1, 2, 2), (1, 1, 2, 2), "VALID")

    x = maxpool2(conv_block(x, params["conv1_w"], params["conv1_b"]))
    x = maxpool2(conv_block(x, params["conv2_w"], params["conv2_b"]))
    B, C, H, W = x.shape
    x = x.reshape(B, C, 8, H // 8, 8, W // 8).mean(axis=(3, 5))
    x = x.reshape(B, -1)
    h = jax.nn.relu(x @ params["fc1_w"].T + params["fc1_b"])
    return h @ params["fc2_w"].T + params["fc2_b"]


if __name__ == "__main__":
    num_classes = 10
    key = jax.random.PRNGKey(0)
    k_params, k_x = jax.random.split(key)

    params = init_params(k_params, num_classes)
    # Small spectrogram-like input, PyTorch NCHW: batch=2, 1 channel, 32x32.
    x = jax.random.normal(k_x, (2, 1, 32, 32), jnp.float32)

    packed = prepare_params(params, H=32, W=32)           # one-time weight prep
    fwd = jax.jit(audio_cnn_forward)

    out = jax.block_until_ready(fwd(x, packed))
    ref = jax.block_until_ready(_reference_forward(x, params))

    assert out.shape == (2, num_classes), out.shape
    assert bool(jnp.all(jnp.isfinite(out)))
    # bf16 fc weights (per perf review) introduce ~1e-3-scale differences vs.
    # the f32 reference; everything else matches f32 semantics.
    assert bool(jnp.allclose(out, ref, atol=5e-3, rtol=5e-3)), (
        float(jnp.max(jnp.abs(out - ref))))
    print("KERNEL_OK")
</pallas_src>

<mosaic_0001>
module attributes {stable_mosaic.version = 11 : i64} {
  func.func @_audio_cnn_kernel(%arg0: i32, %arg1: memref<1x8x272xf32, #tpu.memory_space<vmem>>, %arg2: memref<16x9xf32, #tpu.memory_space<vmem>>, %arg3: memref<16x1xf32, #tpu.memory_space<vmem>>, %arg4: memref<32x144xf32, #tpu.memory_space<vmem>>, %arg5: memref<32x1xf32, #tpu.memory_space<vmem>>, %arg6: memref<4x4x256x64xbf16, #tpu.memory_space<vmem>>, %arg7: memref<2048x256xbf16, #tpu.memory_space<vmem>>, %arg8: memref<1x256xf32, #tpu.memory_space<vmem>>, %arg9: memref<256x10xbf16, #tpu.memory_space<vmem>>, %arg10: memref<1x10xf32, #tpu.memory_space<vmem>>, %arg11: memref<1x1x10xf32, #tpu.memory_space<vmem>>, %arg12: memref<1x2048xf32, #tpu.memory_space<vmem>>) attributes {dimension_semantics = [#tpu.dimension_semantics<parallel>], iteration_bounds = array<i64: 2>, scalar_prefetch = 0 : i64, scratch_operands = 1 : i64, tpu.core_type = #tpu.core_type<tc>, window_params = [{transform_indices = @transform_0, window_bounds = array<i64: 1, 8, 272>}, {pipeline_mode = #tpu.pipeline_mode<synchronous>, transform_indices = @transform_1, window_bounds = array<i64: 16, 9>}, {pipeline_mode = #tpu.pipeline_mode<synchronous>, transform_indices = @transform_2, window_bounds = array<i64: 16, 1>}, {pipeline_mode = #tpu.pipeline_mode<synchronous>, transform_indices = @transform_3, window_bounds = array<i64: 32, 144>}, {pipeline_mode = #tpu.pipeline_mode<synchronous>, transform_indices = @transform_4, window_bounds = array<i64: 32, 1>}, {pipeline_mode = #tpu.pipeline_mode<synchronous>, transform_indices = @transform_5, window_bounds = array<i64: 4, 4, 256, 64>}, {pipeline_mode = #tpu.pipeline_mode<synchronous>, transform_indices = @transform_6, window_bounds = array<i64: 2048, 256>}, {pipeline_mode = #tpu.pipeline_mode<synchronous>, transform_indices = @transform_7, window_bounds = array<i64: 1, 256>}, {pipeline_mode = #tpu.pipeline_mode<synchronous>, transform_indices = @transform_8, window_bounds = array<i64: 256, 10>}, {pipeline_mode = #tpu.pipeline_mode<synchronous>, transform_indices = @transform_9, window_bounds = array<i64: 1, 10>}, {transform_indices = @transform_10, window_bounds = array<i64: 1, 1, 10>}]} {
    %cst = arith.constant 0.000000e+00 : f32
    %0 = vector.broadcast %cst : f32 to vector<16x256xf32>
    %c0 = arith.constant 0 : index
    %c0_0 = arith.constant 0 : index
    %c0_1 = arith.constant 0 : index
    %1 = vector.load %arg1[%c0, %c0_0, %c0_1] : memref<1x8x272xf32, #tpu.memory_space<vmem>>, vector<1x1x256xf32>
    %2 = vector.shape_cast %1 : vector<1x1x256xf32> to vector<1x256xf32>
    %c0_2 = arith.constant 0 : index
    %c0_3 = arith.constant 0 : index
    %3 = vector.load %arg2[%c0_2, %c0_3] : memref<16x9xf32, #tpu.memory_space<vmem>>, vector<16x1xf32>
    %4 = vector.broadcast %3 : vector<16x1xf32> to vector<16x256xf32>
    %5 = vector.broadcast %2 : vector<1x256xf32> to vector<16x256xf32>
    %6 = arith.mulf %4, %5 : vector<16x256xf32>
    %7 = arith.addf %0, %6 : vector<16x256xf32>
    %c0_4 = arith.constant 0 : index
    %c2 = arith.constant 2 : index
    %c0_5 = arith.constant 0 : index
    %8 = vector.load %arg1[%c0_4, %c2, %c0_5] : memref<1x8x272xf32, #tpu.memory_space<vmem>>, vector<1x1x256xf32>
    %9 = vector.shape_cast %8 : vector<1x1x256xf32> to vector<1x256xf32>
    %c0_6 = arith.constant 0 : index
    %c1 = arith.constant 1 : index
    %10 = vector.load %arg2[%c0_6, %c1] : memref<16x9xf32, #tpu.memory_space<vmem>>, vector<16x1xf32>
    %11 = vector.broadcast %10 : vector<16x1xf32> to vector<16x256xf32>
    %12 = vector.broadcast %9 : vector<1x256xf32> to vector<16x256xf32>
    %13 = arith.mulf %11, %12 : vector<16x256xf32>
    %14 = arith.addf %7, %13 : vector<16x256xf32>
    %c0_7 = arith.constant 0 : index
    %c1_8 = arith.constant 1 : index
    %c0_9 = arith.constant 0 : index
    %15 = vector.load %arg1[%c0_7, %c1_8, %c0_9] : memref<1x8x272xf32, #tpu.memory_space<vmem>>, vector<1x1x256xf32>
    %16 = vector.shape_cast %15 : vector<1x1x256xf32> to vector<1x256xf32>
    %c0_10 = arith.constant 0 : index
    %c2_11 = arith.constant 2 : index
    %17 = vector.load %arg2[%c0_10, %c2_11] : memref<16x9xf32, #tpu.memory_space<vmem>>, vector<16x1xf32>
    %18 = vector.broadcast %17 : vector<16x1xf32> to vector<16x256xf32>
    %19 = vector.broadcast %16 : vector<1x256xf32> to vector<16x256xf32>
    %20 = arith.mulf %18, %19 : vector<16x256xf32>
    %21 = arith.addf %14, %20 : vector<16x256xf32>
    %c0_12 = arith.constant 0 : index
    %c4 = arith.constant 4 : index
    %c0_13 = arith.constant 0 : index
    %22 = vector.load %arg1[%c0_12, %c4, %c0_13] : memref<1x8x272xf32, #tpu.memory_space<vmem>>, vector<1x1x256xf32>
    %23 = vector.shape_cast %22 : vector<1x1x256xf32> to vector<1x256xf32>
    %c0_14 = arith.constant 0 : index
    %c3 = arith.constant 3 : index
    %24 = vector.load %arg2[%c0_14, %c3] : memref<16x9xf32, #tpu.memory_space<vmem>>, vector<16x1xf32>
    %25 = vector.broadcast %24 : vector<16x1xf32> to vector<16x256xf32>
    %26 = vector.broadcast %23 : vector<1x256xf32> to vector<16x256xf32>
    %27 = arith.mulf %25, %26 : vector<16x256xf32>
    %28 = arith.addf %21, %27 : vector<16x256xf32>
    %c0_15 = arith.constant 0 : index
    %c6 = arith.constant 6 : index
    %c0_16 = arith.constant 0 : index
    %29 = vector.load %arg1[%c0_15, %c6, %c0_16] : memref<1x8x272xf32, #tpu.memory_space<vmem>>, vector<1x1x256xf32>
    %30 = vector.shape_cast %29 : vector<1x1x256xf32> to vector<1x256xf32>
    %c0_17 = arith.constant 0 : index
    %c4_18 = arith.constant 4 : index
    %31 = vector.load %arg2[%c0_17, %c4_18] : memref<16x9xf32, #tpu.memory_space<vmem>>, vector<16x1xf32>
    %32 = vector.broadcast %31 : vector<16x1xf32> to vector<16x256xf32>
    %33 = vector.broadcast %30 : vector<1x256xf32> to vector<16x256xf32>
    %34 = arith.mulf %32, %33 : vector<16x256xf32>
    %35 = arith.addf %28, %34 : vector<16x256xf32>
    %c0_19 = arith.constant 0 : index
    %c5 = arith.constant 5 : index
    %c0_20 = arith.constant 0 : index
    %36 = vector.load %arg1[%c0_19, %c5, %c0_20] : memref<1x8x272xf32, #tpu.memory_space<vmem>>, vector<1x1x256xf32>
    %37 = vector.shape_cast %36 : vector<1x1x256xf32> to vector<1x256xf32>
    %c0_21 = arith.constant 0 : index
    %c5_22 = arith.constant 5 : index
    %38 = vector.load %arg2[%c0_21, %c5_22] : memref<16x9xf32, #tpu.memory_space<vmem>>, vector<16x1xf32>
    %39 = vector.broadcast %38 : vector<16x1xf32> to vector<16x256xf32>
    %40 = vector.broadcast %37 : vector<1x256xf32> to vector<16x256xf32>
    %41 = arith.mulf %39, %40 : vector<16x256xf32>
    %42 = arith.addf %35, %41 : vector<16x256xf32>
    %c0_23 = arith.constant 0 : index
    %c0_24 = arith.constant 0 : index
    %c16 = arith.constant 16 : index
    %43 = vector.load %arg1[%c0_23, %c0_24, %c16] : memref<1x8x272xf32, #tpu.memory_space<vmem>>, vector<1x1x256xf32>
    %44 = vector.shape_cast %43 : vector<1x1x256xf32> to vector<1x256xf32>
    %c0_25 = arith.constant 0 : index
    %c6_26 = arith.constant 6 : index
    %45 = vector.load %arg2[%c0_25, %c6_26] : memref<16x9xf32, #tpu.memory_space<vmem>>, vector<16x1xf32>
    %46 = vector.broadcast %45 : vector<16x1xf32> to vector<16x256xf32>
    %47 = vector.broadcast %44 : vector<1x256xf32> to vector<16x256xf32>
    %48 = arith.mulf %46, %47 : vector<16x256xf32>
    %49 = arith.addf %42, %48 : vector<16x256xf32>
    %c0_27 = arith.constant 0 : index
    %c2_28 = arith.constant 2 : index
    %c16_29 = arith.constant 16 : index
    %50 = vector.load %arg1[%c0_27, %c2_28, %c16_29] : memref<1x8x272xf32, #tpu.memory_space<vmem>>, vector<1x1x256xf32>
    %51 = vector.shape_cast %50 : vector<1x1x256xf32> to vector<1x256xf32>
    %c0_30 = arith.constant 0 : index
    %c7 = arith.constant 7 : index
    %52 = vector.load %arg2[%c0_30, %c7] : memref<16x9xf32, #tpu.memory_space<vmem>>, vector<16x1xf32>
    %53 = vector.broadcast %52 : vector<16x1xf32> to vector<16x256xf32>
    %54 = vector.broadcast %51 : vector<1x256xf32> to vector<16x256xf32>
    %55 = arith.mulf %53, %54 : vector<16x256xf32>
    %56 = arith.addf %49, %55 : vector<16x256xf32>
    %c0_31 = arith.constant 0 : index
    %c1_32 = arith.constant 1 : index
    %c16_33 = arith.constant 16 : index
    %57 = vector.load %arg1[%c0_31, %c1_32, %c16_33] : memref<1x8x272xf32, #tpu.memory_space<vmem>>, vector<1x1x256xf32>
    %58 = vector.shape_cast %57 : vector<1x1x256xf32> to vector<1x256xf32>
    %c0_34 = arith.constant 0 : index
    %c8 = arith.constant 8 : index
    %59 = vector.load %arg2[%c0_34, %c8] : memref<16x9xf32, #tpu.memory_space<vmem>>, vector<16x1xf32>
    %60 = vector.broadcast %59 : vector<16x1xf32> to vector<16x256xf32>
    %61 = vector.broadcast %58 : vector<1x256xf32> to vector<16x256xf32>
    %62 = arith.mulf %60, %61 : vector<16x256xf32>
    %63 = arith.addf %56, %62 : vector<16x256xf32>
    %cst_35 = arith.constant 0.000000e+00 : f32
    %64 = vector.broadcast %cst_35 : f32 to vector<16x256xf32>
    %c0_36 = arith.constant 0 : index
    %c2_37 = arith.constant 2 : index
    %c0_38 = arith.constant 0 : index
    %65 = vector.load %arg1[%c0_36, %c2_37, %c0_38] : memref<1x8x272xf32, #tpu.memory_space<vmem>>, vector<1x1x256xf32>
    %66 = vector.shape_cast %65 : vector<1x1x256xf32> to vector<1x256xf32>
    %c0_39 = arith.constant 0 : index
    %c0_40 = arith.constant 0 : index
    %67 = vector.load %arg2[%c0_39, %c0_40] : memref<16x9xf32, #tpu.memory_space<vmem>>, vector<16x1xf32>
    %68 = vector.broadcast %67 : vector<16x1xf32> to vector<16x256xf32>
    %69 = vector.broadcast %66 : vector<1x256xf32> to vector<16x256xf32>
    %70 = arith.mulf %68, %69 : vector<16x256xf32>
    %71 = arith.addf %64, %70 : vector<16x256xf32>
    %c0_41 = arith.constant 0 : index
    %c1_42 = arith.constant 1 : index
    %c0_43 = arith.constant 0 : index
    %72 = vector.load %arg1[%c0_41, %c1_42, %c0_43] : memref<1x8x272xf32, #tpu.memory_space<vmem>>, vector<1x1x256xf32>
    %73 = vector.shape_cast %72 : vector<1x1x256xf32> to vector<1x256xf32>
    %c0_44 = arith.constant 0 : index
    %c1_45 = arith.constant 1 : index
    %74 = vector.load %arg2[%c0_44, %c1_45] : memref<16x9xf32, #tpu.memory_space<vmem>>, vector<16x1xf32>
    %75 = vector.broadcast %74 : vector<16x1xf32> to vector<16x256xf32>
    %76 = vector.broadcast %73 : vector<1x256xf32> to vector<16x256xf32>
    %77 = arith.mulf %75, %76 : vector<16x256xf32>
    %78 = arith.addf %71, %77 : vector<16x256xf32>
    %c0_46 = arith.constant 0 : index
    %c3_47 = arith.constant 3 : index
    %c0_48 = arith.constant 0 : index
    %79 = vector.load %arg1[%c0_46, %c3_47, %c0_48] : memref<1x8x272xf32, #tpu.memory_space<vmem>>, vector<1x1x256xf32>
    %80 = vector.shape_cast %79 : vector<1x1x256xf32> to vector<1x256xf32>
    %c0_49 = arith.constant 0 : index
    %c2_50 = arith.constant 2 : index
    %81 = vector.load %arg2[%c0_49, %c2_50] : memref<16x9xf32, #tpu.memory_space<vmem>>, vector<16x1xf32>
    %82 = vector.broadcast %81 : vector<16x1xf32> to vector<16x256xf32>
    %83 = vector.broadcast %80 : vector<1x256xf32> to vector<16x256xf32>
    %84 = arith.mulf %82, %83 : vector<16x256xf32>
    %85 = arith.addf %78, %84 : vector<16x256xf32>
    %c0_51 = arith.constant 0 : index
    %c6_52 = arith.constant 6 : index
    %c0_53 = arith.constant 0 : index
    %86 = vector.load %arg1[%c0_51, %c6_52, %c0_53] : memref<1x8x272xf32, #tpu.memory_space<vmem>>, vector<1x1x256xf32>
    %87 = vector.shape_cast %86 : vector<1x1x256xf32> to vector<1x256xf32>
    %c0_54 = arith.constant 0 : index
    %c3_55 = arith.constant 3 : index
    %88 = vector.load %arg2[%c0_54, %c3_55] : memref<16x9xf32, #tpu.memory_space<vmem>>, vector<16x1xf32>
    %89 = vector.broadcast %88 : vector<16x1xf32> to vector<16x256xf32>
    %90 = vector.broadcast %87 : vector<1x256xf32> to vector<16x256xf32>
    %91 = arith.mulf %89, %90 : vector<16x256xf32>
    %92 = arith.addf %85, %91 : vector<16x256xf32>
    %c0_56 = arith.constant 0 : index
    %c5_57 = arith.constant 5 : index
    %c0_58 = arith.constant 0 : index
    %93 = vector.load %arg1[%c0_56, %c5_57, %c0_58] : memref<1x8x272xf32, #tpu.memory_space<vmem>>, vector<1x1x256xf32>
    %94 = vector.shape_cast %93 : vector<1x1x256xf32> to vector<1x256xf32>
    %c0_59 = arith.constant 0 : index
    %c4_60 = arith.constant 4 : index
    %95 = vector.load %arg2[%c0_59, %c4_60] : memref<16x9xf32, #tpu.memory_space<vmem>>, vector<16x1xf32>
    %96 = vector.broadcast %95 : vector<16x1xf32> to vector<16x256xf32>
    %97 = vector.broadcast %94 : vector<1x256xf32> to vector<16x256xf32>
    %98 = arith.mulf %96, %97 : vector<16x256xf32>
    %99 = arith.addf %92, %98 : vector<16x256xf32>
    %c0_61 = arith.constant 0 : index
    %c7_62 = arith.constant 7 : index
    %c0_63 = arith.constant 0 : index
    %100 = vector.load %arg1[%c0_61, %c7_62, %c0_63] : memref<1x8x272xf32, #tpu.memory_space<vmem>>, vector<1x1x256xf32>
    %101 = vector.shape_cast %100 : vector<1x1x256xf32> to vector<1x256xf32>
    %c0_64 = arith.constant 0 : index
    %c5_65 = arith.constant 5 : index
    %102 = vector.load %arg2[%c0_64, %c5_65] : memref<16x9xf32, #tpu.memory_space<vmem>>, vector<16x1xf32>
    %103 = vector.broadcast %102 : vector<16x1xf32> to vector<16x256xf32>
    %104 = vector.broadcast %101 : vector<1x256xf32> to vector<16x256xf32>
    %105 = arith.mulf %103, %104 : vector<16x256xf32>
    %106 = arith.addf %99, %105 : vector<16x256xf32>
    %c0_66 = arith.constant 0 : index
    %c2_67 = arith.constant 2 : index
    %c16_68 = arith.constant 16 : index
    %107 = vector.load %arg1[%c0_66, %c2_67, %c16_68] : memref<1x8x272xf32, #tpu.memory_space<vmem>>, vector<1x1x256xf32>
    %108 = vector.shape_cast %107 : vector<1x1x256xf32> to vector<1x256xf32>
    %c0_69 = arith.constant 0 : index
    %c6_70 = arith.constant 6 : index
    %109 = vector.load %arg2[%c0_69, %c6_70] : memref<16x9xf32, #tpu.memory_space<vmem>>, vector<16x1xf32>
    %110 = vector.broadcast %109 : vector<16x1xf32> to vector<16x256xf32>
    %111 = vector.broadcast %108 : vector<1x256xf32> to vector<16x256xf32>
    %112 = arith.mulf %110, %111 : vector<16x256xf32>
    %113 = arith.addf %106, %112 : vector<16x256xf32>
    %c0_71 = arith.constant 0 : index
    %c1_72 = arith.constant 1 : index
    %c16_73 = arith.constant 16 : index
    %114 = vector.load %arg1[%c0_71, %c1_72, %c16_73] : memref<1x8x272xf32, #tpu.memory_space<vmem>>, vector<1x1x256xf32>
    %115 = vector.shape_cast %114 : vector<1x1x256xf32> to vector<1x256xf32>
    %c0_74 = arith.constant 0 : index
    %c7_75 = arith.constant 7 : index
    %116 = vector.load %arg2[%c0_74, %c7_75] : memref<16x9xf32, #tpu.memory_space<vmem>>, vector<16x1xf32>
    %117 = vector.broadcast %116 : vector<16x1xf32> to vector<16x256xf32>
    %118 = vector.broadcast %115 : vector<1x256xf32> to vector<16x256xf32>
    %119 = arith.mulf %117, %118 : vector<16x256xf32>
    %120 = arith.addf %113, %119 : vector<16x256xf32>
    %c0_76 = arith.constant 0 : index
    %c3_77 = arith.constant 3 : index
    %c16_78 = arith.constant 16 : index
    %121 = vector.load %arg1[%c0_76, %c3_77, %c16_78] : memref<1x8x272xf32, #tpu.memory_space<vmem>>, vector<1x1x256xf32>
    %122 = vector.shape_cast %121 : vector<1x1x256xf32> to vector<1x256xf32>
    %c0_79 = arith.constant 0 : index
    %c8_80 = arith.constant 8 : index
    %123 = vector.load %arg2[%c0_79, %c8_80] : memref<16x9xf32, #tpu.memory_space<vmem>>, vector<16x1xf32>
    %124 = vector.broadcast %123 : vector<16x1xf32> to vector<16x256xf32>
    %125 = vector.broadcast %122 : vector<1x256xf32> to vector<16x256xf32>
    %126 = arith.mulf %124, %125 : vector<16x256xf32>
    %127 = arith.addf %120, %126 : vector<16x256xf32>
    %128 = arith.maximumf %63, %127 : vector<16x256xf32>
    %cst_81 = arith.constant 0.000000e+00 : f32
    %129 = vector.broadcast %cst_81 : f32 to vector<16x256xf32>
    %c0_82 = arith.constant 0 : index
    %c4_83 = arith.constant 4 : index
    %c0_84 = arith.constant 0 : index
    %130 = vector.load %arg1[%c0_82, %c4_83, %c0_84] : memref<1x8x272xf32, #tpu.memory_space<vmem>>, vector<1x1x256xf32>
    %131 = vector.shape_cast %130 : vector<1x1x256xf32> to vector<1x256xf32>
    %c0_85 = arith.constant 0 : index
    %c0_86 = arith.constant 0 : index
    %132 = vector.load %arg2[%c0_85, %c0_86] : memref<16x9xf32, #tpu.memory_space<vmem>>, vector<16x1xf32>
    %133 = vector.broadcast %132 : vector<16x1xf32> to vector<16x256xf32>
    %134 = vector.broadcast %131 : vector<1x256xf32> to vector<16x256xf32>
    %135 = arith.mulf %133, %134 : vector<16x256xf32>
    %136 = arith.addf %129, %135 : vector<16x256xf32>
    %c0_87 = arith.constant 0 : index
    %c6_88 = arith.constant 6 : index
    %c0_89 = arith.constant 0 : index
    %137 = vector.load %arg1[%c0_87, %c6_88, %c0_89] : memref<1x8x272xf32, #tpu.memory_space<vmem>>, vector<1x1x256xf32>
    %138 = vector.shape_cast %137 : vector<1x1x256xf32> to vector<1x256xf32>
    %c0_90 = arith.constant 0 : index
    %c1_91 = arith.constant 1 : index
    %139 = vector.load %arg2[%c0_90, %c1_91] : memref<16x9xf32, #tpu.memory_space<vmem>>, vector<16x1xf32>
    %140 = vector.broadcast %139 : vector<16x1xf32> to vector<16x256xf32>
    %141 = vector.broadcast %138 : vector<1x256xf32> to vector<16x256xf32>
    %142 = arith.mulf %140, %141 : vector<16x256xf32>
    %143 = arith.addf %136, %142 : vector<16x256xf32>
    %c0_92 = arith.constant 0 : index
    %c5_93 = arith.constant 5 : index
    %c0_94 = arith.constant 0 : index
    %144 = vector.load %arg1[%c0_92, %c5_93, %c0_94] : memref<1x8x272xf32, #tpu.memory_space<vmem>>, vector<1x1x256xf32>
    %145 = vector.shape_cast %144 : vector<1x1x256xf32> to vector<1x256xf32>
    %c0_95 = arith.constant 0 : index
    %c2_96 = arith.constant 2 : index
    %146 = vector.load %arg2[%c0_95, %c2_96] : memref<16x9xf32, #tpu.memory_space<vmem>>, vector<16x1xf32>
    %147 = vector.broadcast %146 : vector<16x1xf32> to vector<16x256xf32>
    %148 = vector.broadcast %145 : vector<1x256xf32> to vector<16x256xf32>
    %149 = arith.mulf %147, %148 : vector<16x256xf32>
    %150 = arith.addf %143, %149 : vector<16x256xf32>
    %c0_97 = arith.constant 0 : index
    %c0_98 = arith.constant 0 : index
    %c16_99 = arith.constant 16 : index
    %151 = vector.load %arg1[%c0_97, %c0_98, %c16_99] : memref<1x8x272xf32, #tpu.memory_space<vmem>>, vector<1x1x256xf32>
    %152 = vector.shape_cast %151 : vector<1x1x256xf32> to vector<1x256xf32>
    %c0_100 = arith.constant 0 : index
    %c3_101 = arith.constant 3 : index
    %153 = vector.load %arg2[%c0_100, %c3_101] : memref<16x9xf32, #tpu.memory_space<vmem>>, vector<16x1xf32>
    %154 = vector.broadcast %153 : vector<16x1xf32> to vector<16x256xf32>
    %155 = vector.broadcast %152 : vector<1x256xf32> to vector<16x256xf32>
    %156 = arith.mulf %154, %155 : vector<16x256xf32>
    %157 = arith.addf %150, %156 : vector<16x256xf32>
    %c0_102 = arith.constant 0 : index
    %c2_103 = arith.constant 2 : index
    %c16_104 = arith.constant 16 : index
    %158 = vector.load %arg1[%c0_102, %c2_103, %c16_104] : memref<1x8x272xf32, #tpu.memory_space<vmem>>, vector<1x1x256xf32>
    %159 = vector.shape_cast %158 : vector<1x1x256xf32> to vector<1x256xf32>
    %c0_105 = arith.constant 0 : index
    %c4_106 = arith.constant 4 : index
    %160 = vector.load %arg2[%c0_105, %c4_106] : memref<16x9xf32, #tpu.memory_space<vmem>>, vector<16x1xf32>
    %161 = vector.broadcast %160 : vector<16x1xf32> to vector<16x256xf32>
    %162 = vector.broadcast %159 : vector<1x256xf32> to vector<16x256xf32>
    %163 = arith.mulf %161, %162 : vector<16x256xf32>
    %164 = arith.addf %157, %163 : vector<16x256xf32>
    %c0_107 = arith.constant 0 : index
    %c1_108 = arith.constant 1 : index
    %c16_109 = arith.constant 16 : index
    %165 = vector.load %arg1[%c0_107, %c1_108, %c16_109] : memref<1x8x272xf32, #tpu.memory_space<vmem>>, vector<1x1x256xf32>
    %166 = vector.shape_cast %165 : vector<1x1x256xf32> to vector<1x256xf32>
    %c0_110 = arith.constant 0 : index
    %c5_111 = arith.constant 5 : index
    %167 = vector.load %arg2[%c0_110, %c5_111] : memref<16x9xf32, #tpu.memory_space<vmem>>, vector<16x1xf32>
    %168 = vector.broadcast %167 : vector<16x1xf32> to vector<16x256xf32>
    %169 = vector.broadcast %166 : vector<1x256xf32> to vector<16x256xf32>
    %170 = arith.mulf %168, %169 : vector<16x256xf32>
    %171 = arith.addf %164, %170 : vector<16x256xf32>
    %c0_112 = arith.constant 0 : index
    %c4_113 = arith.constant 4 : index
    %c16_114 = arith.constant 16 : index
    %172 = vector.load %arg1[%c0_112, %c4_113, %c16_114] : memref<1x8x272xf32, #tpu.memory_space<vmem>>, vector<1x1x256xf32>
    %173 = vector.shape_cast %172 : vector<1x1x256xf32> to vector<1x256xf32>
    %c0_115 = arith.constant 0 : index
    %c6_116 = arith.constant 6 : index
    %174 = vector.load %arg2[%c0_115, %c6_116] : memref<16x9xf32, #tpu.memory_space<vmem>>, vector<16x1xf32>
    %175 = vector.broadcast %174 : vector<16x1xf32> to vector<16x256xf32>
    %176 = vector.broadcast %173 : vector<1x256xf32> to vector<16x256xf32>
    %177 = arith.mulf %175, %176 : vector<16x256xf32>
    %178 = arith.addf %171, %177 : vector<16x256xf32>
    %c0_117 = arith.constant 0 : index
    %c6_118 = arith.constant 6 : index
    %c16_119 = arith.constant 16 : index
    %179 = vector.load %arg1[%c0_117, %c6_118, %c16_119] : memref<1x8x272xf32, #tpu.memory_space<vmem>>, vector<1x1x256xf32>
    %180 = vector.shape_cast %179 : vector<1x1x256xf32> to vector<1x256xf32>
    %c0_120 = arith.constant 0 : index
    %c7_121 = arith.constant 7 : index
    %181 = vector.load %arg2[%c0_120, %c7_121] : memref<16x9xf32, #tpu.memory_space<vmem>>, vector<16x1xf32>
    %182 = vector.broadcast %181 : vector<16x1xf32> to vector<16x256xf32>
    %183 = vector.broadcast %180 : vector<1x256xf32> to vector<16x256xf32>
    %184 = arith.mulf %182, %183 : vector<16x256xf32>
    %185 = arith.addf %178, %184 : vector<16x256xf32>
    %c0_122 = arith.constant 0 : index
    %c5_123 = arith.constant 5 : index
    %c16_124 = arith.constant 16 : index
    %186 = vector.load %arg1[%c0_122, %c5_123, %c16_124] : memref<1x8x272xf32, #tpu.memory_space<vmem>>, vector<1x1x256xf32>
    %187 = vector.shape_cast %186 : vector<1x1x256xf32> to vector<1x256xf32>
    %c0_125 = arith.constant 0 : index
    %c8_126 = arith.constant 8 : index
    %188 = vector.load %arg2[%c0_125, %c8_126] : memref<16x9xf32, #tpu.memory_space<vmem>>, vector<16x1xf32>
    %189 = vector.broadcast %188 : vector<16x1xf32> to vector<16x256xf32>
    %190 = vector.broadcast %187 : vector<1x256xf32> to vector<16x256xf32>
    %191 = arith.mulf %189, %190 : vector<16x256xf32>
    %192 = arith.addf %185, %191 : vector<16x256xf32>
    %193 = arith.maximumf %128, %192 : vector<16x256xf32>
    %cst_127 = arith.constant 0.000000e+00 : f32
    %194 = vector.broadcast %cst_127 : f32 to vector<16x256xf32>
    %c0_128 = arith.constant 0 : index
    %c6_129 = arith.constant 6 : index
    %c0_130 = arith.constant 0 : index
    %195 = vector.load %arg1[%c0_128, %c6_129, %c0_130] : memref<1x8x272xf32, #tpu.memory_space<vmem>>, vector<1x1x256xf32>
    %196 = vector.shape_cast %195 : vector<1x1x256xf32> to vector<1x256xf32>
    %c0_131 = arith.constant 0 : index
    %c0_132 = arith.constant 0 : index
    %197 = vector.load %arg2[%c0_131, %c0_132] : memref<16x9xf32, #tpu.memory_space<vmem>>, vector<16x1xf32>
    %198 = vector.broadcast %197 : vector<16x1xf32> to vector<16x256xf32>
    %199 = vector.broadcast %196 : vector<1x256xf32> to vector<16x256xf32>
    %200 = arith.mulf %198, %199 : vector<16x256xf32>
    %201 = arith.addf %194, %200 : vector<16x256xf32>
    %c0_133 = arith.constant 0 : index
    %c5_134 = arith.constant 5 : index
    %c0_135 = arith.constant 0 : index
    %202 = vector.load %arg1[%c0_133, %c5_134, %c0_135] : memref<1x8x272xf32, #tpu.memory_space<vmem>>, vector<1x1x256xf32>
    %203 = vector.shape_cast %202 : vector<1x1x256xf32> to vector<1x256xf32>
    %c0_136 = arith.constant 0 : index
    %c1_137 = arith.constant 1 : index
    %204 = vector.load %arg2[%c0_136, %c1_137] : memref<16x9xf32, #tpu.memory_space<vmem>>, vector<16x1xf32>
    %205 = vector.broadcast %204 : vector<16x1xf32> to vector<16x256xf32>
    %206 = vector.broadcast %203 : vector<1x256xf32> to vector<16x256xf32>
    %207 = arith.mulf %205, %206 : vector<16x256xf32>
    %208 = arith.addf %201, %207 : vector<16x256xf32>
    %c0_138 = arith.constant 0 : index
    %c7_139 = arith.constant 7 : index
    %c0_140 = arith.constant 0 : index
    %209 = vector.load %arg1[%c0_138, %c7_139, %c0_140] : memref<1x8x272xf32, #tpu.memory_space<vmem>>, vector<1x1x256xf32>
    %210 = vector.shape_cast %209 : vector<1x1x256xf32> to vector<1x256xf32>
    %c0_141 = arith.constant 0 : index
    %c2_142 = arith.constant 2 : index
    %211 = vector.load %arg2[%c0_141, %c2_142] : memref<16x9xf32, #tpu.memory_space<vmem>>, vector<16x1xf32>
    %212 = vector.broadcast %211 : vector<16x1xf32> to vector<16x256xf32>
    %213 = vector.broadcast %210 : vector<1x256xf32> to vector<16x256xf32>
    %214 = arith.mulf %212, %213 : vector<16x256xf32>
    %215 = arith.addf %208, %214 : vector<16x256xf32>
    %c0_143 = arith.constant 0 : index
    %c2_144 = arith.constant 2 : index
    %c16_145 = arith.constant 16 : index
    %216 = vector.load %arg1[%c0_143, %c2_144, %c16_145] : memref<1x8x272xf32, #tpu.memory_space<vmem>>, vector<1x1x256xf32>
    %217 = vector.shape_cast %216 : vector<1x1x256xf32> to vector<1x256xf32>
    %c0_146 = arith.constant 0 : index
    %c3_147 = arith.constant 3 : index
    %218 = vector.load %arg2[%c0_146, %c3_147] : memref<16x9xf32, #tpu.memory_space<vmem>>, vector<16x1xf32>
    %219 = vector.broadcast %218 : vector<16x1xf32> to vector<16x256xf32>
    %220 = vector.broadcast %217 : vector<1x256xf32> to vector<16x256xf32>
    %221 = arith.mulf %219, %220 : vector<16x256xf32>
    %222 = arith.addf %215, %221 : vector<16x256xf32>
    %c0_148 = arith.constant 0 : index
    %c1_149 = arith.constant 1 : index
    %c16_150 = arith.constant 16 : index
    %223 = vector.load %arg1[%c0_148, %c1_149, %c16_150] : memref<1x8x272xf32, #tpu.memory_space<vmem>>, vector<1x1x256xf32>
    %224 = vector.shape_cast %223 : vector<1x1x256xf32> to vector<1x256xf32>
    %c0_151 = arith.constant 0 : index
    %c4_152 = arith.constant 4 : index
    %225 = vector.load %arg2[%c0_151, %c4_152] : memref<16x9xf32, #tpu.memory_space<vmem>>, vector<16x1xf32>
    %226 = vector.broadcast %225 : vector<16x1xf32> to vector<16x256xf32>
    %227 = vector.broadcast %224 : vector<1x256xf32> to vector<16x256xf32>
    %228 = arith.mulf %226, %227 : vector<16x256xf32>
    %229 = arith.addf %222, %228 : vector<16x256xf32>
    %c0_153 = arith.constant 0 : index
    %c3_154 = arith.constant 3 : index
    %c16_155 = arith.constant 16 : index
    %230 = vector.load %arg1[%c0_153, %c3_154, %c16_155] : memref<1x8x272xf32, #tpu.memory_space<vmem>>, vector<1x1x256xf32>
    %231 = vector.shape_cast %230 : vector<1x1x256xf32> to vector<1x256xf32>
    %c0_156 = arith.constant 0 : index
    %c5_157 = arith.constant 5 : index
    %232 = vector.load %arg2[%c0_156, %c5_157] : memref<16x9xf32, #tpu.memory_space<vmem>>, vector<16x1xf32>
    %233 = vector.broadcast %232 : vector<16x1xf32> to vector<16x256xf32>
    %234 = vector.broadcast %231 : vector<1x256xf32> to vector<16x256xf32>
    %235 = arith.mulf %233, %234 : vector<16x256xf32>
    %236 = arith.addf %229, %235 : vector<16x256xf32>
    %c0_158 = arith.constant 0 : index
    %c6_159 = arith.constant 6 : index
    %c16_160 = arith.constant 16 : index
    %237 = vector.load %arg1[%c0_158, %c6_159, %c16_160] : memref<1x8x272xf32, #tpu.memory_space<vmem>>, vector<1x1x256xf32>
    %238 = vector.shape_cast %237 : vector<1x1x256xf32> to vector<1x256xf32>
    %c0_161 = arith.constant 0 : index
    %c6_162 = arith.constant 6 : index
    %239 = vector.load %arg2[%c0_161, %c6_162] : memref<16x9xf32, #tpu.memory_space<vmem>>, vector<16x1xf32>
    %240 = vector.broadcast %239 : vector<16x1xf32> to vector<16x256xf32>
    %241 = vector.broadcast %238 : vector<1x256xf32> to vector<16x256xf32>
    %242 = arith.mulf %240, %241 : vector<16x256xf32>
    %243 = arith.addf %236, %242 : vector<16x256xf32>
    %c0_163 = arith.constant 0 : index
    %c5_164 = arith.constant 5 : index
    %c16_165 = arith.constant 16 : index
    %244 = vector.load %arg1[%c0_163, %c5_164, %c16_165] : memref<1x8x272xf32, #tpu.memory_space<vmem>>, vector<1x1x256xf32>
    %245 = vector.shape_cast %244 : vector<1x1x256xf32> to vector<1x256xf32>
    %c0_166 = arith.constant 0 : index
    %c7_167 = arith.constant 7 : index
    %246 = vector.load %arg2[%c0_166, %c7_167] : memref<16x9xf32, #tpu.memory_space<vmem>>, vector<16x1xf32>
    %247 = vector.broadcast %246 : vector<16x1xf32> to vector<16x256xf32>
    %248 = vector.broadcast %245 : vector<1x256xf32> to vector<16x256xf32>
    %249 = arith.mulf %247, %248 : vector<16x256xf32>
    %250 = arith.addf %243, %249 : vector<16x256xf32>
    %c0_168 = arith.constant 0 : index
    %c7_169 = arith.constant 7 : index
    %c16_170 = arith.constant 16 : index
    %251 = vector.load %arg1[%c0_168, %c7_169, %c16_170] : memref<1x8x272xf32, #tpu.memory_space<vmem>>, vector<1x1x256xf32>
    %252 = vector.shape_cast %251 : vector<1x1x256xf32> to vector<1x256xf32>
    %c0_171 = arith.constant 0 : index
    %c8_172 = arith.constant 8 : index
    %253 = vector.load %arg2[%c0_171, %c8_172] : memref<16x9xf32, #tpu.memory_space<vmem>>, vector<16x1xf32>
    %254 = vector.broadcast %253 : vector<16x1xf32> to vector<16x256xf32>
    %255 = vector.broadcast %252 : vector<1x256xf32> to vector<16x256xf32>
    %256 = arith.mulf %254, %255 : vector<16x256xf32>
    %257 = arith.addf %250, %256 : vector<16x256xf32>
    %258 = arith.maximumf %193, %257 : vector<16x256xf32>
    %c0_173 = arith.constant 0 : index
    %c0_174 = arith.constant 0 : index
    %259 = vector.load %arg3[%c0_173, %c0_174] : memref<16x1xf32, #tpu.memory_space<vmem>>, vector<16x1xf32>
    %260 = vector.broadcast %259 : vector<16x1xf32> to vector<16x256xf32>
    %261 = arith.addf %258, %260 : vector<16x256xf32>
    %cst_175 = arith.constant 0.000000e+00 : f32
    %262 = vector.broadcast %cst_175 : f32 to vector<16x256xf32>
    %263 = arith.maximumf %261, %262 : vector<16x256xf32>
    %c0_176 = arith.constant 0 : index
    %c0_177 = arith.constant 0 : index
    %c0_178 = arith.constant 0 : index
    %c0_179 = arith.constant 0 : index
    %264 = vector.load %arg6[%c0_176, %c0_177, %c0_178, %c0_179] : memref<4x4x256x64xbf16, #tpu.memory_space<vmem>>, vector<1x1x256x64xbf16>
    %265 = vector.shape_cast %264 : vector<1x1x256x64xbf16> to vector<256x64xbf16>
    %266 = arith.extf %265 : vector<256x64xbf16> to vector<256x64xf32>
    %cst_180 = arith.constant dense<0.000000e+00> : vector<16x64xf32>
    %267 = tpu.matmul %263, %266, %cst_180 {dimension_numbers = #tpu.dot_dimension_numbers<[1], [0], [0], [1], [0, 0, 1, 1], [], []>} : vector<16x256xf32>, vector<256x64xf32>, vector<16x64xf32> -> vector<16x64xf32>
    %c0_181 = arith.constant 0 : index
    %c1_182 = arith.constant 1 : index
    %c0_183 = arith.constant 0 : index
    %c0_184 = arith.constant 0 : index
    %268 = vector.load %arg6[%c0_181, %c1_182, %c0_183, %c0_184] : memref<4x4x256x64xbf16, #tpu.memory_space<vmem>>, vector<1x1x256x64xbf16>
    %269 = vector.shape_cast %268 : vector<1x1x256x64xbf16> to vector<256x64xbf16>
    %270 = arith.extf %269 : vector<256x64xbf16> to vector<256x64xf32>
    %cst_185 = arith.constant dense<0.000000e+00> : vector<16x64xf32>
    %271 = tpu.matmul %263, %270, %cst_185 {dimension_numbers = #tpu.dot_dimension_numbers<[1], [0], [0], [1], [0, 0, 1, 1], [], []>} : vector<16x256xf32>, vector<256x64xf32>, vector<16x64xf32> -> vector<16x64xf32>
    %c0_186 = arith.constant 0 : index
    %c2_187 = arith.constant 2 : index
    %c0_188 = arith.constant 0 : index
    %c0_189 = arith.constant 0 : index
    %272 = vector.load %arg6[%c0_186, %c2_187, %c0_188, %c0_189] : memref<4x4x256x64xbf16, #tpu.memory_space<vmem>>, vector<1x1x256x64xbf16>
    %273 = vector.shape_cast %272 : vector<1x1x256x64xbf16> to vector<256x64xbf16>
    %274 = arith.extf %273 : vector<256x64xbf16> to vector<256x64xf32>
    %cst_190 = arith.constant dense<0.000000e+00> : vector<16x64xf32>
    %275 = tpu.matmul %263, %274, %cst_190 {dimension_numbers = #tpu.dot_dimension_numbers<[1], [0], [0], [1], [0, 0, 1, 1], [], []>} : vector<16x256xf32>, vector<256x64xf32>, vector<16x64xf32> -> vector<16x64xf32>
    %c0_191 = arith.constant 0 : index
    %c3_192 = arith.constant 3 : index
    %c0_193 = arith.constant 0 : index
    %c0_194 = arith.constant 0 : index
    %276 = vector.load %arg6[%c0_191, %c3_192, %c0_193, %c0_194] : memref<4x4x256x64xbf16, #tpu.memory_space<vmem>>, vector<1x1x256x64xbf16>
    %277 = vector.shape_cast %276 : vector<1x1x256x64xbf16> to vector<256x64xbf16>
    %278 = arith.extf %277 : vector<256x64xbf16> to vector<256x64xf32>
    %cst_195 = arith.constant dense<0.000000e+00> : vector<16x64xf32>
    %279 = tpu.matmul %263, %278, %cst_195 {dimension_numbers = #tpu.dot_dimension_numbers<[1], [0], [0], [1], [0, 0, 1, 1], [], []>} : vector<16x256xf32>, vector<256x64xf32>, vector<16x64xf32> -> vector<16x64xf32>
    %c1_196 = arith.constant 1 : index
    %c0_197 = arith.constant 0 : index
    %c0_198 = arith.constant 0 : index
    %c0_199 = arith.constant 0 : index
    %280 = vector.load %arg6[%c1_196, %c0_197, %c0_198, %c0_199] : memref<4x4x256x64xbf16, #tpu.memory_space<vmem>>, vector<1x1x256x64xbf16>
    %281 = vector.shape_cast %280 : vector<1x1x256x64xbf16> to vector<256x64xbf16>
    %282 = arith.extf %281 : vector<256x64xbf16> to vector<256x64xf32>
    %cst_200 = arith.constant dense<0.000000e+00> : vector<16x64xf32>
    %283 = tpu.matmul %263, %282, %cst_200 {dimension_numbers = #tpu.dot_dimension_numbers<[1], [0], [0], [1], [0, 0, 1, 1], [], []>} : vector<16x256xf32>, vector<256x64xf32>, vector<16x64xf32> -> vector<16x64xf32>
    %c1_201 = arith.constant 1 : index
    %c1_202 = arith.constant 1 : index
    %c0_203 = arith.constant 0 : index
    %c0_204 = arith.constant 0 : index
    %284 = vector.load %arg6[%c1_201, %c1_202, %c0_203, %c0_204] : memref<4x4x256x64xbf16, #tpu.memory_space<vmem>>, vector<1x1x256x64xbf16>
    %285 = vector.shape_cast %284 : vector<1x1x256x64xbf16> to vector<256x64xbf16>
    %286 = arith.extf %285 : vector<256x64xbf16> to vector<256x64xf32>
    %cst_205 = arith.constant dense<0.000000e+00> : vector<16x64xf32>
    %287 = tpu.matmul %263, %286, %cst_205 {dimension_numbers = #tpu.dot_dimension_numbers<[1], [0], [0], [1], [0, 0, 1, 1], [], []>} : vector<16x256xf32>, vector<256x64xf32>, vector<16x64xf32> -> vector<16x64xf32>
    %c1_206 = arith.constant 1 : index
    %c2_207 = arith.constant 2 : index
    %c0_208 = arith.constant 0 : index
    %c0_209 = arith.constant 0 : index
    %288 = vector.load %arg6[%c1_206, %c2_207, %c0_208, %c0_209] : memref<4x4x256x64xbf16, #tpu.memory_space<vmem>>, vector<1x1x256x64xbf16>
    %289 = vector.shape_cast %288 : vector<1x1x256x64xbf16> to vector<256x64xbf16>
    %290 = arith.extf %289 : vector<256x64xbf16> to vector<256x64xf32>
    %cst_210 = arith.constant dense<0.000000e+00> : vector<16x64xf32>
    %291 = tpu.matmul %263, %290, %cst_210 {dimension_numbers = #tpu.dot_dimension_numbers<[1], [0], [0], [1], [0, 0, 1, 1], [], []>} : vector<16x256xf32>, vector<256x64xf32>, vector<16x64xf32> -> vector<16x64xf32>
    %c1_211 = arith.constant 1 : index
    %c3_212 = arith.constant 3 : index
    %c0_213 = arith.constant 0 : index
    %c0_214 = arith.constant 0 : index
    %292 = vector.load %arg6[%c1_211, %c3_212, %c0_213, %c0_214] : memref<4x4x256x64xbf16, #tpu.memory_space<vmem>>, vector<1x1x256x64xbf16>
    %293 = vector.shape_cast %292 : vector<1x1x256x64xbf16> to vector<256x64xbf16>
    %294 = arith.extf %293 : vector<256x64xbf16> to vector<256x64xf32>
    %cst_215 = arith.constant dense<0.000000e+00> : vector<16x64xf32>
    %295 = tpu.matmul %263, %294, %cst_215 {dimension_numbers = #tpu.dot_dimension_numbers<[1], [0], [0], [1], [0, 0, 1, 1], [], []>} : vector<16x256xf32>, vector<256x64xf32>, vector<16x64xf32> -> vector<16x64xf32>
    %c2_216 = arith.constant 2 : index
    %c0_217 = arith.constant 0 : index
    %c0_218 = arith.constant 0 : index
    %c0_219 = arith.constant 0 : index
    %296 = vector.load %arg6[%c2_216, %c0_217, %c0_218, %c0_219] : memref<4x4x256x64xbf16, #tpu.memory_space<vmem>>, vector<1x1x256x64xbf16>
    %297 = vector.shape_cast %296 : vector<1x1x256x64xbf16> to vector<256x64xbf16>
    %298 = arith.extf %297 : vector<256x64xbf16> to vector<256x64xf32>
    %cst_220 = arith.constant dense<0.000000e+00> : vector<16x64xf32>
    %299 = tpu.matmul %263, %298, %cst_220 {dimension_numbers = #tpu.dot_dimension_numbers<[1], [0], [0], [1], [0, 0, 1, 1], [], []>} : vector<16x256xf32>, vector<256x64xf32>, vector<16x64xf32> -> vector<16x64xf32>
    %c2_221 = arith.constant 2 : index
    %c1_222 = arith.constant 1 : index
    %c0_223 = arith.constant 0 : index
    %c0_224 = arith.constant 0 : index
    %300 = vector.load %arg6[%c2_221, %c1_222, %c0_223, %c0_224] : memref<4x4x256x64xbf16, #tpu.memory_space<vmem>>, vector<1x1x256x64xbf16>
    %301 = vector.shape_cast %300 : vector<1x1x256x64xbf16> to vector<256x64xbf16>
    %302 = arith.extf %301 : vector<256x64xbf16> to vector<256x64xf32>
    %cst_225 = arith.constant dense<0.000000e+00> : vector<16x64xf32>
    %303 = tpu.matmul %263, %302, %cst_225 {dimension_numbers = #tpu.dot_dimension_numbers<[1], [0], [0], [1], [0, 0, 1, 1], [], []>} : vector<16x256xf32>, vector<256x64xf32>, vector<16x64xf32> -> vector<16x64xf32>
    %c2_226 = arith.constant 2 : index
    %c2_227 = arith.constant 2 : index
    %c0_228 = arith.constant 0 : index
    %c0_229 = arith.constant 0 : index
    %304 = vector.load %arg6[%c2_226, %c2_227, %c0_228, %c0_229] : memref<4x4x256x64xbf16, #tpu.memory_space<vmem>>, vector<1x1x256x64xbf16>
    %305 = vector.shape_cast %304 : vector<1x1x256x64xbf16> to vector<256x64xbf16>
    %306 = arith.extf %305 : vector<256x64xbf16> to vector<256x64xf32>
    %cst_230 = arith.constant dense<0.000000e+00> : vector<16x64xf32>
    %307 = tpu.matmul %263, %306, %cst_230 {dimension_numbers = #tpu.dot_dimension_numbers<[1], [0], [0], [1], [0, 0, 1, 1], [], []>} : vector<16x256xf32>, vector<256x64xf32>, vector<16x64xf32> -> vector<16x64xf32>
    %c2_231 = arith.constant 2 : index
    %c3_232 = arith.constant 3 : index
    %c0_233 = arith.constant 0 : index
    %c0_234 = arith.constant 0 : index
    %308 = vector.load %arg6[%c2_231, %c3_232, %c0_233, %c0_234] : memref<4x4x256x64xbf16, #tpu.memory_space<vmem>>, vector<1x1x256x64xbf16>
    %309 = vector.shape_cast %308 : vector<1x1x256x64xbf16> to vector<256x64xbf16>
    %310 = arith.extf %309 : vector<256x64xbf16> to vector<256x64xf32>
    %cst_235 = arith.constant dense<0.000000e+00> : vector<16x64xf32>
    %311 = tpu.matmul %263, %310, %cst_235 {dimension_numbers = #tpu.dot_dimension_numbers<[1], [0], [0], [1], [0, 0, 1, 1], [], []>} : vector<16x256xf32>, vector<256x64xf32>, vector<16x64xf32> -> vector<16x64xf32>
    %c3_236 = arith.constant 3 : index
    %c0_237 = arith.constant 0 : index
    %c0_238 = arith.constant 0 : index
    %c0_239 = arith.constant 0 : index
    %312 = vector.load %arg6[%c3_236, %c0_237, %c0_238, %c0_239] : memref<4x4x256x64xbf16, #tpu.memory_space<vmem>>, vector<1x1x256x64xbf16>
    %313 = vector.shape_cast %312 : vector<1x1x256x64xbf16> to vector<256x64xbf16>
    %314 = arith.extf %313 : vector<256x64xbf16> to vector<256x64xf32>
    %cst_240 = arith.constant dense<0.000000e+00> : vector<16x64xf32>
    %315 = tpu.matmul %263, %314, %cst_240 {dimension_numbers = #tpu.dot_dimension_numbers<[1], [0], [0], [1], [0, 0, 1, 1], [], []>} : vector<16x256xf32>, vector<256x64xf32>, vector<16x64xf32> -> vector<16x64xf32>
    %c3_241 = arith.constant 3 : index
    %c1_242 = arith.constant 1 : index
    %c0_243 = arith.constant 0 : index
    %c0_244 = arith.constant 0 : index
    %316 = vector.load %arg6[%c3_241, %c1_242, %c0_243, %c0_244] : memref<4x4x256x64xbf16, #tpu.memory_space<vmem>>, vector<1x1x256x64xbf16>
    %317 = vector.shape_cast %316 : vector<1x1x256x64xbf16> to vector<256x64xbf16>
    %318 = arith.extf %317 : vector<256x64xbf16> to vector<256x64xf32>
    %cst_245 = arith.constant dense<0.000000e+00> : vector<16x64xf32>
    %319 = tpu.matmul %263, %318, %cst_245 {dimension_numbers = #tpu.dot_dimension_numbers<[1], [0], [0], [1], [0, 0, 1, 1], [], []>} : vector<16x256xf32>, vector<256x64xf32>, vector<16x64xf32> -> vector<16x64xf32>
    %c3_246 = arith.constant 3 : index
    %c2_247 = arith.constant 2 : index
    %c0_248 = arith.constant 0 : index
    %c0_249 = arith.constant 0 : index
    %320 = vector.load %arg6[%c3_246, %c2_247, %c0_248, %c0_249] : memref<4x4x256x64xbf16, #tpu.memory_space<vmem>>, vector<1x1x256x64xbf16>
    %321 = vector.shape_cast %320 : vector<1x1x256x64xbf16> to vector<256x64xbf16>
    %322 = arith.extf %321 : vector<256x64xbf16> to vector<256x64xf32>
    %cst_250 = arith.constant dense<0.000000e+00> : vector<16x64xf32>
    %323 = tpu.matmul %263, %322, %cst_250 {dimension_numbers = #tpu.dot_dimension_numbers<[1], [0], [0], [1], [0, 0, 1, 1], [], []>} : vector<16x256xf32>, vector<256x64xf32>, vector<16x64xf32> -> vector<16x64xf32>
    %c3_251 = arith.constant 3 : index
    %c3_252 = arith.constant 3 : index
    %c0_253 = arith.constant 0 : index
    %c0_254 = arith.constant 0 : index
    %324 = vector.load %arg6[%c3_251, %c3_252, %c0_253, %c0_254] : memref<4x4x256x64xbf16, #tpu.memory_space<vmem>>, vector<1x1x256x64xbf16>
    %325 = vector.shape_cast %324 : vector<1x1x256x64xbf16> to vector<256x64xbf16>
    %326 = arith.extf %325 : vector<256x64xbf16> to vector<256x64xf32>
    %cst_255 = arith.constant dense<0.000000e+00> : vector<16x64xf32>
    %327 = tpu.matmul %263, %326, %cst_255 {dimension_numbers = #tpu.dot_dimension_numbers<[1], [0], [0], [1], [0, 0, 1, 1], [], []>} : vector<16x256xf32>, vector<256x64xf32>, vector<16x64xf32> -> vector<16x64xf32>
    %c0_256 = arith.constant 0 : index
    %c0_257 = arith.constant 0 : index
    %328 = vector.load %arg4[%c0_256, %c0_257] : memref<32x144xf32, #tpu.memory_space<vmem>>, vector<32x144xf32>
    %329 = tpu.concatenate %267, %271, %275, %283, %287, %291, %299, %303, %307 in 0 : vector<16x64xf32>, vector<16x64xf32>, vector<16x64xf32>, vector<16x64xf32>, vector<16x64xf32>, vector<16x64xf32>, vector<16x64xf32>, vector<16x64xf32>, vector<16x64xf32> -> vector<144x64xf32>
    %cst_258 = arith.constant dense<0.000000e+00> : vector<32x64xf32>
    %330 = tpu.matmul %328, %329, %cst_258 {dimension_numbers = #tpu.dot_dimension_numbers<[1], [0], [0], [1], [0, 0, 1, 1], [], []>} : vector<32x144xf32>, vector<144x64xf32>, vector<32x64xf32> -> vector<32x64xf32>
    %331 = tpu.concatenate %271, %275, %279, %287, %291, %295, %303, %307, %311 in 0 : vector<16x64xf32>, vector<16x64xf32>, vector<16x64xf32>, vector<16x64xf32>, vector<16x64xf32>, vector<16x64xf32>, vector<16x64xf32>, vector<16x64xf32>, vector<16x64xf32> -> vector<144x64xf32>
    %cst_259 = arith.constant dense<0.000000e+00> : vector<32x64xf32>
    %332 = tpu.matmul %328, %331, %cst_259 {dimension_numbers = #tpu.dot_dimension_numbers<[1], [0], [0], [1], [0, 0, 1, 1], [], []>} : vector<32x144xf32>, vector<144x64xf32>, vector<32x64xf32> -> vector<32x64xf32>
    %333 = arith.maximumf %330, %332 : vector<32x64xf32>
    %334 = tpu.concatenate %283, %287, %291, %299, %303, %307, %315, %319, %323 in 0 : vector<16x64xf32>, vector<16x64xf32>, vector<16x64xf32>, vector<16x64xf32>, vector<16x64xf32>, vector<16x64xf32>, vector<16x64xf32>, vector<16x64xf32>, vector<16x64xf32> -> vector<144x64xf32>
    %cst_260 = arith.constant dense<0.000000e+00> : vector<32x64xf32>
    %335 = tpu.matmul %328, %334, %cst_260 {dimension_numbers = #tpu.dot_dimension_numbers<[1], [0], [0], [1], [0, 0, 1, 1], [], []>} : vector<32x144xf32>, vector<144x64xf32>, vector<32x64xf32> -> vector<32x64xf32>
    %336 = arith.maximumf %333, %335 : vector<32x64xf32>
    %337 = tpu.concatenate %287, %291, %295, %303, %307, %311, %319, %323, %327 in 0 : vector<16x64xf32>, vector<16x64xf32>, vector<16x64xf32>, vector<16x64xf32>, vector<16x64xf32>, vector<16x64xf32>, vector<16x64xf32>, vector<16x64xf32>, vector<16x64xf32> -> vector<144x64xf32>
    %cst_261 = arith.constant dense<0.000000e+00> : vector<32x64xf32>
    %338 = tpu.matmul %328, %337, %cst_261 {dimension_numbers = #tpu.dot_dimension_numbers<[1], [0], [0], [1], [0, 0, 1, 1], [], []>} : vector<32x144xf32>, vector<144x64xf32>, vector<32x64xf32> -> vector<32x64xf32>
    %339 = arith.maximumf %336, %338 : vector<32x64xf32>
    %c0_262 = arith.constant 0 : index
    %c0_263 = arith.constant 0 : index
    %340 = vector.load %arg5[%c0_262, %c0_263] : memref<32x1xf32, #tpu.memory_space<vmem>>, vector<32x1xf32>
    %341 = vector.broadcast %340 : vector<32x1xf32> to vector<32x64xf32>
    %342 = arith.addf %339, %341 : vector<32x64xf32>
    %cst_264 = arith.constant 0.000000e+00 : f32
    %343 = vector.broadcast %cst_264 : f32 to vector<32x64xf32>
    %344 = arith.maximumf %342, %343 : vector<32x64xf32>
    %345 = vector.extract_strided_slice %344 {offsets = [0, 0], sizes = [1, 64], strides = [1, 1]} : vector<32x64xf32> to vector<1x64xf32>
    %c0_265 = arith.constant 0 : index
    %c0_266 = arith.constant 0 : index
    %346 = vector.load %arg12[%c0_265, %c0_266] : memref<1x2048xf32, #tpu.memory_space<vmem>>, vector<1x64xf32>
    tpu.vector_store %arg12[%c0_265, %c0_266], %345 {strides = array<i32>} : memref<1x2048xf32, #tpu.memory_space<vmem>>, vector<1x64xf32>,
    %347 = vector.extract_strided_slice %344 {offsets = [1, 0], sizes = [1, 64], strides = [1, 1]} : vector<32x64xf32> to vector<1x64xf32>
    %c0_267 = arith.constant 0 : index
    %c64 = arith.constant 64 : index
    %348 = vector.load %arg12[%c0_267, %c64] : memref<1x2048xf32, #tpu.memory_space<vmem>>, vector<1x64xf32>
    tpu.vector_store %arg12[%c0_267, %c64], %347 {strides = array<i32>} : memref<1x2048xf32, #tpu.memory_space<vmem>>, vector<1x64xf32>,
    %349 = vector.extract_strided_slice %344 {offsets = [2, 0], sizes = [1, 64], strides = [1, 1]} : vector<32x64xf32> to vector<1x64xf32>
    %c0_268 = arith.constant 0 : index
    %c128 = arith.constant 128 : index
    %350 = vector.load %arg12[%c0_268, %c128] : memref<1x2048xf32, #tpu.memory_space<vmem>>, vector<1x64xf32>
    tpu.vector_store %arg12[%c0_268, %c128], %349 {strides = array<i32>} : memref<1x2048xf32, #tpu.memory_space<vmem>>, vector<1x64xf32>,
    %351 = vector.extract_strided_slice %344 {offsets = [3, 0], sizes = [1, 64], strides = [1, 1]} : vector<32x64xf32> to vector<1x64xf32>
    %c0_269 = arith.constant 0 : index
    %c192 = arith.constant 192 : index
    %352 = vector.load %arg12[%c0_269, %c192] : memref<1x2048xf32, #tpu.memory_space<vmem>>, vector<1x64xf32>
    tpu.vector_store %arg12[%c0_269, %c192], %351 {strides = array<i32>} : memref<1x2048xf32, #tpu.memory_space<vmem>>, vector<1x64xf32>,
    %353 = vector.extract_strided_slice %344 {offsets = [4, 0], sizes = [1, 64], strides = [1, 1]} : vector<32x64xf32> to vector<1x64xf32>
    %c0_270 = arith.constant 0 : index
    %c256 = arith.constant 256 : index
    %354 = vector.load %arg12[%c0_270, %c256] : memref<1x2048xf32, #tpu.memory_space<vmem>>, vector<1x64xf32>
    tpu.vector_store %arg12[%c0_270, %c256], %353 {strides = array<i32>} : memref<1x2048xf32, #tpu.memory_space<vmem>>, vector<1x64xf32>,
    %355 = vector.extract_strided_slice %344 {offsets = [5, 0], sizes = [1, 64], strides = [1, 1]} : vector<32x64xf32> to vector<1x64xf32>
    %c0_271 = arith.constant 0 : index
    %c320 = arith.constant 320 : index
    %356 = vector.load %arg12[%c0_271, %c320] : memref<1x2048xf32, #tpu.memory_space<vmem>>, vector<1x64xf32>
    tpu.vector_store %arg12[%c0_271, %c320], %355 {strides = array<i32>} : memref<1x2048xf32, #tpu.memory_space<vmem>>, vector<1x64xf32>,
    %357 = vector.extract_strided_slice %344 {offsets = [6, 0], sizes = [1, 64], strides = [1, 1]} : vector<32x64xf32> to vector<1x64xf32>
    %c0_272 = arith.constant 0 : index
    %c384 = arith.constant 384 : index
    %358 = vector.load %arg12[%c0_272, %c384] : memref<1x2048xf32, #tpu.memory_space<vmem>>, vector<1x64xf32>
    tpu.vector_store %arg12[%c0_272, %c384], %357 {strides = array<i32>} : memref<1x2048xf32, #tpu.memory_space<vmem>>, vector<1x64xf32>,
    %359 = vector.extract_strided_slice %344 {offsets = [7, 0], sizes = [1, 64], strides = [1, 1]} : vector<32x64xf32> to vector<1x64xf32>
    %c0_273 = arith.constant 0 : index
    %c448 = arith.constant 448 : index
    %360 = vector.load %arg12[%c0_273, %c448] : memref<1x2048xf32, #tpu.memory_space<vmem>>, vector<1x64xf32>
    tpu.vector_store %arg12[%c0_273, %c448], %359 {strides = array<i32>} : memref<1x2048xf32, #tpu.memory_space<vmem>>, vector<1x64xf32>,
    %361 = vector.extract_strided_slice %344 {offsets = [8, 0], sizes = [1, 64], strides = [1, 1]} : vector<32x64xf32> to vector<1x64xf32>
    %c0_274 = arith.constant 0 : index
    %c512 = arith.constant 512 : index
    %362 = vector.load %arg12[%c0_274, %c512] : memref<1x2048xf32, #tpu.memory_space<vmem>>, vector<1x64xf32>
    tpu.vector_store %arg12[%c0_274, %c512], %361 {strides = array<i32>} : memref<1x2048xf32, #tpu.memory_space<vmem>>, vector<1x64xf32>,
    %363 = vector.extract_strided_slice %344 {offsets = [9, 0], sizes = [1, 64], strides = [1, 1]} : vector<32x64xf32> to vector<1x64xf32>
    %c0_275 = arith.constant 0 : index
    %c576 = arith.constant 576 : index
    %364 = vector.load %arg12[%c0_275, %c576] : memref<1x2048xf32, #tpu.memory_space<vmem>>, vector<1x64xf32>
    tpu.vector_store %arg12[%c0_275, %c576], %363 {strides = array<i32>} : memref<1x2048xf32, #tpu.memory_space<vmem>>, vector<1x64xf32>,
    %365 = vector.extract_strided_slice %344 {offsets = [10, 0], sizes = [1, 64], strides = [1, 1]} : vector<32x64xf32> to vector<1x64xf32>
    %c0_276 = arith.constant 0 : index
    %c640 = arith.constant 640 : index
    %366 = vector.load %arg12[%c0_276, %c640] : memref<1x2048xf32, #tpu.memory_space<vmem>>, vector<1x64xf32>
    tpu.vector_store %arg12[%c0_276, %c640], %365 {strides = array<i32>} : memref<1x2048xf32, #tpu.memory_space<vmem>>, vector<1x64xf32>,
    %367 = vector.extract_strided_slice %344 {offsets = [11, 0], sizes = [1, 64], strides = [1, 1]} : vector<32x64xf32> to vector<1x64xf32>
    %c0_277 = arith.constant 0 : index
    %c704 = arith.constant 704 : index
    %368 = vector.load %arg12[%c0_277, %c704] : memref<1x2048xf32, #tpu.memory_space<vmem>>, vector<1x64xf32>
    tpu.vector_store %arg12[%c0_277, %c704], %367 {strides = array<i32>} : memref<1x2048xf32, #tpu.memory_space<vmem>>, vector<1x64xf32>,
    %369 = vector.extract_strided_slice %344 {offsets = [12, 0], sizes = [1, 64], strides = [1, 1]} : vector<32x64xf32> to vector<1x64xf32>
    %c0_278 = arith.constant 0 : index
    %c768 = arith.constant 768 : index
    %370 = vector.load %arg12[%c0_278, %c768] : memref<1x2048xf32, #tpu.memory_space<vmem>>, vector<1x64xf32>
    tpu.vector_store %arg12[%c0_278, %c768], %369 {strides = array<i32>} : memref<1x2048xf32, #tpu.memory_space<vmem>>, vector<1x64xf32>,
    %371 = vector.extract_strided_slice %344 {offsets = [13, 0], sizes = [1, 64], strides = [1, 1]} : vector<32x64xf32> to vector<1x64xf32>
    %c0_279 = arith.constant 0 : index
    %c832 = arith.constant 832 : index
    %372 = vector.load %arg12[%c0_279, %c832] : memref<1x2048xf32, #tpu.memory_space<vmem>>, vector<1x64xf32>
    tpu.vector_store %arg12[%c0_279, %c832], %371 {strides = array<i32>} : memref<1x2048xf32, #tpu.memory_space<vmem>>, vector<1x64xf32>,
    %373 = vector.extract_strided_slice %344 {offsets = [14, 0], sizes = [1, 64], strides = [1, 1]} : vector<32x64xf32> to vector<1x64xf32>
    %c0_280 = arith.constant 0 : index
    %c896 = arith.constant 896 : index
    %374 = vector.load %arg12[%c0_280, %c896] : memref<1x2048xf32, #tpu.memory_space<vmem>>, vector<1x64xf32>
    tpu.vector_store %arg12[%c0_280, %c896], %373 {strides = array<i32>} : memref<1x2048xf32, #tpu.memory_space<vmem>>, vector<1x64xf32>,
    %375 = vector.extract_strided_slice %344 {offsets = [15, 0], sizes = [1, 64], strides = [1, 1]} : vector<32x64xf32> to vector<1x64xf32>
    %c0_281 = arith.constant 0 : index
    %c960 = arith.constant 960 : index
    %376 = vector.load %arg12[%c0_281, %c960] : memref<1x2048xf32, #tpu.memory_space<vmem>>, vector<1x64xf32>
    tpu.vector_store %arg12[%c0_281, %c960], %375 {strides = array<i32>} : memref<1x2048xf32, #tpu.memory_space<vmem>>, vector<1x64xf32>,
    %377 = vector.extract_strided_slice %344 {offsets = [16, 0], sizes = [1, 64], strides = [1, 1]} : vector<32x64xf32> to vector<1x64xf32>
    %c0_282 = arith.constant 0 : index
    %c1024 = arith.constant 1024 : index
    %378 = vector.load %arg12[%c0_282, %c1024] : memref<1x2048xf32, #tpu.memory_space<vmem>>, vector<1x64xf32>
    tpu.vector_store %arg12[%c0_282, %c1024], %377 {strides = array<i32>} : memref<1x2048xf32, #tpu.memory_space<vmem>>, vector<1x64xf32>,
    %379 = vector.extract_strided_slice %344 {offsets = [17, 0], sizes = [1, 64], strides = [1, 1]} : vector<32x64xf32> to vector<1x64xf32>
    %c0_283 = arith.constant 0 : index
    %c1088 = arith.constant 1088 : index
    %380 = vector.load %arg12[%c0_283, %c1088] : memref<1x2048xf32, #tpu.memory_space<vmem>>, vector<1x64xf32>
    tpu.vector_store %arg12[%c0_283, %c1088], %379 {strides = array<i32>} : memref<1x2048xf32, #tpu.memory_space<vmem>>, vector<1x64xf32>,
    %381 = vector.extract_strided_slice %344 {offsets = [18, 0], sizes = [1, 64], strides = [1, 1]} : vector<32x64xf32> to vector<1x64xf32>
    %c0_284 = arith.constant 0 : index
    %c1152 = arith.constant 1152 : index
    %382 = vector.load %arg12[%c0_284, %c1152] : memref<1x2048xf32, #tpu.memory_space<vmem>>, vector<1x64xf32>
    tpu.vector_store %arg12[%c0_284, %c1152], %381 {strides = array<i32>} : memref<1x2048xf32, #tpu.memory_space<vmem>>, vector<1x64xf32>,
    %383 = vector.extract_strided_slice %344 {offsets = [19, 0], sizes = [1, 64], strides = [1, 1]} : vector<32x64xf32> to vector<1x64xf32>
    %c0_285 = arith.constant 0 : index
    %c1216 = arith.constant 1216 : index
    %384 = vector.load %arg12[%c0_285, %c1216] : memref<1x2048xf32, #tpu.memory_space<vmem>>, vector<1x64xf32>
    tpu.vector_store %arg12[%c0_285, %c1216], %383 {strides = array<i32>} : memref<1x2048xf32, #tpu.memory_space<vmem>>, vector<1x64xf32>,
    %385 = vector.extract_strided_slice %344 {offsets = [20, 0], sizes = [1, 64], strides = [1, 1]} : vector<32x64xf32> to vector<1x64xf32>
    %c0_286 = arith.constant 0 : index
    %c1280 = arith.constant 1280 : index
    %386 = vector.load %arg12[%c0_286, %c1280] : memref<1x2048xf32, #tpu.memory_space<vmem>>, vector<1x64xf32>
    tpu.vector_store %arg12[%c0_286, %c1280], %385 {strides = array<i32>} : memref<1x2048xf32, #tpu.memory_space<vmem>>, vector<1x64xf32>,
    %387 = vector.extract_strided_slice %344 {offsets = [21, 0], sizes = [1, 64], strides = [1, 1]} : vector<32x64xf32> to vector<1x64xf32>
    %c0_287 = arith.constant 0 : index
    %c1344 = arith.constant 1344 : index
    %388 = vector.load %arg12[%c0_287, %c1344] : memref<1x2048xf32, #tpu.memory_space<vmem>>, vector<1x64xf32>
    tpu.vector_store %arg12[%c0_287, %c1344], %387 {strides = array<i32>} : memref<1x2048xf32, #tpu.memory_space<vmem>>, vector<1x64xf32>,
    %389 = vector.extract_strided_slice %344 {offsets = [22, 0], sizes = [1, 64], strides = [1, 1]} : vector<32x64xf32> to vector<1x64xf32>
    %c0_288 = arith.constant 0 : index
    %c1408 = arith.constant 1408 : index
    %390 = vector.load %arg12[%c0_288, %c1408] : memref<1x2048xf32, #tpu.memory_space<vmem>>, vector<1x64xf32>
    tpu.vector_store %arg12[%c0_288, %c1408], %389 {strides = array<i32>} : memref<1x2048xf32, #tpu.memory_space<vmem>>, vector<1x64xf32>,
    %391 = vector.extract_strided_slice %344 {offsets = [23, 0], sizes = [1, 64], strides = [1, 1]} : vector<32x64xf32> to vector<1x64xf32>
    %c0_289 = arith.constant 0 : index
    %c1472 = arith.constant 1472 : index
    %392 = vector.load %arg12[%c0_289, %c1472] : memref<1x2048xf32, #tpu.memory_space<vmem>>, vector<1x64xf32>
    tpu.vector_store %arg12[%c0_289, %c1472], %391 {strides = array<i32>} : memref<1x2048xf32, #tpu.memory_space<vmem>>, vector<1x64xf32>,
    %393 = vector.extract_strided_slice %344 {offsets = [24, 0], sizes = [1, 64], strides = [1, 1]} : vector<32x64xf32> to vector<1x64xf32>
    %c0_290 = arith.constant 0 : index
    %c1536 = arith.constant 1536 : index
    %394 = vector.load %arg12[%c0_290, %c1536] : memref<1x2048xf32, #tpu.memory_space<vmem>>, vector<1x64xf32>
    tpu.vector_store %arg12[%c0_290, %c1536], %393 {strides = array<i32>} : memref<1x2048xf32, #tpu.memory_space<vmem>>, vector<1x64xf32>,
    %395 = vector.extract_strided_slice %344 {offsets = [25, 0], sizes = [1, 64], strides = [1, 1]} : vector<32x64xf32> to vector<1x64xf32>
    %c0_291 = arith.constant 0 : index
    %c1600 = arith.constant 1600 : index
    %396 = vector.load %arg12[%c0_291, %c1600] : memref<1x2048xf32, #tpu.memory_space<vmem>>, vector<1x64xf32>
    tpu.vector_store %arg12[%c0_291, %c1600], %395 {strides = array<i32>} : memref<1x2048xf32, #tpu.memory_space<vmem>>, vector<1x64xf32>,
    %397 = vector.extract_strided_slice %344 {offsets = [26, 0], sizes = [1, 64], strides = [1, 1]} : vector<32x64xf32> to vector<1x64xf32>
    %c0_292 = arith.constant 0 : index
    %c1664 = arith.constant 1664 : index
    %398 = vector.load %arg12[%c0_292, %c1664] : memref<1x2048xf32, #tpu.memory_space<vmem>>, vector<1x64xf32>
    tpu.vector_store %arg12[%c0_292, %c1664], %397 {strides = array<i32>} : memref<1x2048xf32, #tpu.memory_space<vmem>>, vector<1x64xf32>,
    %399 = vector.extract_strided_slice %344 {offsets = [27, 0], sizes = [1, 64], strides = [1, 1]} : vector<32x64xf32> to vector<1x64xf32>
    %c0_293 = arith.constant 0 : index
    %c1728 = arith.constant 1728 : index
    %400 = vector.load %arg12[%c0_293, %c1728] : memref<1x2048xf32, #tpu.memory_space<vmem>>, vector<1x64xf32>
    tpu.vector_store %arg12[%c0_293, %c1728], %399 {strides = array<i32>} : memref<1x2048xf32, #tpu.memory_space<vmem>>, vector<1x64xf32>,
    %401 = vector.extract_strided_slice %344 {offsets = [28, 0], sizes = [1, 64], strides = [1, 1]} : vector<32x64xf32> to vector<1x64xf32>
    %c0_294 = arith.constant 0 : index
    %c1792 = arith.constant 1792 : index
    %402 = vector.load %arg12[%c0_294, %c1792] : memref<1x2048xf32, #tpu.memory_space<vmem>>, vector<1x64xf32>
    tpu.vector_store %arg12[%c0_294, %c1792], %401 {strides = array<i32>} : memref<1x2048xf32, #tpu.memory_space<vmem>>, vector<1x64xf32>,
    %403 = vector.extract_strided_slice %344 {offsets = [29, 0], sizes = [1, 64], strides = [1, 1]} : vector<32x64xf32> to vector<1x64xf32>
    %c0_295 = arith.constant 0 : index
    %c1856 = arith.constant 1856 : index
    %404 = vector.load %arg12[%c0_295, %c1856] : memref<1x2048xf32, #tpu.memory_space<vmem>>, vector<1x64xf32>
    tpu.vector_store %arg12[%c0_295, %c1856], %403 {strides = array<i32>} : memref<1x2048xf32, #tpu.memory_space<vmem>>, vector<1x64xf32>,
    %405 = vector.extract_strided_slice %344 {offsets = [30, 0], sizes = [1, 64], strides = [1, 1]} : vector<32x64xf32> to vector<1x64xf32>
    %c0_296 = arith.constant 0 : index
    %c1920 = arith.constant 1920 : index
    %406 = vector.load %arg12[%c0_296, %c1920] : memref<1x2048xf32, #tpu.memory_space<vmem>>, vector<1x64xf32>
    tpu.vector_store %arg12[%c0_296, %c1920], %405 {strides = array<i32>} : memref<1x2048xf32, #tpu.memory_space<vmem>>, vector<1x64xf32>,
    %407 = vector.extract_strided_slice %344 {offsets = [31, 0], sizes = [1, 64], strides = [1, 1]} : vector<32x64xf32> to vector<1x64xf32>
    %c0_297 = arith.constant 0 : index
    %c1984 = arith.constant 1984 : index
    %408 = vector.load %arg12[%c0_297, %c1984] : memref<1x2048xf32, #tpu.memory_space<vmem>>, vector<1x64xf32>
    tpu.vector_store %arg12[%c0_297, %c1984], %407 {strides = array<i32>} : memref<1x2048xf32, #tpu.memory_space<vmem>>, vector<1x64xf32>,
    %c0_298 = arith.constant 0 : index
    %c0_299 = arith.constant 0 : index
    %409 = vector.load %arg12[%c0_298, %c0_299] : memref<1x2048xf32, #tpu.memory_space<vmem>>, vector<1x2048xf32>
    %410 = arith.truncf %409 : vector<1x2048xf32> to vector<1x2048xbf16>
    %c0_300 = arith.constant 0 : index
    %c0_301 = arith.constant 0 : index
    %411 = vector.load %arg7[%c0_300, %c0_301] : memref<2048x256xbf16, #tpu.memory_space<vmem>>, vector<2048x256xbf16>
    %cst_302 = arith.constant dense<0.000000e+00> : vector<1x256xf32>
    %412 = tpu.matmul %410, %411, %cst_302 {dimension_numbers = #tpu.dot_dimension_numbers<[1], [0], [0], [1], [0, 0, 1, 1], [], []>} : vector<1x2048xbf16>, vector<2048x256xbf16>, vector<1x256xf32> -> vector<1x256xf32>
    %c0_303 = arith.constant 0 : index
    %c0_304 = arith.constant 0 : index
    %413 = vector.load %arg8[%c0_303, %c0_304] : memref<1x256xf32, #tpu.memory_space<vmem>>, vector<1x256xf32>
    %414 = arith.addf %412, %413 : vector<1x256xf32>
    %cst_305 = arith.constant 0.000000e+00 : f32
    %415 = vector.broadcast %cst_305 : f32 to vector<1x256xf32>
    %416 = arith.maximumf %414, %415 : vector<1x256xf32>
    %417 = arith.truncf %416 : vector<1x256xf32> to vector<1x256xbf16>
    %c0_306 = arith.constant 0 : index
    %c0_307 = arith.constant 0 : index
    %418 = vector.load %arg9[%c0_306, %c0_307] : memref<256x10xbf16, #tpu.memory_space<vmem>>, vector<256x10xbf16>
    %cst_308 = arith.constant dense<0.000000e+00> : vector<1x10xf32>
    %419 = tpu.matmul %417, %418, %cst_308 {dimension_numbers = #tpu.dot_dimension_numbers<[1], [0], [0], [1], [0, 0, 1, 1], [], []>} : vector<1x256xbf16>, vector<256x10xbf16>, vector<1x10xf32> -> vector<1x10xf32>
    %c0_309 = arith.constant 0 : index
    %c0_310 = arith.constant 0 : index
    %420 = vector.load %arg10[%c0_309, %c0_310] : memref<1x10xf32, #tpu.memory_space<vmem>>, vector<1x10xf32>
    %421 = arith.addf %419, %420 : vector<1x10xf32>
    %c0_311 = arith.constant 0 : index
    %c0_312 = arith.constant 0 : index
    %c0_313 = arith.constant 0 : index
    %422 = vector.load %arg11[%c0_311, %c0_312, %c0_313] : memref<1x1x10xf32, #tpu.memory_space<vmem>>, vector<1x1x10xf32>
    %423 = vector.shape_cast %422 : vector<1x1x10xf32> to vector<1x10xf32>
    %424 = vector.shape_cast %421 : vector<1x10xf32> to vector<1x1x10xf32>
    tpu.vector_store %arg11[%c0_311, %c0_312, %c0_313], %424 {strides = array<i32>} : memref<1x1x10xf32, #tpu.memory_space<vmem>>, vector<1x1x10xf32>,
    return
  }
  func.func @transform_0(%arg0: i32) -> (i32, i32, i32) {
    %c0_i32 = arith.constant 0 : i32
    %c0_i32_0 = arith.constant 0 : i32
    %c0_i32_1 = arith.constant 0 : i32
    return %arg0, %c0_i32, %c0_i32_0 : i32, i32, i32
  }
  func.func @transform_1(%arg0: i32) -> (i32, i32) {
    %c0_i32 = arith.constant 0 : i32
    %c0_i32_0 = arith.constant 0 : i32
    %c0_i32_1 = arith.constant 0 : i32
    return %c0_i32, %c0_i32_0 : i32, i32
  }
  func.func @transform_2(%arg0: i32) -> (i32, i32) {
    %c0_i32 = arith.constant 0 : i32
    %c0_i32_0 = arith.constant 0 : i32
    %c0_i32_1 = arith.constant 0 : i32
    return %c0_i32, %c0_i32_0 : i32, i32
  }
  func.func @transform_3(%arg0: i32) -> (i32, i32) {
    %c0_i32 = arith.constant 0 : i32
    %c0_i32_0 = arith.constant 0 : i32
    %c0_i32_1 = arith.constant 0 : i32
    return %c0_i32, %c0_i32_0 : i32, i32
  }
  func.func @transform_4(%arg0: i32) -> (i32, i32) {
    %c0_i32 = arith.constant 0 : i32
    %c0_i32_0 = arith.constant 0 : i32
    %c0_i32_1 = arith.constant 0 : i32
    return %c0_i32, %c0_i32_0 : i32, i32
  }
  func.func @transform_5(%arg0: i32) -> (i32, i32, i32, i32) {
    %c0_i32 = arith.constant 0 : i32
    %c0_i32_0 = arith.constant 0 : i32
    %c0_i32_1 = arith.constant 0 : i32
    %c0_i32_2 = arith.constant 0 : i32
    %c0_i32_3 = arith.constant 0 : i32
    return %c0_i32, %c0_i32_0, %c0_i32_1, %c0_i32_2 : i32, i32, i32, i32
  }
  func.func @transform_6(%arg0: i32) -> (i32, i32) {
    %c0_i32 = arith.constant 0 : i32
    %c0_i32_0 = arith.constant 0 : i32
    %c0_i32_1 = arith.constant 0 : i32
    return %c0_i32, %c0_i32_0 : i32, i32
  }
  func.func @transform_7(%arg0: i32) -> (i32, i32) {
    %c0_i32 = arith.constant 0 : i32
    %c0_i32_0 = arith.constant 0 : i32
    %c0_i32_1 = arith.constant 0 : i32
    return %c0_i32, %c0_i32_0 : i32, i32
  }
  func.func @transform_8(%arg0: i32) -> (i32, i32) {
    %c0_i32 = arith.constant 0 : i32
    %c0_i32_0 = arith.constant 0 : i32
    %c0_i32_1 = arith.constant 0 : i32
    return %c0_i32, %c0_i32_0 : i32, i32
  }
  func.func @transform_9(%arg0: i32) -> (i32, i32) {
    %c0_i32 = arith.constant 0 : i32
    %c0_i32_0 = arith.constant 0 : i32
    %c0_i32_1 = arith.constant 0 : i32
    return %c0_i32, %c0_i32_0 : i32, i32
  }
  func.func @transform_10(%arg0: i32) -> (i32, i32, i32) {
    %c0_i32 = arith.constant 0 : i32
    %c0_i32_0 = arith.constant 0 : i32
    %c0_i32_1 = arith.constant 0 : i32
    return %arg0, %c0_i32, %c0_i32_0 : i32, i32, i32
  }
}

</mosaic_0001>

<bundles_post_ra>
// kernel: audio_cnn_forward.1
= control target key start
LH: loop header
LB: loop body
LE: loop exit
PB: predicated region body
PF: predicated region fallthrough
CT: control target
= control target key end

     0   :  { %s13721_s0 = inlined_call_operand.vmem [shape: f32[2,8,272], index: 0, kind: input, shape index: {}]   ;;  %s13722_s1 = inlined_call_operand.vmem [shape: f32[16,9], index: 1, kind: input, shape index: {}]   ;;  %s13723_s2 = inlined_call_operand.vmem [shape: f32[16,1], index: 2, kind: input, shape index: {}]   ;;  %s13724_s3 = inlined_call_operand.vmem [shape: f32[32,144], index: 3, kind: input, shape index: {}]   ;;  %s13725_s4 = inlined_call_operand.vmem [shape: f32[32,1], index: 4, kind: input, shape index: {}]   ;;  %s13726_s5 = inlined_call_operand.vmem [shape: bf16[4,4,256,64], index: 5, kind: input, shape index: {}]   ;;  %s13727_s6 = inlined_call_operand.vmem [shape: bf16[2048,256], index: 6, kind: input, shape index: {}]   ;;  %s13728_s7 = inlined_call_operand.vmem [shape: f32[1,256], index: 7, kind: input, shape index: {}]   ;;  %s13729_s8 = inlined_call_operand.vmem [shape: bf16[256,10], index: 8, kind: input, shape index: {}]   ;;  %s13730_s9 = inlined_call_operand.vmem [shape: f32[1,10], index: 9, kind: input, shape index: {}]   ;;  %s13731_s10 = inlined_call_operand.hbm [shape: f32[2,1,10], index: 10, kind: output, shape index: {}]  }
   0x1   :  { %13773 = sst [smem:[#allocation53_spill]] %s13721_s0 }
   0x2   :  { %15 = vsyncpa [#allocation4], 0 }
   0x3   :  { %17 = vsyncpa [#allocation4 + $0x1], 0  ;;  %s10613_s13 = smov 0   ;;  %s10615_s14 = smov 0  }
   0x4   :  { %s10617_s15 = smov 0   ;;  %s10619_s16 = smov 0  }
   0x5 LB: > { %s10634_s17 = sadd.s32 4294967295, %s10542_s16   ;;  %s6660_s18 = sadd.s32 4294967294, %s10542_s16   ;;  %s10542_s16 = sphi %s10619_s16, %s13879_s16   ;;  %s10538_s15 = sphi %s10617_s15, %s13878_s15   ;;  %s10534_s14 = sphi %s10615_s14, %s13877_s14   ;;  %s10530_s13 = sphi %s10613_s13, %s13876_s13  }
   0x6   : > { %s10638_s19 = sadd.s32 1, %s10542_s16   ;;  %s245_s20 = sadd.s32 1, %s10538_s15 }
   0x7   : > { %s242_s21 = ssub.s32 %s10542_s16, %s10638_s19  ;;  %p255_p0 = scmp.ne.s32.totalorder %s10538_s15, %s10534_s14 }
   0x8   : > { %p243_p1 = scmp.eq.s32.totalorder %s242_s21, 0  ;;  %p256_p2 = scmp.eq.s32.totalorder %s10634_s17, 1 }
   0x9   : > { %p261_p3 = scmp.ne.s32.totalorder %s10534_s14, %s10530_s13  ;;  %p262_p4 = scmp.eq.s32.totalorder %s6660_s18, 1 }
   0xa   : > { %s10649_s22 = scalar_select %p243_p1, %s10538_s15, %s245_s20  }
   0xb   : > { %p10651_p5 = por %p256_p2, %p255_p0  ;;  %p10655_p6 = por %p262_p4, %p261_p3 }
   0xc   : > { %p6663_p7 = scmp.ge.s32.totalorder %s10542_s16, 1  ;;  %p315_p8 = scmp.lt.s32.totalorder %s10542_s16, 3 }
   0xe   : > { %p316_p9 = pnand %p6663_p7, %p315_p8 }
  0x10   : > { %319 = sbr.rel (%p316_p9) target bundleno = 2027 (0x7eb), region = 60 }
  0x17   : > { %v359_v0 = vld [vmem:[%s13722_s1] sm:$0xff]  ;;  %v10544_v1 = vmov 5   ;;  %v10545_v2 = vmov 3   ;;  %v10546_v3 = vmov 6   ;;  %v10547_v4 = vmov 4   ;;  %v10667_v5 = vld [vmem:[%s13722_s1 + $0x8] sm:$0xff] }
  0x18   : > { %10062 = vset.pattern.permute.xlu1 %v10544_v1  ;;  %10060 = vset.pattern.permute.xlu0 %v10545_v2  ;;  %v10548_v6 = vmov 7   ;;  %v10549_v7 = vmov 8   ;;  %v10550_v8 = vmov 2   ;;  %v10551_v9 = vmov 1   ;;  %p352_p10 = scmp.lt.s32.totalorder %s10634_s17, 1  ;;  %s13777_s0 = sld [smem:[#allocation53_spill]] }
  0x19   : > { %509 = vperm.xlu1 %10062, %v359_v0   ;;  %451 = vperm.xlu0 %10060, %v359_v0   ;;  %v10552_v10 = vmov 0   ;;  %v13732_v11 = vlaneseq  ;;  %s10553_s20 = smov 112   ;;  %vm584_vm0 = vcmask 916480   ;;  %vm3745_vm1 = vcmask 130048   ;;  %s10556_s25 = smov 64  }
  0x1a   : > { %s353_s29 = scalar_select %p352_p10, %s10634_s17, 1  ;;  %vm6590_vm6 = vcmask 73728  }
  0x1b   : > { %v10681_v12 = vshrl.u32 %v13732_v11, 7  ;;  %s350_s26 = sand.u32 1, %s10534_s14  }
  0x1c   : > { %s10007_s30 = smul.u32 24, %s353_s29  ;;  %s7447_s29 = sshll.u32 %s10634_s17, 4 }
  0x1d   : > { %10063 = vset.pattern.permute.xlu1 %v10546_v3  ;;  %10061 = vset.pattern.permute.xlu0 %v10547_v4  ;;  %13776 = vst [vmem:[#allocation6_spill] sm:$0xff] %v10681_v12  ;;  %v10689_v13 = vsub.s32 1, %v10681_v12  ;;  %v10692_v14 = vsub.s32 0, %v10681_v12  ;;  %v10702_v18 = vsub.s32 2, %v10681_v12  ;;  %s6593_s12 = scalar_lea.sflag [#allocation4], %s350_s26 }
  0x1e   : > { %537 = vperm.xlu1 %10063, %v359_v0   ;;  %480 = vperm.xlu0 %10061, %v359_v0   ;;  %s10686_s18 = scalar_lea.vmem %s13777_s0, %s10007_s30  ;;  %s351_s0 = scalar_lea.vmem [#allocation3], %s350_s26 }
  0x1f   : > { %13778 = vst [vmem:[#allocation7_spill] sm:$0xff] %v10689_v13  ;;  %13779 = vst [vmem:[#allocation8_spill] sm:$0xff] %v10692_v14  ;;  %v535_v15 = vld [vmem:[%s10686_s18] ss:$8 sm:$0x7]  ;;  %s6605_s30 = sshll.u32 %s351_s0, 4  ;;  %s13681_s30 = int_to_ptr.vmem [resolvable:$true] %s6605_s30 }
  0x20   : > { %v10696_v16 = vrot.slane %v535_v15, %v10689_v13  ;;  %v10699_v17 = vrot.slane %v535_v15, %v10692_v14  ;;  %13780 = vst [vmem:[#allocation9_spill] sm:$0xff] %v10702_v18  ;;  %v10711_v22 = vrot.slane %v535_v15, %v10702_v18  ;;  %v6670_v23 = vld [vmem:[%s10686_s18 + $0x2] ss:$8 sm:$0x7]  ;;  %s10480_s17 = scalar_lea.vmem %s13681_s30, 16 }
  0x21   : > { %v10717_v24 = vrot.slane %v6670_v23, %v10702_v18  ;;  %v10724_v27 = vrot.slane %v6670_v23, %v10689_v13  ;;  %v10737_v32 = vrot.slane %v6670_v23, %v10692_v14  ;;  %v6671_v40 = vld [vmem:[%s10686_s18 + $0x1] ss:$8 sm:$0x7]  ;;  %v6675_v56 = vld [vmem:[%s10686_s18 + $0x4] ss:$8 sm:$0x7]  ;;  %p10481_p11 = scmp.ne.s32.totalorder %s13681_s30, %s10480_s17 }
  0x22   : > { %10064 = vset.pattern.permute.xlu1 %v10548_v6  ;;  %10067 = vset.pattern.permute.xlu0 %v10544_v1  ;;  %v10763_v41 = vrot.slane %v6671_v40, %v10702_v18  ;;  %v10771_v44 = vrot.slane %v6671_v40, %v10689_v13  ;;  %v10785_v49 = vrot.slane %v6671_v40, %v10692_v14  ;;  %v6674_v59 = vld [vmem:[%s10686_s18 + $0x3] ss:$8 sm:$0x7] }
  0x23   : > { %599 = vperm.xlu1 %10064, %v359_v0   ;;  %513 = vperm.xlu0 %10067, %v10667_v5   ;;  %v10809_v58 = vrot.slane %v6675_v56, %v10702_v18  ;;  %v10817_v61 = vrot.slane %v6675_v56, %v10689_v13  ;;  %v10822_v63 = vrot.slane %v6674_v59, %v10702_v18  ;;  %p10482_p12 = pnand %p10481_p11, %p10651_p5 }
  0x24   : > { %v10829_v1 = vrot.slane %v6674_v59, %v10689_v13  ;;  %v10849_v15 = vrot.slane %v6675_v56, %v10692_v14  ;;  %v7451_v56 = vld [vmem:[%s13726_s5] sm:$0xff]  }
  0x25   : > { %p10483_p13 = pneg %p10482_p12 }
  0x27   : > { %10065 = vset.pattern.permute.xlu1 %v10545_v2  ;;  %10068 = vset.pattern.permute.xlu0 %v10549_v7  ;;  %v10842_v7 = vrot.slane %v6674_v59, %v10692_v14  ;;  %v8489_v59 = vld [vmem:[%s13726_s5 + $0x80] sm:$0xff]  }
  0x28   : > { %455 = vperm.xlu1 %10065, %v10667_v5   ;;  %660 = vperm.xlu0 %10068, %v359_v0  }
  0x2c   : > { %10066 = vset.pattern.permute.xlu1 %v10547_v4  ;;  %664 = vperm.xlu0 %10068, %v10667_v5  }
  0x2d   : > { %484 = vperm.xlu1 %10066, %v10667_v5  }
  0x30   : > { %10073 = vset.pattern.permute.xlu0 %v10550_v8 }
  0x31   : > { %10069 = vset.pattern.permute.xlu1 %v10546_v3  ;;  %422 = vperm.xlu0 %10073, %v359_v0  }
  0x32   : > { %541 = vperm.xlu1 %10069, %v10667_v5  }
  0x35   : > { %10075 = vset.pattern.permute.xlu0 %v10551_v9 }
  0x36   : > { %10070 = vset.pattern.permute.xlu1 %v10548_v6 }
  0x37   : > { %603 = vperm.xlu1 %10070, %v10667_v5  }
  0x3b   : > { %10071 = vset.pattern.permute.xlu1 %v10552_v10 }
  0x3c   : > { %363 = vperm.xlu1 %10071, %v359_v0  }
  0x40   : > { %10072 = vset.pattern.permute.xlu1 %v10551_v9 }
  0x41   : > { %393 = vperm.xlu1 %10072, %v359_v0  }
  0x45   : > { %10074 = vset.pattern.permute.xlu1 %v10552_v10 }
  0x98   : > { %v10704_v19 = vpop.permute.xlu0 %451  ;;  %v10732_v30 = vpop.permute.xlu1 %509 }
  0x99   : > { %v947_v20 = vmul.f32 %v10696_v16, %v10704_v19  ;;  %v946_v21 = vmul.f32 %v10699_v17, %v10704_v19  ;;  %v948_v26 = vmul.f32 %v10711_v22, %v10704_v19  ;;  %v1243_v31 = vmul.f32 %v10717_v24, %v10704_v19 }
  0x9a   : > { %v1242_v33 = vmul.f32 %v10724_v27, %v10704_v19  ;;  %v1241_v34 = vmul.f32 %v10737_v32, %v10704_v19  ;;  %v1020_v43 = vmul.f32 %v10763_v41, %v10732_v30  ;;  %v1019_v45 = vmul.f32 %v10771_v44, %v10732_v30 }
  0x9b   : > { %960 = vrot.lane.b32.xlu1 %v947_v20, %s10553_s20  ;;  %958 = vrot.lane.b32.xlu0 %v946_v21, %s10553_s20  ;;  %v1018_v54 = vmul.f32 %v10785_v49, %v10732_v30  ;;  %v1315_v2 = vmul.f32 %v10822_v63, %v10732_v30  ;;  %v1314_v4 = vmul.f32 %v10829_v1, %v10732_v30 }
  0x9c   : > { %v1313_v20 = vmul.f32 %v10842_v7, %v10732_v30 }
  0x9d   : > { %v10719_v25 = vpop.permute.xlu0 %480  ;;  %v10745_v35 = vpop.permute.xlu1 %537 }
  0x9e   : > { %v984_v28 = vmul.f32 %v10717_v24, %v10719_v25  ;;  %v983_v29 = vmul.f32 %v10724_v27, %v10719_v25  ;;  %v562_v36 = vmul.f32 %v10711_v22, %v10745_v35  ;;  %v982_v37 = vmul.f32 %v10737_v32, %v10719_v25 }
  0x9f   : > { %962 = vrot.lane.b32.xlu1 %v948_v26, %s10553_s20  ;;  %v561_v38 = vmul.f32 %v10696_v16, %v10745_v35  ;;  %v795_v39 = vmul.f32 %v10717_v24, %v10745_v35  ;;  %v794_v42 = vmul.f32 %v10724_v27, %v10745_v35  ;;  %v1279_v46 = vmul.f32 %v10763_v41, %v10719_v25 }
  0xa0   : > { %998 = vrot.lane.b32.xlu0 %v984_v28, %s10553_s20  ;;  %v1278_v47 = vmul.f32 %v10771_v44, %v10719_v25  ;;  %v793_v48 = vmul.f32 %v10737_v32, %v10745_v35  ;;  %v560_v50 = vmul.f32 %v10699_v17, %v10745_v35  ;;  %v1277_v51 = vmul.f32 %v10785_v49, %v10719_v25 }
  0xa1   : > { %v1073_v62 = vmul.f32 %v10809_v58, %v10745_v35  ;;  %v1072_v0 = vmul.f32 %v10817_v61, %v10745_v35  ;;  %v1071_v26 = vmul.f32 %v10849_v15, %v10745_v35 }
  0xa2   : > { %v10793_v52 = vpop.permute.xlu1 %599  ;;  %v10835_v3 = vpop.permute.xlu0 %513 }
  0xa3   : > { %996 = vrot.lane.b32.xlu1 %v983_v29, %s10553_s20  ;;  %v624_v53 = vmul.f32 %v10717_v24, %v10793_v52  ;;  %v623_v55 = vmul.f32 %v10724_v27, %v10793_v52  ;;  %v831_v57 = vmul.f32 %v10763_v41, %v10793_v52  ;;  %v830_v60 = vmul.f32 %v10771_v44, %v10793_v52 }
  0xa4   : > { %1257 = vrot.lane.b32.xlu0 %v1243_v31, %s10553_s20  ;;  %13781 = vst [vmem:[#allocation10_spill] sm:$0xff] %v10835_v3  ;;  %v829_v6 = vmul.f32 %v10785_v49, %v10793_v52  ;;  %v622_v9 = vmul.f32 %v10737_v32, %v10793_v52  ;;  %v6676_v31 = vld [vmem:[%s10686_s18 + $0x6] ss:$8 sm:$0x7] }
  0xa7   : > { %1255 = vrot.lane.b32.xlu1 %v1242_v33, %s10553_s20  ;;  %v10853_v21 = vpop.permute.xlu0 %660  ;;  %v10871_v33 = vrot.slane %v6676_v31, %v10702_v18 }
  0xa8   : > { %1253 = vrot.lane.b32.xlu0 %v1241_v34, %s10553_s20  ;;  %v685_v23 = vmul.f32 %v10763_v41, %v10853_v21  ;;  %v684_v28 = vmul.f32 %v10771_v44, %v10853_v21  ;;  %v884_v29 = vmul.f32 %v10822_v63, %v10853_v21  ;;  %v883_v34 = vmul.f32 %v10829_v1, %v10853_v21 }
  0xab   : > { %994 = vrot.lane.b32.xlu1 %v982_v37, %s10553_s20  ;;  %v10879_v37 = vrot.slane %v6676_v31, %v10689_v13 }
  0xac   : > { %576 = vrot.lane.b32.xlu0 %v562_v36, %s10553_s20  ;;  %v1126_v36 = vmul.f32 %v10871_v33, %v10793_v52 }
  0xad   : > { %v1350_v40 = vmul.f32 %v10879_v37, %v10745_v35 }
  0xaf   : > { %574 = vrot.lane.b32.xlu1 %v561_v38, %s10553_s20  ;;  %v1125_v38 = vmul.f32 %v10879_v37, %v10793_v52 }
  0xb0   : > { %809 = vrot.lane.b32.xlu0 %v795_v39, %s10553_s20  ;;  %v1351_v39 = vmul.f32 %v10871_v33, %v10745_v35 }
  0xb3   : > { %807 = vrot.lane.b32.xlu1 %v794_v42, %s10553_s20  ;;  %v882_v42 = vmul.f32 %v10842_v7, %v10853_v21 }
  0xb4   : > { %1034 = vrot.lane.b32.xlu0 %v1020_v43, %s10553_s20  ;;  %v10893_v43 = vrot.slane %v6676_v31, %v10692_v14 }
  0xb7   : > { %1032 = vrot.lane.b32.xlu1 %v1019_v45, %s10553_s20  ;;  %v10895_v45 = vpop.permute.xlu1 %455 }
  0xb8   : > { %1293 = vrot.lane.b32.xlu0 %v1279_v46, %s10553_s20  ;;  %13782 = vst [vmem:[#allocation11_spill] sm:$0xff] %v10895_v45  ;;  %v683_v46 = vmul.f32 %v10785_v49, %v10853_v21 }
  0xbb   : > { %1291 = vrot.lane.b32.xlu1 %v1278_v47, %s10553_s20  ;;  %v6677_v47 = vld [vmem:[%s10686_s18 + $0x5] ss:$8 sm:$0x7] }
  0xbc   : > { %805 = vrot.lane.b32.xlu0 %v793_v48, %s10553_s20  ;;  %v1349_v48 = vmul.f32 %v10893_v43, %v10745_v35  ;;  %v8497_v35 = vld [vmem:[%s13726_s5 + $0xc0] sm:$0xff]  }
  0xbd   : > { %9392 = vmatprep.subr.bf16.mxu1 %v8497_v35  ;;  %v8501_v35 = vld [vmem:[%s13726_s5 + $0xe0] sm:$0xff]  }
  0xbe   : > { %9394 = vmatpush3.bf16.msra.mxu1 %v8489_v59 }
  0xbf   : > { %572 = vrot.lane.b32.xlu1 %v560_v50, %s10553_s20  ;;  %v10907_v50 = vrot.slane %v6677_v47, %v10702_v18 }
  0xc0   : > { %1289 = vrot.lane.b32.xlu0 %v1277_v51, %s10553_s20  ;;  %v10909_v51 = vpop.permute.xlu1 %484 }
  0xc1   : > { %13783 = vst [vmem:[#allocation12_spill] sm:$0xff] %v10909_v51 }
  0xc3   : > { %1030 = vrot.lane.b32.xlu1 %v1018_v54, %s10553_s20  ;;  %v1179_v54 = vmul.f32 %v10907_v50, %v10853_v21 }
  0xc4   : > { %638 = vrot.lane.b32.xlu0 %v624_v53, %s10553_s20  ;;  %v1124_v53 = vmul.f32 %v10893_v43, %v10793_v52 }
  0xc7   : > { %636 = vrot.lane.b32.xlu1 %v623_v55, %s10553_s20  ;;  %v8481_v55 = vld [vmem:[%s13726_s5 + $0x40] sm:$0xff]  }
  0xc8   : > { %845 = vrot.lane.b32.xlu0 %v831_v57, %s10553_s20  ;;  %v10926_v57 = vrot.slane %v6677_v47, %v10689_v13  ;;  %9360 = vmatprep.subr.bf16.mxu0 %v8481_v55  ;;  %v8485_v55 = vld [vmem:[%s13726_s5 + $0x60] sm:$0xff]  }
  0xc9   : > { %9362 = vmatpush3.bf16.msra.mxu0 %v7451_v56 }
  0xcb   : > { %843 = vrot.lane.b32.xlu1 %v830_v60, %s10553_s20  ;;  %v8482_v60 = vld [vmem:[%s13726_s5 + $0x48] sm:$0xff]  }
  0xcc   : > { %1087 = vrot.lane.b32.xlu0 %v1073_v62, %s10553_s20  ;;  %v8498_v62 = vld [vmem:[%s13726_s5 + $0xc8] sm:$0xff]   ;;  %9364 = vmatprep.subr.bf16.mxu0 %v8482_v60 }
  0xcd   : > { %9396 = vmatprep.subr.bf16.mxu1 %v8498_v62  ;;  %v8477_v62 = vld [vmem:[%s13726_s5 + $0x20] sm:$0xff]  }
  0xcf   : > { %1085 = vrot.lane.b32.xlu1 %v1072_v0, %s10553_s20  ;;  %v1178_v0 = vmul.f32 %v10926_v57, %v10853_v21 }
  0xd0   : > { %1329 = vrot.lane.b32.xlu0 %v1315_v2, %s10553_s20  ;;  %v1387_v2 = vmul.f32 %v10907_v50, %v10793_v52 }
  0xd3   : > { %1327 = vrot.lane.b32.xlu1 %v1314_v4, %s10553_s20  ;;  %v8474_v4 = vld [vmem:[%s13726_s5 + $0x8] sm:$0xff]  }
  0xd4   : > { %841 = vrot.lane.b32.xlu0 %v829_v6, %s10553_s20  ;;  %v8490_v6 = vld [vmem:[%s13726_s5 + $0x88] sm:$0xff]   ;;  %9366 = vmatpush3.bf16.msra.mxu0 %v8474_v4 }
  0xd5   : > { %9398 = vmatpush3.bf16.msra.mxu1 %v8490_v6 }
  0xd7   : > { %634 = vrot.lane.b32.xlu1 %v622_v9, %s10553_s20  ;;  %v10948_v9 = vpop.permute.xlu1 %541 }
  0xd8   : > { %1325 = vrot.lane.b32.xlu0 %v1313_v20, %s10553_s20  ;;  %v6678_v20 = vld [vmem:[%s10686_s18 + $0x7] ss:$8 sm:$0x7] }
  0xd9   : > { %v11009_v59 = vrot.slane %v6678_v20, %v10702_v18 }
  0xdb   : > { %1083 = vrot.lane.b32.xlu1 %v1071_v26, %s10553_s20  ;;  %v8483_v26 = vld [vmem:[%s13726_s5 + $0x50] sm:$0xff]   ;;  %v1440_v4 = vmul.f32 %v11009_v59, %v10853_v21 }
  0xdc   : > { %699 = vrot.lane.b32.xlu0 %v685_v23, %s10553_s20  ;;  %v10954_v23 = vrot.slane %v6677_v47, %v10692_v14  ;;  %9368 = vmatprep.subr.bf16.mxu0 %v8483_v26  ;;  %v951_v26 = vmul.f32 %v10711_v22, %v10895_v45 }
  0xde   : > { %v1177_v31 = vmul.f32 %v10954_v23, %v10853_v21  ;;  %v1385_v56 = vmul.f32 %v10954_v23, %v10793_v52 }
  0xdf   : > { %697 = vrot.lane.b32.xlu1 %v684_v28, %s10553_s20  ;;  %v8499_v28 = vld [vmem:[%s13726_s5 + $0xd0] sm:$0xff]  }
  0xe0   : > { %898 = vrot.lane.b32.xlu0 %v884_v29, %s10553_s20  ;;  %v1386_v29 = vmul.f32 %v10926_v57, %v10793_v52  ;;  %9400 = vmatprep.subr.bf16.mxu1 %v8499_v28  ;;  %v11021_v52 = vpop.permute.xlu0 %664  ;;  %v8486_v28 = vld [vmem:[%s13726_s5 + $0x68] sm:$0xff]  }
  0xe3   : > { %896 = vrot.lane.b32.xlu1 %v883_v34, %s10553_s20  ;;  %v10967_v34 = vrot.slane %v6678_v20, %v10689_v13 }
  0xe4   : > { %1140 = vrot.lane.b32.xlu0 %v1126_v36, %s10553_s20  ;;  %v8475_v36 = vld [vmem:[%s13726_s5 + $0x10] sm:$0xff]  }
  0xe5   : > { %9370 = vmatpush3.bf16.msra.mxu0 %v8475_v36  ;;  %v1439_v47 = vmul.f32 %v10967_v34, %v10853_v21 }
  0xe7   : > { %1138 = vrot.lane.b32.xlu1 %v1125_v38, %s10553_s20  ;;  %v8491_v38 = vld [vmem:[%s13726_s5 + $0x90] sm:$0xff]  }
  0xe8   : > { %1365 = vrot.lane.b32.xlu0 %v1351_v39, %s10553_s20  ;;  %v1478_v39 = vld [vmem:[%s13723_s2] sm:$0xff]  ;;  %9402 = vmatpush3.bf16.msra.mxu1 %v8491_v38 }
  0xeb   : > { %1363 = vrot.lane.b32.xlu1 %v1350_v40, %s10553_s20  ;;  %v8484_v40 = vld [vmem:[%s13726_s5 + $0x58] sm:$0xff]  }
  0xec   : > { %894 = vrot.lane.b32.xlu0 %v882_v42, %s10553_s20  ;;  %v8500_v42 = vld [vmem:[%s13726_s5 + $0xd8] sm:$0xff]   ;;  %9372 = vmatprep.subr.bf16.mxu0 %v8484_v40  ;;  %v8503_v40 = vld [vmem:[%s13726_s5 + $0xf0] sm:$0xff]  }
  0xed   : > { %9404 = vmatprep.subr.bf16.mxu1 %v8500_v42  ;;  %v8479_v42 = vld [vmem:[%s13726_s5 + $0x30] sm:$0xff]  }
  0xef   : > { %695 = vrot.lane.b32.xlu1 %v683_v46, %s10553_s20  ;;  %v10986_v46 = vpop.permute.xlu1 %603 }
  0xf0   : > { %1361 = vrot.lane.b32.xlu0 %v1349_v48, %s10553_s20  ;;  %v10991_v48 = vrot.slane %v6678_v20, %v10692_v14  ;;  %v11031_v20 = vpop.permute.xlu0 %422 }
  0xf2   : > { %v1438_v60 = vmul.f32 %v10991_v48, %v10853_v21  ;;  %v8502_v21 = vld [vmem:[%s13726_s5 + $0xe8] sm:$0xff]  }
  0xf3   : > { %1136 = vrot.lane.b32.xlu1 %v1124_v53, %s10553_s20  ;;  %v8476_v53 = vld [vmem:[%s13726_s5 + $0x18] sm:$0xff]  }
  0xf4   : > { %1193 = vrot.lane.b32.xlu0 %v1179_v54, %s10553_s20  ;;  %v8492_v54 = vld [vmem:[%s13726_s5 + $0x98] sm:$0xff]   ;;  %9374 = vmatpush3.bf16.msra.mxu0 %v8476_v53 }
  0xf5   : > { %9406 = vmatpush3.bf16.msra.mxu1 %v8492_v54  ;;  %9376 = vmatprep.subr.bf16.mxu0 %v8485_v55  ;;  %v8488_v53 = vld [vmem:[%s13726_s5 + $0x78] sm:$0xff]   ;;  %v10479_v54 = vld [vmem:[%s13722_s1 + $0x8] sm:$0xff] }
  0xf6   : > { %9408 = vmatprep.subr.bf16.mxu1 %v8501_v35 }
  0xf7   : > { %1191 = vrot.lane.b32.xlu1 %v1178_v0, %s10553_s20  ;;  %v8493_v0 = vld [vmem:[%s13726_s5 + $0xa0] sm:$0xff]  }
  0xf8   : > { %1401 = vrot.lane.b32.xlu0 %v1387_v2, %s10553_s20  ;;  %v11019_v2 = vpop.permute.xlu1 %363  ;;  %9378 = vmatpush3.bf16.msra.mxu0 %v8477_v62  ;;  %v8480_v62 = vld [vmem:[%s13726_s5 + $0x38] sm:$0xff]  }
  0xf9   : > { %9410 = vmatpush3.bf16.msra.mxu1 %v8493_v0  ;;  %9380 = vmatprep.subr.bf16.mxu0 %v8486_v28  ;;  %v8496_v0 = vld [vmem:[%s13726_s5 + $0xb8] sm:$0xff]   ;;  %v985_v28 = vmul.f32 %v10737_v32, %v10909_v51 }
  0xfa   : > { %9412 = vmatprep.subr.bf16.mxu1 %v8502_v21  ;;  %v949_v21 = vmul.f32 %v10699_v17, %v10895_v45 }
  0xfb   : > { %1399 = vrot.lane.b32.xlu1 %v1386_v29, %s10553_s20  ;;  %v8478_v29 = vld [vmem:[%s13726_s5 + $0x28] sm:$0xff]  }
  0xfc   : > { %1189 = vrot.lane.b32.xlu0 %v1177_v31, %s10553_s20  ;;  %v11029_v6 = vpop.permute.xlu1 %393  ;;  %v8494_v31 = vld [vmem:[%s13726_s5 + $0xa8] sm:$0xff]   ;;  %9382 = vmatpush3.bf16.msra.mxu0 %v8478_v29 }
  0xfd   : > { %9414 = vmatpush3.bf16.msra.mxu1 %v8494_v31 }
  0xfe   : > { %9416 = vmatprep.subr.bf16.mxu1 %v8503_v40 }
  0xff   : > { %1482 = vperm.xlu1 %10074, %v1478_v39   ;;  %v8487_v39 = vld [vmem:[%s13726_s5 + $0x70] sm:$0xff]  }
 0x100   : > { %1452 = vrot.lane.b32.xlu0 %v1439_v47, %s10553_s20  ;;  %9384 = vmatprep.subr.bf16.mxu0 %v8487_v39  ;;  %v8495_v47 = vld [vmem:[%s13726_s5 + $0xb0] sm:$0xff]  }
 0x101   : > { %9386 = vmatpush3.bf16.msra.mxu0 %v8479_v42  ;;  %9418 = vmatpush3.bf16.msra.mxu1 %v8495_v47  ;;  %v797_v42 = vmul.f32 %v10724_v27, %v10948_v9  ;;  %v1246_v47 = vmul.f32 %v10717_v24, %v10895_v45 }
 0x102   : > { %9388 = vmatprep.subr.bf16.mxu0 %v8488_v53 }
 0x103   : > { %1397 = vrot.lane.b32.xlu1 %v1385_v56, %s10553_s20  ;;  %v1245_v56 = vmul.f32 %v10724_v27, %v10895_v45 }
 0x104   : > { %1450 = vrot.lane.b32.xlu0 %v1438_v60, %s10553_s20  ;;  %v950_v60 = vmul.f32 %v10696_v16, %v10895_v45 }
 0x105   : > { %9390 = vmatpush3.bf16.msra.mxu0 %v8480_v62  ;;  %v1281_v62 = vmul.f32 %v10771_v44, %v10909_v51 }
 0x107   : > { %1454 = vrot.lane.b32.xlu1 %v1440_v4, %s10553_s20 }
 0x108   : > { %397 = vperm.xlu0 %10075, %v10667_v5  }
 0x10b   : > { %368 = vperm.xlu1 %10074, %v10667_v5   ;;  %v986_v5 = vmul.f32 %v10724_v27, %v10909_v51 }
 0x10c   : > { %968 = vrot.lane.b32.xlu0 %v951_v26, %s10553_s20 }
 0x10d   : > { %v11049_v36 = vpop.permute.xlu1 %960  ;;  %v11051_v38 = vpop.permute.xlu0 %958  ;;  %10077 = vset.pattern.permute.xlu0 %v10552_v10 }
 0x10f   : > { %10076 = vset.pattern.permute.xlu1 %v10550_v8  ;;  %v8504_v8 = vld [vmem:[%s13726_s5 + $0xf8] sm:$0xff]  }
 0x110   : > { %1002 = vrot.lane.b32.xlu0 %v986_v5, %s10553_s20  ;;  %426 = vperm.xlu1 %10076, %v10479_v54   ;;  %v987_v5 = vmul.f32 %v10717_v24, %v10909_v51  ;;  %v1022_v54 = vmul.f32 %v10771_v44, %v10835_v3 }
 0x111   : > { %v11079_v55 = vpop.permute.xlu1 %962  ;;  %9420 = vmatprep.subr.bf16.mxu1 %v8504_v8  ;;  %v1244_v8 = vmul.f32 %v10737_v32, %v10895_v45 }
 0x112   : > { %v11081_v35 = vpop.permute.xlu0 %998  ;;  %9422 = vmatpush3.bf16.msra.mxu1 %v8496_v0  ;;  %v565_v0 = vmul.f32 %v10711_v22, %v10948_v9 }
 0x114   : > { %1261 = vrot.lane.b32.xlu0 %v1245_v56, %s10553_s20  ;;  %966 = vrot.lane.b32.xlu1 %v950_v60, %s10553_s20 }
 0x115   : > { %v11095_v4 = vpop.permute.xlu1 %996  ;;  %10078 = vset.pattern.permute.xlu1 %v10552_v10  ;;  %v564_v10 = vmul.f32 %v10696_v16, %v10948_v9 }
 0x116   : > { %v11098_v26 = vpop.permute.xlu0 %1257 }
 0x118   : > { %1000 = vrot.lane.b32.xlu0 %v985_v28, %s10553_s20  ;;  %964 = vrot.lane.b32.xlu1 %v949_v21, %s10553_s20 }
 0x119   : > { %v11106_v29 = vpop.permute.xlu1 %1255 }
 0x11a   : > { %v11108_v31 = vpop.permute.xlu0 %1253 }
 0x11c   : > { %580 = vrot.lane.b32.xlu0 %v564_v10, %s10553_s20  ;;  %1004 = vrot.lane.b32.xlu1 %v987_v5, %s10553_s20  ;;  %v563_v10 = vmul.f32 %v10699_v17, %v10948_v9  ;;  %v798_v5 = vmul.f32 %v10717_v24, %v10948_v9 }
 0x11d   : > { %v11116_v39 = vpop.permute.xlu1 %994 }
 0x11e   : > { %v11118_v40 = vpop.permute.xlu0 %576 }
 0x120   : > { %813 = vrot.lane.b32.xlu0 %v797_v42, %s10553_s20  ;;  %1263 = vrot.lane.b32.xlu1 %v1246_v47, %s10553_s20  ;;  %v1021_v47 = vmul.f32 %v10785_v49, %v10835_v3 }
 0x121   : > { %v11126_v16 = vpop.permute.xlu1 %574 }
 0x122   : > { %v11128_v53 = vpop.permute.xlu0 %809 }
 0x123   : > { %13784 = vst [vmem:[#allocation13_spill] sm:$0xff] %v11128_v53 }
 0x124   : > { %1038 = vrot.lane.b32.xlu0 %v1022_v54, %s10553_s20  ;;  %1259 = vrot.lane.b32.xlu1 %v1244_v8, %s10553_s20  ;;  %v1023_v54 = vmul.f32 %v10763_v41, %v10835_v3 }
 0x125   : > { %v11136_v56 = vpop.permute.xlu1 %807 }
 0x126   : > { %13785 = vst [vmem:[#allocation14_spill] sm:$0xff] %v11136_v56  ;;  %v11138_v60 = vpop.permute.xlu0 %1034 }
 0x127   : > { %13786 = vst [vmem:[#allocation15_spill] sm:$0xff] %v11138_v60 }
 0x128   : > { %1297 = vrot.lane.b32.xlu0 %v1281_v62, %s10553_s20  ;;  %582 = vrot.lane.b32.xlu1 %v565_v0, %s10553_s20  ;;  %v626_v62 = vmul.f32 %v10724_v27, %v10986_v46  ;;  %v1282_v0 = vmul.f32 %v10763_v41, %v10909_v51 }
 0x129   : > { %v11146_v28 = vpop.permute.xlu1 %1032 }
 0x12a   : > { %13787 = vst [vmem:[#allocation16_spill] sm:$0xff] %v11146_v28  ;;  %v11148_v21 = vpop.permute.xlu0 %1293  ;;  %v1354_v28 = vmul.f32 %v10871_v33, %v10948_v9 }
 0x12b   : > { %13788 = vst [vmem:[#allocation17_spill] sm:$0xff] %v11148_v21 }
 0x12c   : > { %578 = vrot.lane.b32.xlu0 %v563_v10, %s10553_s20  ;;  %815 = vrot.lane.b32.xlu1 %v798_v5, %s10553_s20 }
 0x12d   : > { %v11156_v42 = vpop.permute.xlu1 %1291 }
 0x12e   : > { %13789 = vst [vmem:[#allocation18_spill] sm:$0xff] %v11156_v42  ;;  %v11158_v22 = vpop.permute.xlu0 %805 }
 0x12f   : > { %13790 = vst [vmem:[#allocation19_spill] sm:$0xff] %v11158_v22 }
 0x130   : > { %1036 = vrot.lane.b32.xlu0 %v1021_v47, %s10553_s20  ;;  %1040 = vrot.lane.b32.xlu1 %v1023_v54, %s10553_s20  ;;  %v833_v47 = vmul.f32 %v10771_v44, %v10986_v46  ;;  %v796_v54 = vmul.f32 %v10737_v32, %v10948_v9 }
 0x131   : > { %v11166_v17 = vpop.permute.xlu1 %572 }
 0x132   : > { %13791 = vst [vmem:[#allocation20_spill] sm:$0xff] %v11166_v17  ;;  %v11168_v8 = vpop.permute.xlu0 %1289 }
 0x133   : > { %13792 = vst [vmem:[#allocation21_spill] sm:$0xff] %v11168_v8 }
 0x134   : > { %642 = vrot.lane.b32.xlu0 %v626_v62, %s10553_s20  ;;  %1299 = vrot.lane.b32.xlu1 %v1282_v0, %s10553_s20  ;;  %v1075_v62 = vmul.f32 %v10817_v61, %v10948_v9  ;;  %v1280_v0 = vmul.f32 %v10785_v49, %v10909_v51 }
 0x135   : > { %v11176_v10 = vpop.permute.xlu1 %1030 }
 0x136   : > { %13793 = vst [vmem:[#allocation22_spill] sm:$0xff] %v11176_v10  ;;  %v11178_v5 = vpop.permute.xlu0 %638 }
 0x137   : > { %13794 = vst [vmem:[#allocation23_spill] sm:$0xff] %v11178_v5 }
 0x138   : > { %849 = vrot.lane.b32.xlu0 %v833_v47, %s10553_s20  ;;  %811 = vrot.lane.b32.xlu1 %v796_v54, %s10553_s20  ;;  %v1317_v47 = vmul.f32 %v10829_v1, %v10835_v3  ;;  %v627_v54 = vmul.f32 %v10717_v24, %v10986_v46 }
 0x139   : > { %v11186_v27 = vpop.permute.xlu1 %636 }
 0x13a   : > { %13795 = vst [vmem:[#allocation24_spill] sm:$0xff] %v11186_v27  ;;  %v11188_v11 = vpop.permute.xlu0 %845 }
 0x13b   : > { %13796 = vst [vmem:[#allocation25_spill] sm:$0xff] %v11188_v11 }
 0x13c   : > { %1091 = vrot.lane.b32.xlu0 %v1075_v62, %s10553_s20  ;;  %1295 = vrot.lane.b32.xlu1 %v1280_v0, %s10553_s20  ;;  %v625_v62 = vmul.f32 %v10737_v32, %v10986_v46  ;;  %v834_v0 = vmul.f32 %v10763_v41, %v10986_v46 }
 0x13d   : > { %v11196_v18 = vpop.permute.xlu1 %843 }
 0x13e   : > { %13797 = vst [vmem:[#allocation26_spill] sm:$0xff] %v11196_v18  ;;  %v11198_v12 = vpop.permute.xlu0 %1087 }
 0x13f   : > { %13798 = vst [vmem:[#allocation27_spill] sm:$0xff] %v11198_v12 }
 0x140   : > { %1333 = vrot.lane.b32.xlu0 %v1317_v47, %s10553_s20  ;;  %644 = vrot.lane.b32.xlu1 %v627_v54, %s10553_s20  ;;  %v1074_v47 = vmul.f32 %v10849_v15, %v10948_v9  ;;  %v1076_v54 = vmul.f32 %v10809_v58, %v10948_v9 }
 0x141   : > { %v11206_v61 = vpop.permute.xlu1 %1085 }
 0x142   : > { %13799 = vst [vmem:[#allocation28_spill] sm:$0xff] %v11206_v61  ;;  %v11208_v51 = vpop.permute.xlu0 %1329  ;;  %v887_v61 = vmul.f32 %v10822_v63, %v11021_v52 }
 0x143   : > { %13800 = vst [vmem:[#allocation29_spill] sm:$0xff] %v11208_v51 }
 0x144   : > { %640 = vrot.lane.b32.xlu0 %v625_v62, %s10553_s20  ;;  %851 = vrot.lane.b32.xlu1 %v834_v0, %s10553_s20  ;;  %v687_v62 = vmul.f32 %v10771_v44, %v11021_v52  ;;  %v1318_v0 = vmul.f32 %v10822_v63, %v10835_v3  ;;  %v832_v44 = vmul.f32 %v10785_v49, %v10986_v46 }
 0x145   : > { %v11216_v45 = vpop.permute.xlu1 %1327 }
 0x146   : > { %13801 = vst [vmem:[#allocation30_spill] sm:$0xff] %v11216_v45  ;;  %v11218_v24 = vpop.permute.xlu0 %841  ;;  %v688_v45 = vmul.f32 %v10763_v41, %v11021_v52 }
 0x147   : > { %13802 = vst [vmem:[#allocation31_spill] sm:$0xff] %v11218_v24  ;;  %v6672_v24 = vld [vmem:[%s10686_s18 + $0x3] ss:$8 sm:$0x3] }
 0x148   : > { %1089 = vrot.lane.b32.xlu0 %v1074_v47, %s10553_s20  ;;  %1093 = vrot.lane.b32.xlu1 %v1076_v54, %s10553_s20  ;;  %v886_v47 = vmul.f32 %v10829_v1, %v11021_v52  ;;  %v1316_v1 = vmul.f32 %v10842_v7, %v10835_v3  ;;  %v358_v3 = vld [vmem:[%s10686_s18] ss:$8 sm:$0x3]  ;;  %v11327_v5 = vrot.slane %v6672_v24, %v10692_v14 }
 0x149   : > { %v11226_v32 = vpop.permute.xlu1 %634 }
 0x14a   : > { %13803 = vst [vmem:[#allocation32_spill] sm:$0xff] %v11226_v32  ;;  %v11228_v51 = vpop.permute.xlu0 %1325  ;;  %v11283_v32 = vrot.slane %v358_v3, %v10689_v13  ;;  %13820 = vst [vmem:[#allocation49_spill] sm:$0xff] %v11327_v5 }
 0x14b   : > { %13804 = vst [vmem:[#allocation33_spill] sm:$0xff] %v11228_v51  ;;  %v6669_v51 = vld [vmem:[%s10686_s18 + $0x5] ss:$8 sm:$0x3] }
 0x14c   : > { %703 = vrot.lane.b32.xlu0 %v687_v62, %s10553_s20  ;;  %1335 = vrot.lane.b32.xlu1 %v1318_v0, %s10553_s20  ;;  %v1128_v0 = vmul.f32 %v10879_v37, %v10986_v46  ;;  %13812 = vst [vmem:[#allocation41_spill] sm:$0xff] %v11283_v32  ;;  %v11302_v11 = vrot.slane %v6669_v51, %v10689_v13 }
 0x14d   : > { %v11236_v58 = vpop.permute.xlu1 %1083 }
 0x14e   : > { %13805 = vst [vmem:[#allocation34_spill] sm:$0xff] %v11236_v58  ;;  %v11238_v15 = vpop.permute.xlu0 %699  ;;  %v6665_v58 = vld [vmem:[%s10686_s18 + $0x2] ss:$8 sm:$0x3] }
 0x14f   : > { %13806 = vst [vmem:[#allocation35_spill] sm:$0xff] %v11238_v15  ;;  %v6668_v15 = vld [vmem:[%s10686_s18 + $0x6] ss:$8 sm:$0x3]  ;;  %v11286_v41 = vrot.slane %v6665_v58, %v10689_v13 }
 0x150   : > { %902 = vrot.lane.b32.xlu0 %v886_v47, %s10553_s20  ;;  %847 = vrot.lane.b32.xlu1 %v832_v44, %s10553_s20  ;;  %v6667_v47 = vld [vmem:[%s10686_s18 + $0x4] ss:$8 sm:$0x3]  ;;  %v11299_v18 = vrot.slane %v6668_v15, %v10689_v13 }
 0x151   : > { %v11246_v54 = vpop.permute.xlu1 %697  ;;  %13813 = vst [vmem:[#allocation42_spill] sm:$0xff] %v11286_v41  ;;  %v11296_v12 = vrot.slane %v6667_v47, %v10689_v13 }
 0x152   : > { %13807 = vst [vmem:[#allocation36_spill] sm:$0xff] %v11246_v54  ;;  %v11248_v62 = vpop.permute.xlu0 %898  ;;  %v757_v8 = vmul.f32 %v11299_v18, %v10704_v19  ;;  %v499_v60 = vmul.f32 %v11299_v18, %v10719_v25 }
 0x153   : > { %13808 = vst [vmem:[#allocation37_spill] sm:$0xff] %v11248_v62  ;;  %v1353_v62 = vmul.f32 %v10879_v37, %v10948_v9  ;;  %v6666_v37 = vld [vmem:[%s10686_s18 + $0x1] ss:$8 sm:$0x3] }
 0x154   : > { %1144 = vrot.lane.b32.xlu0 %v1128_v0, %s10553_s20  ;;  %1331 = vrot.lane.b32.xlu1 %v1316_v1, %s10553_s20  ;;  %v6673_v0 = vld [vmem:[%s10686_s18 + $0x7] ss:$8 sm:$0x3]  ;;  %v11273_v1 = vrot.slane %v6667_v47, %v10692_v14  ;;  %v11314_v63 = vrot.slane %v6666_v37, %v10692_v14  ;;  %s10557_s18 = smov [#allocation3]  }
 0x155   : > { %v11259_v44 = vpop.permute.xlu1 %896  ;;  %v11305_v27 = vrot.slane %v6673_v0, %v10689_v13  ;;  %s10484_s21 = sshll.u32 %s10557_s18, 4  ;;  %s10485_s21 = int_to_ptr.vmem [resolvable:$false] %s10484_s21 }
 0x156   : > { %13809 = vst [vmem:[#allocation38_spill] sm:$0xff] %v11259_v44  ;;  %v11261_v54 = vpop.permute.xlu0 %1140  ;;  %13811 = vst [vmem:[#allocation40_spill] sm:$0xff] %v11273_v1  ;;  %v11276_v44 = vrot.slane %v6668_v15, %v10692_v14  ;;  %v11324_v15 = vrot.slane %v6672_v24, %v10689_v13  ;;  %v470_v24 = vmul.f32 %v11296_v12, %v10704_v19  ;;  %s10486_s27 = scalar_lea.vmem %s10485_s21, 32  ;;  %p10487_p0 = scmp.lt.s32.totalorder %s13681_s30, %s10485_s21 }
 0x157   : > { %13810 = vst [vmem:[#allocation39_spill] sm:$0xff] %v11261_v54  ;;  %v11279_v54 = vrot.slane %v6669_v51, %v10692_v14  ;;  %13817 = vst [vmem:[#allocation46_spill] sm:$0xff] %v11314_v63  ;;  %v11321_v51 = vrot.slane %v6673_v0, %v10692_v14  ;;  %v1129_v0 = vmul.f32 %v10871_v33, %v10986_v46  ;;  %p10488_p1 = scmp.lt.s32.totalorder %s10486_s27, %s10480_s17 }
 0x158   : > { %1369 = vrot.lane.b32.xlu0 %v1353_v62, %s10553_s20  ;;  %705 = vrot.lane.b32.xlu1 %v688_v45, %s10553_s20  ;;  %v686_v45 = vmul.f32 %v10785_v49, %v11021_v52  ;;  %v11311_v49 = vrot.slane %v6665_v58, %v10692_v14  ;;  %13819 = vst [vmem:[#allocation48_spill] sm:$0xff] %v11324_v15 }
 0x159   : > { %v11316_v47 = vpop.permute.xlu1 %1138  ;;  %v11330_v58 = vrot.slane %v358_v3, %v10692_v14  ;;  %v11346_v3 = vmul.f32 %v11302_v11, %v10732_v30  ;;  %v11350_v14 = vmul.f32 %v11305_v27, %v10732_v30  ;;  %v727_v10 = vmul.f32 %v11314_v63, %v11029_v6  ;;  %p10489_p2 = por %p10488_p1, %p10487_p0 }
 0x15a   : > { %v11289_v62 = vpop.permute.xlu0 %1365  ;;  %13816 = vst [vmem:[#allocation45_spill] sm:$0xff] %v11311_v49  ;;  %13818 = vst [vmem:[#allocation47_spill] sm:$0xff] %v11316_v47  ;;  %v11366_v17 = vmul.f32 %v11321_v51, %v10732_v30  ;;  %v411_v22 = vmul.f32 %v11311_v49, %v11029_v6  ;;  %v765_v33 = vmul.f32 %v11302_v11, %v10719_v25 }
 0x15b   : > { %13814 = vst [vmem:[#allocation43_spill] sm:$0xff] %v11289_v62  ;;  %v11308_v62 = vrot.slane %v6666_v37, %v10689_v13  ;;  %13821 = vst [vmem:[#allocation50_spill] sm:$0xff] %v11330_v58  ;;  %v383_v37 = vmul.f32 %v11283_v32, %v11019_v2  ;;  %v720_v13 = vmul.f32 %v11286_v41, %v11019_v2  ;;  %p10490_p3 = pnand %p10489_p2, %p10483_p13 }
 0x15c   : > { %701 = vrot.lane.b32.xlu0 %v686_v45, %s10553_s20  ;;  %904 = vrot.lane.b32.xlu1 %v887_v61, %s10553_s20  ;;  %v412_v45 = vmul.f32 %v11286_v41, %v11029_v6  ;;  %v1127_v61 = vmul.f32 %v10893_v43, %v10986_v46  ;;  %v382_v41 = vmul.f32 %v11330_v58, %v11019_v2 }
 0x15d   : > { %13815 = vst [vmem:[#allocation44_spill] sm:$0xff] %v11308_v62  ;;  %v728_v32 = vmul.f32 %v11308_v62, %v11029_v6  ;;  %v441_v21 = vmul.f32 %v11308_v62, %v11031_v20  ;;  %v749_v58 = vmul.f32 %v11324_v15, %v11031_v20  ;;  %v764_v15 = vmul.f32 %v11279_v54, %v10719_v25 }
 0x15e   : > { %v11336_v47 = vpop.permute.xlu0 %894  ;;  %v416_v42 = vadd.f32 %v412_v45, %v383_v37  ;;  %v756_v37 = vmul.f32 %v11276_v44, %v10704_v19  ;;  %v469_v45 = vmul.f32 %v11273_v1, %v10704_v19  ;;  %v415_v53 = vadd.f32 %v411_v22, %v382_v41 }
 0x15f   : > { %13822 = vst [vmem:[#allocation51_spill] sm:$0xff] %v11336_v47  ;;  %v719_v47 = vmul.f32 %v11311_v49, %v11019_v2  ;;  %v732_v62 = vadd.f32 %v728_v32, %v720_v13  ;;  %v748_v49 = vmul.f32 %v11327_v5, %v11031_v20  ;;  %v440_v13 = vmul.f32 %v11314_v63, %v11031_v20  ;;  %v1479_v63 = vld [vmem:[%s13723_s2 + $0x8] sm:$0xff] }
 0x160   : > { %1142 = vrot.lane.b32.xlu0 %v1127_v61, %s10553_s20  ;;  %1146 = vrot.lane.b32.xlu1 %v1129_v0, %s10553_s20  ;;  %v11374_v61 = vpop.permute.xlu1 %1363  ;;  %v1181_v0 = vmul.f32 %v10926_v57, %v11021_v52  ;;  %v445_v19 = vadd.f32 %v441_v21, %v416_v42  ;;  %v1389_v32 = vmul.f32 %v10926_v57, %v10986_v46 }
 0x161   : > { %13823 = vst [vmem:[#allocation52_spill] sm:$0xff] %v11374_v61  ;;  %v731_v61 = vadd.f32 %v727_v10, %v719_v47  ;;  %v498_v10 = vmul.f32 %v11276_v44, %v10719_v25  ;;  %v922_v47 = vmul.f32 %v11273_v1, %v11019_v2  ;;  %v923_v22 = vmul.f32 %v11296_v12, %v11019_v2 }
 0x162   : > { %v11390_v56 = vpop.permute.xlu0 %1361  ;;  %v931_v21 = vmul.f32 %v11299_v18, %v11029_v6  ;;  %v753_v42 = vadd.f32 %v749_v58, %v732_v62  ;;  %v11416_v57 = vmul.f32 %v11279_v54, %v10732_v30  ;;  %v444_v5 = vadd.f32 %v440_v13, %v415_v53 }
 0x163   : > { %v752_v25 = vadd.f32 %v748_v49, %v731_v61  ;;  %v1352_v62 = vmul.f32 %v10893_v43, %v10948_v9  ;;  %v1442_v30 = vmul.f32 %v10967_v34, %v11021_v52  ;;  %v1226_v49 = vmul.f32 %v11302_v11, %v11029_v6 }
 0x164   : > { %1197 = vrot.lane.b32.xlu0 %v1181_v0, %s10553_s20  ;;  %1371 = vrot.lane.b32.xlu1 %v1354_v28, %s10553_s20  ;;  %v885_v28 = vmul.f32 %v10842_v7, %v11021_v52  ;;  %v930_v0 = vmul.f32 %v11276_v44, %v11029_v6  ;;  %v11418_v41 = vpop.permute.xlu1 %695  ;;  %v1218_v7 = vmul.f32 %v11299_v18, %v11019_v2 }
 0x165   : > { %v1217_v58 = vmul.f32 %v11276_v44, %v11019_v2  ;;  %v1225_v61 = vmul.f32 %v11279_v54, %v11029_v6  ;;  %v474_v53 = vadd.f32 %v470_v24, %v445_v19  ;;  %v935_v43 = vadd.f32 %v931_v21, %v923_v22 }
 0x166   : > { %v11437_v13 = vpop.permute.xlu0 %1193  ;;  %v939_v9 = vmul.f32 %v11302_v11, %v11031_v20  ;;  %v761_v34 = vadd.f32 %v757_v8, %v753_v42  ;;  %v760_v1 = vadd.f32 %v756_v37, %v752_v25  ;;  %v1182_v2 = vmul.f32 %v10907_v50, %v11021_v52  ;;  %v8513_v8 = vld [vmem:[%s13726_s5 + $0x140] sm:$0xff]  }
 0x167   : > { %v1234_v6 = vmul.f32 %v11305_v27, %v11031_v20  ;;  %v1233_v24 = vmul.f32 %v11321_v51, %v11031_v20  ;;  %v473_v19 = vadd.f32 %v469_v45, %v444_v5  ;;  %v1230_v37 = vadd.f32 %v1226_v49, %v1218_v7  ;;  %9424 = vmatprep.subr.bf16.mxu0 %v8513_v8 }
 0x168   : > { %1405 = vrot.lane.b32.xlu0 %v1389_v32, %s10553_s20  ;;  %900 = vrot.lane.b32.xlu1 %v885_v28, %s10553_s20  ;;  %v934_v32 = vadd.f32 %v930_v0, %v922_v47  ;;  %v938_v28 = vmul.f32 %v11279_v54, %v11031_v20  ;;  %v1441_v47 = vmul.f32 %v10991_v48, %v11021_v52  ;;  %v11458_v21 = vpop.permute.xlu1 %1136 }
 0x169   : > { %v1229_v0 = vadd.f32 %v1225_v61, %v1217_v58  ;;  %v503_v22 = vadd.f32 %v499_v60, %v474_v53  ;;  %v943_v5 = vadd.f32 %v939_v9, %v935_v43  ;;  %v1180_v48 = vmul.f32 %v10954_v23, %v11021_v52  ;;  %v13826_v53 = vld [vmem:[#allocation15_spill] sm:$0xff]  ;;  %v13828_v9 = vld [vmem:[#allocation17_spill] sm:$0xff] }
 0x16a   : > { %v942_v20 = vadd.f32 %v938_v28, %v934_v32  ;;  %v11464_v45 = vmul.f32 %v11009_v59, %v11021_v52  ;;  %v971_v42 = vsel %vm584_vm0, %v11049_v36, %v11079_v55  ;;  %v769_v25 = vadd.f32 %v765_v33, %v761_v34  ;;  %v11469_v60 = vpop.permute.xlu0 %1401  ;;  %v13827_v32 = vld [vmem:[#allocation16_spill] sm:$0xff] }
 0x16b   : > { %v768_v7 = vadd.f32 %v764_v15, %v760_v1  ;;  %v502_v49 = vadd.f32 %v498_v10, %v473_v19  ;;  %v1390_v59 = vmul.f32 %v10907_v50, %v10986_v46  ;;  %v1388_v52 = vmul.f32 %v10954_v23, %v10986_v46  ;;  %v13832_v19 = vld [vmem:[#allocation21_spill] sm:$0xff] }
 0x16c   : > { %1487 = vperm.xlu0 %10077, %v1479_v63   ;;  %1367 = vrot.lane.b32.xlu1 %v1352_v62, %s10553_s20  ;;  %v8529_v63 = vld [vmem:[%s13726_s5 + $0x1c0] sm:$0xff]   ;;  %v970_v62 = vsel %vm584_vm0, %v11051_v38, %v11049_v36  ;;  %v1007_v55 = vsel %vm584_vm0, %v11095_v4, %v11081_v35  ;;  %v1238_v1 = vadd.f32 %v1234_v6, %v1230_v37  ;;  %v11495_v10 = vpop.permute.xlu1 %1191  ;;  %v13833_v37 = vld [vmem:[#allocation22_spill] sm:$0xff] }
 0x16d   : > { %9456 = vmatprep.subr.bf16.mxu1 %v8529_v63  ;;  %v1237_v15 = vadd.f32 %v1233_v24, %v1229_v0  ;;  %v532_v33 = vadd.f32 %v11346_v3, %v503_v22  ;;  %v1266_v36 = vsel %vm584_vm0, %v11106_v29, %v11098_v26  ;;  %v1265_v50 = vsel %vm584_vm0, %v11108_v31, %v11106_v29  ;;  %v13824_v31 = vld [vmem:[#allocation13_spill] sm:$0xff]  ;;  %v13825_v3 = vld [vmem:[#allocation14_spill] sm:$0xff]  ;;  %v13831_v6 = vld [vmem:[#allocation20_spill] sm:$0xff] }
 0x16e   : > { %v1006_v23 = vsel %vm584_vm0, %v11116_v39, %v11095_v4  ;;  %v978_v46 = vadd.f32 %v970_v62, %v942_v20  ;;  %v790_v38 = vadd.f32 %v11350_v14, %v769_v25  ;;  %v789_v35 = vadd.f32 %v11366_v17, %v768_v7  ;;  %v4111_v14 = vld [vmem:[%s13725_s4 + $0x8] sm:$0xff]  ;;  %v1190_v43 = vpop.permute.xlu0 %1189  ;;  %v13834_v20 = vld [vmem:[#allocation23_spill] sm:$0xff] }
 0x16f   : > { %v586_v29 = vsel %vm584_vm0, %v11126_v16, %v11118_v40  ;;  %v818_v4 = vsel %vm584_vm0, %v13825_v3, %v13824_v31  ;;  %v531_v39 = vadd.f32 %v11416_v57, %v502_v49  ;;  %v1274_v17 = vadd.f32 %v1266_v36, %v1238_v1  ;;  %v13829_v40 = vld [vmem:[#allocation18_spill] sm:$0xff]  ;;  %v13836_v25 = vld [vmem:[#allocation25_spill] sm:$0xff]  ;;  %v13838_v62 = vld [vmem:[#allocation27_spill] sm:$0xff] }
 0x170   : > { %1458 = vrot.lane.b32.xlu0 %v1442_v30, %s10553_s20  ;;  %1199 = vrot.lane.b32.xlu1 %v1182_v2, %s10553_s20  ;;  %v979_v30 = vadd.f32 %v971_v42, %v943_v5  ;;  %v1273_v58 = vadd.f32 %v1265_v50, %v1237_v15  ;;  %v1014_v61 = vadd.f32 %v1006_v23, %v978_v46  ;;  %v13830_v2 = vld [vmem:[#allocation19_spill] sm:$0xff]  ;;  %v13835_v5 = vld [vmem:[#allocation24_spill] sm:$0xff] }
 0x171   : > { %v1043_v28 = vsel %vm584_vm0, %v13827_v32, %v13826_v53  ;;  %v1302_v34 = vsel %vm584_vm0, %v13829_v40, %v13828_v9  ;;  %v817_v57 = vsel %vm584_vm0, %v13830_v2, %v13825_v3  ;;  %v585_v24 = vsel %vm584_vm0, %v13831_v6, %v11126_v16  ;;  %v13837_v16 = vld [vmem:[#allocation26_spill] sm:$0xff]  ;;  %v13839_v49 = vld [vmem:[#allocation28_spill] sm:$0xff]  ;;  %v13840_v50 = vld [vmem:[#allocation31_spill] sm:$0xff] }
 0x172   : > { %v1015_v26 = vadd.f32 %v1007_v55, %v979_v30  ;;  %v594_v8 = vadd.f32 %v586_v29, %v532_v33  ;;  %v826_v63 = vadd.f32 %v818_v4, %v790_v38  ;;  %v1042_v0 = vsel %vm584_vm0, %v13833_v37, %v13827_v32  ;;  %v4113_v55 = vld [vmem:[%s13725_s4 + $0x18] sm:$0xff]  ;;  %v1400_v30 = vpop.permute.xlu1 %1399  ;;  %v13841_v46 = vld [vmem:[#allocation32_spill] sm:$0xff] }
 0x173   : > { %v647_v42 = vsel %vm584_vm0, %v13835_v5, %v13834_v20  ;;  %v854_v7 = vsel %vm584_vm0, %v13837_v16, %v13836_v25  ;;  %v1310_v1 = vadd.f32 %v1302_v34, %v1274_v17  ;;  %v825_v15 = vadd.f32 %v817_v57, %v789_v35  ;;  %v1453_v35 = vpop.permute.xlu0 %1452  ;;  %v13846_v53 = vld [vmem:[#allocation36_spill] sm:$0xff]  ;;  %v13849_v57 = vld [vmem:[#allocation38_spill] sm:$0xff] }
 0x174   : > { %1456 = vrot.lane.b32.xlu0 %v1441_v47, %s10553_s20  ;;  %1407 = vrot.lane.b32.xlu1 %v1390_v59, %s10553_s20  ;;  %v1301_v47 = vsel %vm584_vm0, %v13832_v19, %v13829_v40  ;;  %v1051_v22 = vadd.f32 %v1043_v28, %v1015_v26  ;;  %v1096_v59 = vsel %vm584_vm0, %v13839_v49, %v13838_v62  ;;  %v13842_v26 = vld [vmem:[#allocation34_spill] sm:$0xff]  ;;  %v13847_v28 = vld [vmem:[#allocation47_spill] sm:$0xff] }
 0x175   : > { %v1309_v33 = vadd.f32 %v1301_v47, %v1273_v58  ;;  %v1050_v36 = vadd.f32 %v1042_v0, %v1014_v61  ;;  %v853_v23 = vsel %vm584_vm0, %v13840_v50, %v13837_v16  ;;  %v646_v38 = vsel %vm584_vm0, %v13841_v46, %v13835_v5  ;;  %v13845_v58 = vld [vmem:[#allocation33_spill] sm:$0xff]  ;;  %v13850_v19 = vld [vmem:[#allocation39_spill] sm:$0xff] }
 0x176   : > { %v1095_v29 = vsel %vm584_vm0, %v13842_v26, %v13839_v49  ;;  %v655_v31 = vadd.f32 %v647_v42, %v594_v8  ;;  %v862_v3 = vadd.f32 %v854_v7, %v826_v63  ;;  %v1104_v4 = vadd.f32 %v1096_v59, %v1051_v22  ;;  %v13851_v8 = vld [vmem:[#allocation51_spill] sm:$0xff]  ;;  %v13852_v63 = vld [vmem:[#allocation52_spill] sm:$0xff] }
 0x177   : > { %v707_v32 = vsel %vm584_vm0, %v11418_v41, %v13846_v53  ;;  %v1148_v9 = vsel %vm584_vm0, %v11458_v21, %v13847_v28  ;;  %v861_v40 = vadd.f32 %v853_v23, %v825_v15  ;;  %v1103_v2 = vadd.f32 %v1095_v29, %v1050_v36  ;;  %v13853_v22 = vld [vmem:[#allocation35_spill] sm:$0xff]  ;;  %v1451_v15 = vpop.permute.xlu0 %1450 }
 0x178   : > { %4121 = vperm.xlu0 %10077, %v4111_v14   ;;  %1195 = vrot.lane.b32.xlu1 %v1180_v48, %s10553_s20  ;;  %v593_v48 = vadd.f32 %v585_v24, %v531_v39  ;;  %v13843_v39 = vld [vmem:[#allocation29_spill] sm:$0xff]  ;;  %v13844_v14 = vld [vmem:[#allocation30_spill] sm:$0xff]  ;;  %v1149_v47 = vsel %vm584_vm0, %v13847_v28, %v13850_v19  ;;  %v906_v41 = vsel %vm584_vm0, %v13851_v8, %v13849_v57  ;;  %v13854_v7 = vld [vmem:[#allocation43_spill] sm:$0xff] }
 0x179   : > { %v1338_v17 = vsel %vm584_vm0, %v13844_v14, %v13843_v39  ;;  %v1337_v61 = vsel %vm584_vm0, %v13845_v58, %v13844_v14  ;;  %v1373_v21 = vsel %vm584_vm0, %v11390_v56, %v13852_v63  ;;  %v1201_v37 = vsel %vm584_vm0, %v1190_v43, %v11495_v10 }
 0x17a   : > { %v654_v34 = vadd.f32 %v646_v38, %v593_v48  ;;  %v1345_v0 = vadd.f32 %v1337_v61, %v1309_v33  ;;  %v708_v20 = vsel %vm584_vm0, %v13846_v53, %v13853_v22  ;;  %v1156_v42 = vadd.f32 %v1148_v9, %v1103_v2  ;;  %v13855_v9 = vld [vmem:[#allocation42_spill] sm:$0xff] }
 0x17b   : > { %v1346_v25 = vadd.f32 %v1338_v17, %v1310_v1  ;;  %v1374_v62 = vsel %vm584_vm0, %v13852_v63, %v13854_v7  ;;  %v1202_v56 = vsel %vm584_vm0, %v11495_v10, %v11437_v13  ;;  %v1157_v43 = vadd.f32 %v1149_v47, %v1104_v4  ;;  %v13860_v7 = vld [vmem:[#allocation44_spill] sm:$0xff] }
 0x17c   : > { %4131 = vperm.xlu0 %10077, %v4113_v55   ;;  %1403 = vrot.lane.b32.xlu1 %v1388_v52, %s10553_s20  ;;  %v13848_v52 = vld [vmem:[#allocation37_spill] sm:$0xff]  ;;  %v715_v5 = vadd.f32 %v707_v32, %v654_v34  ;;  %v914_v49 = vadd.f32 %v906_v41, %v861_v40  ;;  %v1381_v59 = vadd.f32 %v1373_v21, %v1345_v0  ;;  %v13859_v21 = vld [vmem:[#allocation50_spill] sm:$0xff] }
 0x17d   : > { %v907_v6 = vsel %vm584_vm0, %v13849_v57, %v13848_v52  ;;  %v1209_v55 = vadd.f32 %v1201_v37, %v1156_v42  ;;  %v716_v33 = vadd.f32 %v708_v20, %v655_v31  ;;  %v1382_v36 = vadd.f32 %v1374_v62, %v1346_v25  ;;  %v13856_v34 = vld [vmem:[#allocation45_spill] sm:$0xff]  ;;  %v13857_v57 = vld [vmem:[#allocation40_spill] sm:$0xff] }
 0x17e   : > { %v1483_v24 = vpop.permute.xlu1 %1482  ;;  %v915_v16 = vadd.f32 %v907_v6, %v862_v3  ;;  %v918_v50 = vmax.f32 %v715_v5, %v914_v49  ;;  %v1210_v23 = vadd.f32 %v1202_v56, %v1157_v43  ;;  %v1462_v38 = vsel %vm584_vm0, %v1451_v15, %v1453_v35  ;;  %v13858_v41 = vld [vmem:[#allocation41_spill] sm:$0xff] }
 0x180   : > { %1460 = vrot.lane.b32.xlu1 %v11464_v45, %s10553_s20  ;;  %v1410_v45 = vsel %vm584_vm0, %v1400_v30, %v11469_v60  ;;  %v919_v26 = vmax.f32 %v716_v33, %v915_v16  ;;  %v1213_v10 = vmax.f32 %v918_v50, %v1209_v55  ;;  %v13861_v55 = vld [vmem:[#allocation46_spill] sm:$0xff]  ;;  %s13679_s20 = scalar_lea.hbm %s13731_s10, %s7447_s29 }
 0x181   : > { %v1418_v13 = vadd.f32 %v1410_v45, %v1382_v36  ;;  %v8521_v36 = vld [vmem:[%s13726_s5 + $0x180] sm:$0xff]  }
 0x182   : > { %v1398_v48 = vpop.permute.xlu1 %1397  ;;  %v1214_v31 = vmax.f32 %v919_v26, %v1210_v23  ;;  %v8530_v26 = vld [vmem:[%s13726_s5 + $0x1c8] sm:$0xff]  }
 0x183   : > { %v1409_v1 = vsel %vm584_vm0, %v1398_v48, %v1400_v30  ;;  %v8505_v48 = vld [vmem:[%s13726_s5 + $0x100] sm:$0xff]  }
 0x184   : > { %v1417_v46 = vadd.f32 %v1409_v1, %v1381_v59 }
 0x186   : > { %v1470_v29 = vadd.f32 %v1462_v38, %v1417_v46  ;;  %v1455_v3 = vpop.permute.xlu1 %1454  ;;  %v8514_v38 = vld [vmem:[%s13726_s5 + $0x148] sm:$0xff]  }
 0x187   : > { %v1463_v4 = vsel %vm584_vm0, %v1453_v35, %v1455_v3  ;;  %v398_v39 = vpop.permute.xlu0 %397  ;;  %v13862_v3 = vld [vmem:[#allocation48_spill] sm:$0xff] }
 0x188   : > { %v1474_v14 = vmax.f32 %v1213_v10, %v1470_v29  ;;  %v1471_v17 = vadd.f32 %v1463_v4, %v1418_v13  ;;  %v933_v60 = vmul.f32 %v11299_v18, %v398_v39  ;;  %v932_v30 = vmul.f32 %v11276_v44, %v398_v39 }
 0x189   : > { %v1228_v58 = vmul.f32 %v11302_v11, %v398_v39  ;;  %v1227_v61 = vmul.f32 %v11279_v54, %v398_v39  ;;  %v414_v40 = vmul.f32 %v13855_v9, %v398_v39  ;;  %v413_v2 = vmul.f32 %v13856_v34, %v398_v39 }
 0x18a   : > { %v1490_v53 = vadd.f32 %v1483_v24, %v1474_v14  ;;  %v1475_v32 = vmax.f32 %v1214_v31, %v1471_v17  ;;  %v369_v28 = vpop.permute.xlu1 %368  ;;  %v730_v62 = vmul.f32 %v13860_v7, %v398_v39  ;;  %v729_v15 = vmul.f32 %v13861_v55, %v398_v39 }
 0x18b   : > { %v969_v35 = vpop.permute.xlu0 %968  ;;  %v925_v52 = vmul.f32 %v11296_v12, %v369_v28  ;;  %v924_v6 = vmul.f32 %v13857_v57, %v369_v28  ;;  %v1220_v19 = vmul.f32 %v11299_v18, %v369_v28  ;;  %v1219_v47 = vmul.f32 %v11276_v44, %v369_v28 }
 0x18c   : > { %v1491_v8 = vadd.f32 %v1483_v24, %v1475_v32  ;;  %v385_v63 = vmul.f32 %v13858_v41, %v369_v28  ;;  %v384_v37 = vmul.f32 %v13859_v21, %v369_v28  ;;  %v11607_v56 = vmax.f32 %v1490_v53, 0.0  ;;  %v13863_v53 = vld [vmem:[#allocation49_spill] sm:$0xff]  ;;  %v8516_v21 = vld [vmem:[%s13726_s5 + $0x158] sm:$0xff]  }
 0x18d   : > { %v937_v0 = vadd.f32 %v933_v60, %v925_v52  ;;  %v936_v22 = vadd.f32 %v932_v30, %v924_v6  ;;  %v1232_v20 = vadd.f32 %v1228_v58, %v1220_v19  ;;  %v1231_v5 = vadd.f32 %v1227_v61, %v1219_v47  ;;  %v8506_v58 = vld [vmem:[%s13726_s5 + $0x108] sm:$0xff]   ;;  %v8531_v52 = vld [vmem:[%s13726_s5 + $0x1d0] sm:$0xff]  }
 0x18e   : > { %v11604_v42 = vmax.f32 %v1491_v8, 0.0  ;;  %v418_v25 = vadd.f32 %v414_v40, %v385_v63  ;;  %v417_v16 = vadd.f32 %v413_v2, %v384_v37  ;;  %v722_v24 = vmul.f32 %v13855_v9, %v369_v28  ;;  %v8522_v9 = vld [vmem:[%s13726_s5 + $0x188] sm:$0xff]   ;;  %v8515_v40 = vld [vmem:[%s13726_s5 + $0x150] sm:$0xff]  }
 0x18f   : > { %v11609_v43 = vpop.permute.xlu0 %1002  ;;  %v427_v49 = vpop.permute.xlu1 %426  ;;  %v721_v59 = vmul.f32 %v13856_v34, %v369_v28  ;;  %v8507_v47 = vld [vmem:[%s13726_s5 + $0x110] sm:$0xff]  }
 0x190   : > { %1626 = vmatprep.mubr.f32.mxu0 %v11604_v42  ;;  %1766 = vmatprep.mubr.f32.mxu1 %v11604_v42  ;;  %v941_v33 = vmul.f32 %v11302_v11, %v427_v49  ;;  %v940_v45 = vmul.f32 %v11279_v54, %v427_v49  ;;  %v1236_v1 = vmul.f32 %v11305_v27, %v427_v49  ;;  %v8523_v63 = vld [vmem:[%s13726_s5 + $0x190] sm:$0xff]  }
 0x191   : > { %1627 = vmatmul.mubr.f32.vlgmr.msra.gmra.mrb[0].mxu0 %v11607_v56  ;;  %1767 = vmatmul.mubr.f32.vlgmr.msra.gmra.mrb[0].mxu1 %v11607_v56  ;;  %v1235_v50 = vmul.f32 %v11321_v51, %v427_v49  ;;  %v443_v23 = vmul.f32 %v13860_v7, %v427_v49  ;;  %v442_v46 = vmul.f32 %v13861_v55, %v427_v49  ;;  %v8524_v7 = vld [vmem:[%s13726_s5 + $0x198] sm:$0xff]   ;;  %v8533_v55 = vld [vmem:[%s13726_s5 + $0x1e0] sm:$0xff]  }
 0x192   : > { %v945_v13 = vadd.f32 %v941_v33, %v937_v0  ;;  %v944_v10 = vadd.f32 %v940_v45, %v936_v22  ;;  %v1240_v29 = vadd.f32 %v1236_v1, %v1232_v20  ;;  %v751_v4 = vmul.f32 %v13862_v3, %v427_v49  ;;  %9426 = vmatpush3.bf16.msra.mxu0 %v8505_v48  ;;  %v8532_v0 = vld [vmem:[%s13726_s5 + $0x1d8] sm:$0xff]   ;;  %v8509_v33 = vld [vmem:[%s13726_s5 + $0x120] sm:$0xff]   ;;  %v8518_v1 = vld [vmem:[%s13726_s5 + $0x168] sm:$0xff]  }
 0x193   : > { %v11637_v39 = vpop.permute.xlu0 %1261  ;;  %v967_v31 = vpop.permute.xlu1 %966  ;;  %v11639_v14 = vadd.f32 %v1235_v50, %v1231_v5  ;;  %v447_v17 = vadd.f32 %v443_v23, %v418_v25  ;;  %v446_v60 = vadd.f32 %v442_v46, %v417_v16  ;;  %v734_v30 = vadd.f32 %v730_v62, %v722_v24  ;;  %9458 = vmatpush3.bf16.msra.mxu1 %v8521_v36  ;;  %v8508_v25 = vld [vmem:[%s13726_s5 + $0x118] sm:$0xff]   ;;  %v8517_v62 = vld [vmem:[%s13726_s5 + $0x160] sm:$0xff]  }
 0x194   : > { %v973_v61 = vsel %vm584_vm0, %v967_v31, %v969_v35  ;;  %v750_v32 = vmul.f32 %v13863_v53, %v427_v49  ;;  %v733_v28 = vadd.f32 %v729_v15, %v721_v59  ;;  %9428 = vmatprep.subr.bf16.mxu0 %v8514_v38  ;;  %9460 = vmatprep.subr.bf16.mxu1 %v8530_v26  ;;  %v13864_v24 = vld [vmem:[#allocation11_spill] sm:$0xff]  ;;  %v13865_v50 = vld [vmem:[#allocation12_spill] sm:$0xff]  ;;  %v8535_v53 = vld [vmem:[%s13726_s5 + $0x1f0] sm:$0xff]  }
 0x195   : > { %v981_v34 = vadd.f32 %v973_v61, %v945_v13  ;;  %v755_v2 = vadd.f32 %v751_v4, %v734_v30  ;;  %v472_v59 = vmul.f32 %v11296_v12, %v13864_v24  ;;  %v8525_v12 = vld [vmem:[%s13726_s5 + $0x1a0] sm:$0xff]   ;;  %v501_v23 = vmul.f32 %v11299_v18, %v13865_v50  ;;  %v8534_v26 = vld [vmem:[%s13726_s5 + $0x1e8] sm:$0xff]   ;;  %v13866_v30 = vld [vmem:[#allocation10_spill] sm:$0xff] }
 0x196   : > { %v11655_v35 = vadd.f32 %v750_v32, %v733_v28  ;;  %9430 = vmatpush3.bf16.msra.mxu0 %v8506_v58  ;;  %v471_v46 = vmul.f32 %v13857_v57, %v13864_v24  ;;  %v759_v38 = vmul.f32 %v11299_v18, %v13864_v24  ;;  %v8526_v18 = vld [vmem:[%s13726_s5 + $0x1a8] sm:$0xff]   ;;  %v530_v58 = vmul.f32 %v11302_v11, %v13866_v30 }
 0x197   : > { %v1001_v6 = vpop.permute.xlu0 %1000  ;;  %v965_v19 = vpop.permute.xlu1 %964  ;;  %9462 = vmatpush3.bf16.msra.mxu1 %v8522_v9  ;;  %9432 = vmatprep.subr.bf16.mxu0 %v8515_v40  ;;  %v476_v48 = vadd.f32 %v472_v59, %v447_v17  ;;  %v8519_v17 = vld [vmem:[%s13726_s5 + $0x170] sm:$0xff]   ;;  %v500_v61 = vmul.f32 %v11276_v44, %v13865_v50  ;;  %v758_v59 = vmul.f32 %v11276_v44, %v13864_v24 }
 0x198   : > { %v1008_v8 = vsel %vm584_vm0, %v1001_v6, %v11609_v43  ;;  %v972_v41 = vsel %vm584_vm0, %v965_v19, %v967_v31  ;;  %9464 = vmatprep.subr.bf16.mxu1 %v8531_v52  ;;  %v475_v4 = vadd.f32 %v471_v46, %v446_v60  ;;  %v8510_v31 = vld [vmem:[%s13726_s5 + $0x128] sm:$0xff]   ;;  %v8520_v52 = vld [vmem:[%s13726_s5 + $0x178] sm:$0xff]   ;;  %v529_v19 = vmul.f32 %v11279_v54, %v13866_v30 }
 0x199   : > { %v980_v37 = vadd.f32 %v972_v41, %v944_v10  ;;  %v505_v3 = vadd.f32 %v501_v23, %v476_v48  ;;  %v762_v48 = vadd.f32 %v758_v59, %v11655_v35  ;;  %v766_v24 = vmul.f32 %v11279_v54, %v13865_v50 }
 0x19a   : > { %9434 = vmatpush3.bf16.msra.mxu0 %v8507_v47  ;;  %v504_v40 = vadd.f32 %v500_v61, %v475_v4  ;;  %v788_v47 = vmul.f32 %v11305_v27, %v13866_v30 }
 0x19b   : > { %v11672_v22 = vpop.permute.xlu0 %580  ;;  %v1005_v20 = vpop.permute.xlu1 %1004  ;;  %v11674_v5 = vadd.f32 %v1008_v8, %v980_v37  ;;  %9466 = vmatpush3.bf16.msra.mxu1 %v8523_v63  ;;  %9436 = vmatprep.subr.bf16.mxu0 %v8516_v21  ;;  %v534_v9 = vadd.f32 %v530_v58, %v505_v3  ;;  %v8536_v8 = vld [vmem:[%s13726_s5 + $0x1f8] sm:$0xff]   ;;  %v770_v46 = vadd.f32 %v766_v24, %v762_v48 }
 0x19c   : > { %v1009_v16 = vsel %vm584_vm0, %v11609_v43, %v1005_v20  ;;  %9468 = vmatprep.subr.bf16.mxu1 %v8532_v0  ;;  %v533_v63 = vadd.f32 %v529_v19, %v504_v40  ;;  %v8512_v0 = vld [vmem:[%s13726_s5 + $0x138] sm:$0xff]  }
 0x19d   : > { %v11687_v49 = vadd.f32 %v1009_v16, %v981_v34  ;;  %v8511_v34 = vld [vmem:[%s13726_s5 + $0x130] sm:$0xff]   ;;  %v8545_v16 = vld [vmem:[%s13726_s5 + $0x240] sm:$0xff]  }
 0x19e   : > { %9438 = vmatpush3.bf16.msra.mxu0 %v8508_v25  ;;  %v8528_v25 = vld [vmem:[%s13726_s5 + $0x1b8] sm:$0xff]  }
 0x19f   : > { %v11694_v43 = vpop.permute.xlu0 %813  ;;  %v1264_v15 = vpop.permute.xlu1 %1263  ;;  %9470 = vmatpush3.bf16.msra.mxu1 %v8524_v7  ;;  %9440 = vmatprep.subr.bf16.mxu0 %v8517_v62 }
 0x1a0   : > { %v1268_v45 = vsel %vm584_vm0, %v11637_v39, %v1264_v15  ;;  %9472 = vmatprep.subr.bf16.mxu1 %v8533_v55 }
 0x1a1   : > { %v11707_v36 = vadd.f32 %v1268_v45, %v1240_v29  ;;  %v763_v29 = vadd.f32 %v759_v38, %v755_v2 }
 0x1a2   : > { %9442 = vmatpush3.bf16.msra.mxu0 %v8509_v33 }
 0x1a3   : > { %v1039_v13 = vpop.permute.xlu0 %1038  ;;  %v1260_v10 = vpop.permute.xlu1 %1259  ;;  %9474 = vmatpush3.bf16.msra.mxu1 %v8525_v12  ;;  %9444 = vmatprep.subr.bf16.mxu0 %v8518_v1 }
 0x1a4   : > { %v1267_v57 = vsel %vm584_vm0, %v1260_v10, %v11637_v39  ;;  %9476 = vmatprep.subr.bf16.mxu1 %v8534_v26  ;;  %v767_v39 = vmul.f32 %v11302_v11, %v13865_v50  ;;  %v8527_v11 = vld [vmem:[%s13726_s5 + $0x1b0] sm:$0xff]   ;;  %v787_v26 = vmul.f32 %v11321_v51, %v13866_v30 }
 0x1a5   : > { %v11730_v60 = vadd.f32 %v1267_v57, %v11639_v14 }
 0x1a6   : > { %9446 = vmatpush3.bf16.msra.mxu0 %v8510_v31  ;;  %v771_v14 = vadd.f32 %v767_v39, %v763_v29 }
 0x1a7   : > { %v1298_v32 = vpop.permute.xlu0 %1297  ;;  %v583_v28 = vpop.permute.xlu1 %582  ;;  %9478 = vmatpush3.bf16.msra.mxu1 %v8526_v18  ;;  %9448 = vmatprep.subr.bf16.mxu0 %v8519_v17 }
 0x1a8   : > { %v588_v2 = vsel %vm584_vm0, %v11672_v22, %v583_v28  ;;  %9480 = vmatprep.subr.bf16.mxu1 %v8535_v53  ;;  %v792_v37 = vadd.f32 %v788_v47, %v771_v14 }
 0x1a9   : > { %v11752_v6 = vadd.f32 %v588_v2, %v534_v9 }
 0x1aa   : > { %9450 = vmatpush3.bf16.msra.mxu0 %v8511_v34 }
 0x1ab   : > { %v579_v41 = vpop.permute.xlu0 %578  ;;  %v816_v21 = vpop.permute.xlu1 %815  ;;  %9482 = vmatpush3.bf16.msra.mxu1 %v8527_v11  ;;  %9452 = vmatprep.subr.bf16.mxu0 %v8520_v52 }
 0x1ac   : > { %v587_v20 = vsel %vm584_vm0, %v579_v41, %v11672_v22  ;;  %v820_v27 = vsel %vm584_vm0, %v11694_v43, %v816_v21  ;;  %9484 = vmatprep.subr.bf16.mxu1 %v8536_v8  ;;  %v8561_v22 = vld [vmem:[%s13726_s5 + $0x2c0] sm:$0xff]  }
 0x1ad   : > { %v11774_v7 = vadd.f32 %v587_v20, %v533_v63  ;;  %v828_v62 = vadd.f32 %v820_v27, %v792_v37 }
 0x1ae   : > { %9454 = vmatpush3.bf16.msra.mxu0 %v8512_v0 }
 0x1af   : > { %v1037_v55 = vpop.permute.xlu0 %1036  ;;  %v1041_v15 = vpop.permute.xlu1 %1040  ;;  %9486 = vmatpush3.bf16.msra.mxu1 %v8528_v25  ;;  %9488 = vmatprep.subr.bf16.mxu0 %v8545_v16 }
 0x1b0   : > { %v1044_v33 = vsel %vm584_vm0, %v1037_v55, %v1039_v13  ;;  %v1045_v45 = vsel %vm584_vm0, %v1039_v13, %v1041_v15  ;;  %9520 = vmatprep.subr.bf16.mxu1 %v8561_v22 }
 0x1b1   : > { %v11785_v12 = vadd.f32 %v1044_v33, %v11674_v5  ;;  %v1053_v44 = vadd.f32 %v1045_v45, %v11687_v49  ;;  %v791_v5 = vadd.f32 %v787_v26, %v770_v46 }
 0x1b3   : > { %v643_v1 = vpop.permute.xlu0 %642  ;;  %v1300_v23 = vpop.permute.xlu1 %1299 }
 0x1b4   : > { %v1304_v35 = vsel %vm584_vm0, %v1298_v32, %v1300_v23 }
 0x1b5   : > { %v11792_v38 = vadd.f32 %v1304_v35, %v11707_v36 }
 0x1b7   : > { %v850_v13 = vpop.permute.xlu0 %849  ;;  %v812_v10 = vpop.permute.xlu1 %811 }
 0x1b8   : > { %v819_v49 = vsel %vm584_vm0, %v812_v10, %v11694_v43 }
 0x1b9   : > { %v827_v3 = vadd.f32 %v819_v49, %v791_v5 }
 0x1bb   : > { %v1092_v4 = vpop.permute.xlu0 %1091  ;;  %v1296_v54 = vpop.permute.xlu1 %1295 }
 0x1bc   : > { %v1303_v50 = vsel %vm584_vm0, %v1296_v54, %v1298_v32 }
 0x1bd   : > { %v11800_v29 = vadd.f32 %v1303_v50, %v11730_v60 }
 0x1bf   : > { %v1334_v31 = vpop.permute.xlu0 %1333  ;;  %v645_v36 = vpop.permute.xlu1 %644 }
 0x1c0   : > { %v649_v40 = vsel %vm584_vm0, %v643_v1, %v645_v36 }
 0x1c1   : > { %v657_v14 = vadd.f32 %v649_v40, %v11752_v6 }
 0x1c3   : > { %v641_v57 = vpop.permute.xlu0 %640  ;;  %v852_v18 = vpop.permute.xlu1 %851 }
 0x1c4   : > { %v856_v32 = vsel %vm584_vm0, %v850_v13, %v852_v18  ;;  %v648_v0 = vsel %vm584_vm0, %v641_v57, %v643_v1 }
 0x1c5   : > { %v864_v34 = vadd.f32 %v856_v32, %v828_v62  ;;  %v656_v6 = vadd.f32 %v648_v0, %v11774_v7  ;;  %v8547_v0 = vld [vmem:[%s13726_s5 + $0x250] sm:$0xff]  }
 0x1c7   : > { %v1090_v17 = vpop.permute.xlu0 %1089  ;;  %v1094_v51 = vpop.permute.xlu1 %1093 }
 0x1c8   : > { %v1098_v15 = vsel %vm584_vm0, %v1092_v4, %v1094_v51  ;;  %v1097_v26 = vsel %vm584_vm0, %v1090_v17, %v1092_v4 }
 0x1c9   : > { %v1106_v24 = vadd.f32 %v1098_v15, %v1053_v44  ;;  %v1105_v49 = vadd.f32 %v1097_v26, %v11785_v12  ;;  %v8541_v15 = vld [vmem:[%s13726_s5 + $0x220] sm:$0xff]   ;;  %v8552_v26 = vld [vmem:[%s13726_s5 + $0x278] sm:$0xff]  }
 0x1cb   : > { %v704_v30 = vpop.permute.xlu0 %703  ;;  %v1336_v58 = vpop.permute.xlu1 %1335 }
 0x1cc   : > { %v1340_v44 = vsel %vm584_vm0, %v1334_v31, %v1336_v58 }
 0x1cf   : > { %v903_v61 = vpop.permute.xlu0 %902  ;;  %v848_v39 = vpop.permute.xlu1 %847 }
 0x1d0   : > { %v855_v20 = vsel %vm584_vm0, %v848_v39, %v850_v13 }
 0x1d1   : > { %v863_v25 = vadd.f32 %v855_v20, %v827_v3  ;;  %v8563_v20 = vld [vmem:[%s13726_s5 + $0x2d0] sm:$0xff]  }
 0x1d3   : > { %v1145_v53 = vpop.permute.xlu0 %1144  ;;  %v1332_v43 = vpop.permute.xlu1 %1331 }
 0x1d4   : > { %v1339_v54 = vsel %vm584_vm0, %v1332_v43, %v1334_v31 }
 0x1d5   : > { %v1347_v51 = vadd.f32 %v1339_v54, %v11800_v29  ;;  %v8569_v54 = vld [vmem:[%s13726_s5 + $0x300] sm:$0xff]  }
 0x1d7   : > { %v1370_v28 = vpop.permute.xlu0 %1369  ;;  %v706_v9 = vpop.permute.xlu1 %705 }
 0x1d8   : > { %v710_v60 = vsel %vm584_vm0, %v704_v30, %v706_v9 }
 0x1d9   : > { %v718_v19 = vadd.f32 %v710_v60, %v657_v14 }
 0x1db   : > { %v702_v2 = vpop.permute.xlu0 %701  ;;  %v905_v11 = vpop.permute.xlu1 %904 }
 0x1dc   : > { %v909_v52 = vsel %vm584_vm0, %v903_v61, %v905_v11  ;;  %v709_v27 = vsel %vm584_vm0, %v702_v2, %v704_v30  ;;  %v1348_v30 = vadd.f32 %v1340_v44, %v11792_v38  ;;  %v8594_v44 = vld [vmem:[%s13726_s5 + $0x3c8] sm:$0xff]  }
 0x1dd   : > { %v917_v47 = vadd.f32 %v909_v52, %v864_v34  ;;  %v717_v59 = vadd.f32 %v709_v27, %v656_v6  ;;  %v8539_v27 = vld [vmem:[%s13726_s5 + $0x210] sm:$0xff]  }
 0x1de   : > { %v8555_v6 = vld [vmem:[%s13726_s5 + $0x290] sm:$0xff]  }
 0x1df   : > { %v921_v8 = vmax.f32 %v718_v19, %v917_v47  ;;  %v1143_v41 = vpop.permute.xlu0 %1142  ;;  %v1147_v63 = vpop.permute.xlu1 %1146  ;;  %v8537_v47 = vld [vmem:[%s13726_s5 + $0x200] sm:$0xff]  }
 0x1e0   : > { %v1151_v45 = vsel %vm584_vm0, %v1145_v53, %v1147_v63  ;;  %v1150_v5 = vsel %vm584_vm0, %v1143_v41, %v1145_v53  ;;  %v8546_v41 = vld [vmem:[%s13726_s5 + $0x248] sm:$0xff]  }
 0x1e1   : > { %v1159_v1 = vadd.f32 %v1151_v45, %v1106_v24  ;;  %v1158_v50 = vadd.f32 %v1150_v5, %v1105_v49  ;;  %v8562_v63 = vld [vmem:[%s13726_s5 + $0x2c8] sm:$0xff]   ;;  %v8560_v5 = vld [vmem:[%s13726_s5 + $0x2b8] sm:$0xff]   ;;  %v8577_v49 = vld [vmem:[%s13726_s5 + $0x340] sm:$0xff]  }
 0x1e2   : > { %v8566_v45 = vld [vmem:[%s13726_s5 + $0x2e8] sm:$0xff]  }
 0x1e3   : > { %v1198_v21 = vpop.permute.xlu0 %1197  ;;  %v1372_v37 = vpop.permute.xlu1 %1371  ;;  %v8542_v24 = vld [vmem:[%s13726_s5 + $0x228] sm:$0xff]  }
 0x1e4   : > { %v1376_v17 = vsel %vm584_vm0, %v1370_v28, %v1372_v37  ;;  %v8554_v37 = vld [vmem:[%s13726_s5 + $0x288] sm:$0xff]  }
 0x1e5   : > { %v1384_v31 = vadd.f32 %v1376_v17, %v1348_v30  ;;  %v8571_v17 = vld [vmem:[%s13726_s5 + $0x310] sm:$0xff]  }
 0x1e6   : > { %v8587_v30 = vld [vmem:[%s13726_s5 + $0x390] sm:$0xff]  }
 0x1e7   : > { %v901_v16 = vpop.permute.xlu1 %900  ;;  %v1406_v22 = vpop.permute.xlu0 %1405 }
 0x1e8   : > { %v908_v62 = vsel %vm584_vm0, %v901_v16, %v903_v61  ;;  %v8564_v16 = vld [vmem:[%s13726_s5 + $0x2d8] sm:$0xff]  }
 0x1e9   : > { %v916_v55 = vadd.f32 %v908_v62, %v863_v25  ;;  %v8548_v25 = vld [vmem:[%s13726_s5 + $0x258] sm:$0xff]  }
 0x1ea   : > { %v8540_v62 = vld [vmem:[%s13726_s5 + $0x218] sm:$0xff]  }
 0x1eb   : > { %v920_v48 = vmax.f32 %v717_v59, %v916_v55  ;;  %v1368_v33 = vpop.permute.xlu1 %1367  ;;  %v1488_v23 = vpop.permute.xlu0 %1487  ;;  %v8556_v59 = vld [vmem:[%s13726_s5 + $0x298] sm:$0xff]   ;;  %v8565_v55 = vld [vmem:[%s13726_s5 + $0x2e0] sm:$0xff]  }
 0x1ec   : > { %v1375_v57 = vsel %vm584_vm0, %v1368_v33, %v1370_v28  ;;  %v8550_v33 = vld [vmem:[%s13726_s5 + $0x268] sm:$0xff]  }
 0x1ed   : > { %v1383_v61 = vadd.f32 %v1375_v57, %v1347_v51  ;;  %v8570_v57 = vld [vmem:[%s13726_s5 + $0x308] sm:$0xff]   ;;  %v8579_v51 = vld [vmem:[%s13726_s5 + $0x350] sm:$0xff]  }
 0x1ef   : > { %v1200_v46 = vpop.permute.xlu1 %1199  ;;  %v1459_v3 = vpop.permute.xlu0 %1458 }
 0x1f0   : > { %v1204_v35 = vsel %vm584_vm0, %v1198_v21, %v1200_v46  ;;  %v8567_v46 = vld [vmem:[%s13726_s5 + $0x2f0] sm:$0xff]  }
 0x1f1   : > { %v1212_v7 = vadd.f32 %v1204_v35, %v1159_v1  ;;  %v8558_v1 = vld [vmem:[%s13726_s5 + $0x2a8] sm:$0xff]   ;;  %v8543_v35 = vld [vmem:[%s13726_s5 + $0x230] sm:$0xff]  }
 0x1f3   : > { %v1216_v13 = vmax.f32 %v921_v8, %v1212_v7  ;;  %v1408_v10 = vpop.permute.xlu1 %1407  ;;  %v1457_v12 = vpop.permute.xlu0 %1456  ;;  %v8553_v8 = vld [vmem:[%s13726_s5 + $0x280] sm:$0xff]   ;;  %v8559_v7 = vld [vmem:[%s13726_s5 + $0x2b0] sm:$0xff]  }
 0x1f4   : > { %v1412_v43 = vsel %vm584_vm0, %v1406_v22, %v1408_v10  ;;  %v1464_v40 = vsel %vm584_vm0, %v1457_v12, %v1459_v3  ;;  %v8544_v10 = vld [vmem:[%s13726_s5 + $0x238] sm:$0xff]  }
 0x1f5   : > { %v1420_v32 = vadd.f32 %v1412_v43, %v1384_v31  ;;  %v8596_v12 = vld [vmem:[%s13726_s5 + $0x3d8] sm:$0xff]   ;;  %v8581_v43 = vld [vmem:[%s13726_s5 + $0x360] sm:$0xff]  }
 0x1f6   : > { %v8573_v31 = vld [vmem:[%s13726_s5 + $0x320] sm:$0xff]  }
 0x1f7   : > { %v1196_v36 = vpop.permute.xlu1 %1195 }
 0x1f8   : > { %v1203_v18 = vsel %vm584_vm0, %v1196_v36, %v1198_v21  ;;  %v8538_v21 = vld [vmem:[%s13726_s5 + $0x208] sm:$0xff]  }
 0x1f9   : > { %v1211_v4 = vadd.f32 %v1203_v18, %v1158_v50  ;;  %v8585_v50 = vld [vmem:[%s13726_s5 + $0x380] sm:$0xff]   ;;  %v8578_v36 = vld [vmem:[%s13726_s5 + $0x348] sm:$0xff]  }
 0x1fa   : > { %v8586_v18 = vld [vmem:[%s13726_s5 + $0x388] sm:$0xff]  }
 0x1fb   : > { %v1215_v39 = vmax.f32 %v920_v48, %v1211_v4  ;;  %v1404_v53 = vpop.permute.xlu1 %1403  ;;  %v8557_v48 = vld [vmem:[%s13726_s5 + $0x2a0] sm:$0xff]   ;;  %v8595_v4 = vld [vmem:[%s13726_s5 + $0x3d0] sm:$0xff]  }
 0x1fc   : > { %v1411_v9 = vsel %vm584_vm0, %v1404_v53, %v1406_v22  ;;  %v8549_v22 = vld [vmem:[%s13726_s5 + $0x260] sm:$0xff]   ;;  %v8588_v53 = vld [vmem:[%s13726_s5 + $0x398] sm:$0xff]  }
 0x1fd   : > { %v1419_v58 = vadd.f32 %v1411_v9, %v1383_v61  ;;  %v8580_v61 = vld [vmem:[%s13726_s5 + $0x358] sm:$0xff]   ;;  %v8597_v9 = vld [vmem:[%s13726_s5 + $0x3e0] sm:$0xff]  }
 0x1ff   : > { %v1472_v60 = vadd.f32 %v1464_v40, %v1419_v58  ;;  %v1461_v29 = vpop.permute.xlu1 %1460  ;;  %v8589_v58 = vld [vmem:[%s13726_s5 + $0x3a0] sm:$0xff]   ;;  %v8582_v40 = vld [vmem:[%s13726_s5 + $0x368] sm:$0xff]  }
 0x200   : > { %v1465_v14 = vsel %vm584_vm0, %v1459_v3, %v1461_v29  ;;  %v8593_v3 = vld [vmem:[%s13726_s5 + $0x3c0] sm:$0xff]   ;;  %v8590_v29 = vld [vmem:[%s13726_s5 + $0x3a8] sm:$0xff]  }
 0x201   : > { %v1476_v28 = vmax.f32 %v1215_v39, %v1472_v60  ;;  %v1473_v34 = vadd.f32 %v1465_v14, %v1420_v32  ;;  %v8572_v39 = vld [vmem:[%s13726_s5 + $0x318] sm:$0xff]   ;;  %v8598_v32 = vld [vmem:[%s13726_s5 + $0x3e8] sm:$0xff]   ;;  %v8583_v14 = vld [vmem:[%s13726_s5 + $0x370] sm:$0xff]  }
 0x202   : > { %v8574_v60 = vld [vmem:[%s13726_s5 + $0x328] sm:$0xff]  }
 0x203   : > { %v1477_v38 = vmax.f32 %v1216_v13, %v1473_v34  ;;  %v1492_v2 = vadd.f32 %v1488_v23, %v1476_v28  ;;  %v8568_v13 = vld [vmem:[%s13726_s5 + $0x2f8] sm:$0xff]   ;;  %v8599_v28 = vld [vmem:[%s13726_s5 + $0x3f0] sm:$0xff]  }
 0x204   : > { %v8575_v34 = vld [vmem:[%s13726_s5 + $0x330] sm:$0xff]  }
 0x205   : > { %v1493_v11 = vadd.f32 %v1488_v23, %v1477_v38  ;;  %v11831_v19 = vmax.f32 %v1492_v2, 0.0  ;;  %v8551_v23 = vld [vmem:[%s13726_s5 + $0x270] sm:$0xff]   ;;  %v8584_v2 = vld [vmem:[%s13726_s5 + $0x378] sm:$0xff]  }
 0x206   : > { %v8591_v38 = vld [vmem:[%s13726_s5 + $0x3b0] sm:$0xff]  }
 0x207   : > { %v11829_v52 = vmax.f32 %v1493_v11, 0.0  ;;  %v8600_v11 = vld [vmem:[%s13726_s5 + $0x3f8] sm:$0xff]  }
 0x209   : > { %1631 = vmatprep.mubr.f32.mxu0 %v11829_v52  ;;  %1771 = vmatprep.mubr.f32.mxu1 %v11829_v52 }
 0x20a   : > { %1632 = vmatmul.mubr.f32.gmra.mrb[2].mxu0 %v11831_v19  ;;  %1772 = vmatmul.mubr.f32.gmra.mrb[2].mxu1 %v11831_v19 }
 0x20b   : > { %1906 = vmatprep.mubr.f32.mxu0 %v11604_v42  ;;  %2046 = vmatprep.mubr.f32.mxu1 %v11604_v42 }
 0x20e   : > { %1907 = vmatmul.mubr.f32.vlgmr.msra.gmra.mrb[4].mxu0 %v11607_v56  ;;  %2047 = vmatmul.mubr.f32.vlgmr.msra.gmra.mrb[4].mxu1 %v11607_v56 }
 0x20f   : > { %9490 = vmatpush3.bf16.msra.mxu0 %v8537_v47  ;;  %9522 = vmatpush3.bf16.msra.mxu1 %v8553_v8  ;;  %v8576_v47 = vld [vmem:[%s13726_s5 + $0x338] sm:$0xff]  }
 0x210   : > { %1911 = vmatprep.mubr.f32.mxu0 %v11829_v52  ;;  %2051 = vmatprep.mubr.f32.mxu1 %v11829_v52  ;;  %v8592_v8 = vld [vmem:[%s13726_s5 + $0x3b8] sm:$0xff]  }
 0x211   : > { %9492 = vmatprep.subr.bf16.mxu0 %v8546_v41  ;;  %9524 = vmatprep.subr.bf16.mxu1 %v8562_v63  ;;  %v8609_v41 = vld [vmem:[%s13726_s5 + $0x440] sm:$0xff]  }
 0x212   : > { %1912 = vmatmul.mubr.f32.gmra.mrb[6].mxu0 %v11831_v19  ;;  %2052 = vmatmul.mubr.f32.gmra.mrb[6].mxu1 %v11831_v19  ;;  %v8625_v63 = vld [vmem:[%s13726_s5 + $0x4c0] sm:$0xff]  }
 0x213   : > { %9494 = vmatpush3.bf16.msra.mxu0 %v8538_v21  ;;  %9526 = vmatpush3.bf16.msra.mxu1 %v8554_v37  ;;  %v8601_v21 = vld [vmem:[%s13726_s5 + $0x400] sm:$0xff]  }
 0x214   : > { %2186 = vmatprep.mubr.f32.mxu0 %v11604_v42  ;;  %2326 = vmatprep.mubr.f32.mxu1 %v11604_v42  ;;  %v8617_v37 = vld [vmem:[%s13726_s5 + $0x480] sm:$0xff]  }
 0x215   : > { %9496 = vmatprep.subr.bf16.mxu0 %v8547_v0  ;;  %9528 = vmatprep.subr.bf16.mxu1 %v8563_v20  ;;  %v8610_v0 = vld [vmem:[%s13726_s5 + $0x448] sm:$0xff]  }
 0x216   : > { %v8626_v20 = vld [vmem:[%s13726_s5 + $0x4c8] sm:$0xff]  }
 0x217   : > { %9498 = vmatpush3.bf16.msra.mxu0 %v8539_v27  ;;  %9530 = vmatpush3.bf16.msra.mxu1 %v8555_v6  ;;  %v8602_v27 = vld [vmem:[%s13726_s5 + $0x408] sm:$0xff]  }
 0x218   : > { %9500 = vmatprep.subr.bf16.mxu0 %v8548_v25  ;;  %9532 = vmatprep.subr.bf16.mxu1 %v8564_v16  ;;  %v8618_v6 = vld [vmem:[%s13726_s5 + $0x488] sm:$0xff]   ;;  %v8611_v25 = vld [vmem:[%s13726_s5 + $0x450] sm:$0xff]  }
 0x219   : > { %v8627_v16 = vld [vmem:[%s13726_s5 + $0x4d0] sm:$0xff]  }
 0x21b   : > { %9502 = vmatpush3.bf16.msra.mxu0 %v8540_v62  ;;  %9534 = vmatpush3.bf16.msra.mxu1 %v8556_v59  ;;  %v8603_v62 = vld [vmem:[%s13726_s5 + $0x410] sm:$0xff]  }
 0x21c   : > { %9504 = vmatprep.subr.bf16.mxu0 %v8549_v22  ;;  %9536 = vmatprep.subr.bf16.mxu1 %v8565_v55  ;;  %v8619_v59 = vld [vmem:[%s13726_s5 + $0x490] sm:$0xff]   ;;  %v8612_v22 = vld [vmem:[%s13726_s5 + $0x458] sm:$0xff]  }
 0x21d   : > { %v8628_v55 = vld [vmem:[%s13726_s5 + $0x4d8] sm:$0xff]  }
 0x21f   : > { %9506 = vmatpush3.bf16.msra.mxu0 %v8541_v15  ;;  %9538 = vmatpush3.bf16.msra.mxu1 %v8557_v48  ;;  %v8604_v15 = vld [vmem:[%s13726_s5 + $0x418] sm:$0xff]  }
 0x220   : > { %9508 = vmatprep.subr.bf16.mxu0 %v8550_v33  ;;  %9540 = vmatprep.subr.bf16.mxu1 %v8566_v45  ;;  %v8620_v48 = vld [vmem:[%s13726_s5 + $0x498] sm:$0xff]   ;;  %v8613_v33 = vld [vmem:[%s13726_s5 + $0x460] sm:$0xff]  }
 0x221   : > { %v8629_v45 = vld [vmem:[%s13726_s5 + $0x4e0] sm:$0xff]  }
 0x223   : > { %9510 = vmatpush3.bf16.msra.mxu0 %v8542_v24  ;;  %9542 = vmatpush3.bf16.msra.mxu1 %v8558_v1  ;;  %v8605_v24 = vld [vmem:[%s13726_s5 + $0x420] sm:$0xff]  }
 0x224   : > { %9512 = vmatprep.subr.bf16.mxu0 %v8551_v23  ;;  %9544 = vmatprep.subr.bf16.mxu1 %v8567_v46  ;;  %v8621_v1 = vld [vmem:[%s13726_s5 + $0x4a0] sm:$0xff]   ;;  %v8614_v23 = vld [vmem:[%s13726_s5 + $0x468] sm:$0xff]  }
 0x225   : > { %v8630_v46 = vld [vmem:[%s13726_s5 + $0x4e8] sm:$0xff]  }
 0x227   : > { %9514 = vmatpush3.bf16.msra.mxu0 %v8543_v35  ;;  %9546 = vmatpush3.bf16.msra.mxu1 %v8559_v7  ;;  %v8606_v35 = vld [vmem:[%s13726_s5 + $0x428] sm:$0xff]  }
 0x228   : > { %9516 = vmatprep.subr.bf16.mxu0 %v8552_v26  ;;  %9548 = vmatprep.subr.bf16.mxu1 %v8568_v13  ;;  %v8622_v7 = vld [vmem:[%s13726_s5 + $0x4a8] sm:$0xff]   ;;  %v8615_v26 = vld [vmem:[%s13726_s5 + $0x470] sm:$0xff]  }
 0x229   : > { %v8631_v13 = vld [vmem:[%s13726_s5 + $0x4f0] sm:$0xff]  }
 0x22b   : > { %9518 = vmatpush3.bf16.msra.mxu0 %v8544_v10  ;;  %9550 = vmatpush3.bf16.msra.mxu1 %v8560_v5 }
 0x22c   : > { %9552 = vmatprep.subr.bf16.mxu0 %v8577_v49  ;;  %9584 = vmatprep.subr.bf16.mxu1 %v8593_v3 }
 0x22e   : > { %2187 = vmatmul.mubr.f32.vlgmr.msra.gmra.mrb[8].mxu0 %v11607_v56  ;;  %2327 = vmatmul.mubr.f32.vlgmr.msra.gmra.mrb[8].mxu1 %v11607_v56 }
 0x22f   : > { %2191 = vmatprep.mubr.f32.mxu0 %v11829_v52  ;;  %2331 = vmatprep.mubr.f32.mxu1 %v11829_v52 }
 0x230   : > { %9554 = vmatpush3.bf16.msra.mxu0 %v8569_v54  ;;  %9586 = vmatpush3.bf16.msra.mxu1 %v8585_v50 }
 0x231   : > { %9556 = vmatprep.subr.bf16.mxu0 %v8578_v36  ;;  %9588 = vmatprep.subr.bf16.mxu1 %v8594_v44  ;;  %v8607_v36 = vld [vmem:[%s13726_s5 + $0x430] sm:$0xff]  }
 0x232   : > { %2192 = vmatmul.mubr.f32.gmra.mrb[10].mxu0 %v11831_v19  ;;  %2332 = vmatmul.mubr.f32.gmra.mrb[10].mxu1 %v11831_v19  ;;  %v8623_v44 = vld [vmem:[%s13726_s5 + $0x4b0] sm:$0xff]  }
 0x233   : > { %2466 = vmatprep.mubr.f32.mxu0 %v11604_v42  ;;  %2606 = vmatprep.mubr.f32.mxu1 %v11604_v42 }
 0x234   : > { %9558 = vmatpush3.bf16.msra.mxu0 %v8570_v57  ;;  %9590 = vmatpush3.bf16.msra.mxu1 %v8586_v18  ;;  %v8616_v57 = vld [vmem:[%s13726_s5 + $0x478] sm:$0xff]  }
 0x235   : > { %9560 = vmatprep.subr.bf16.mxu0 %v8579_v51  ;;  %9592 = vmatprep.subr.bf16.mxu1 %v8595_v4  ;;  %v8632_v18 = vld [vmem:[%s13726_s5 + $0x4f8] sm:$0xff]  }
 0x236   : > { %v8608_v51 = vld [vmem:[%s13726_s5 + $0x438] sm:$0xff]  }
 0x237   : > { %v8624_v4 = vld [vmem:[%s13726_s5 + $0x4b8] sm:$0xff]  }
 0x238   : > { %9562 = vmatpush3.bf16.msra.mxu0 %v8571_v17  ;;  %9594 = vmatpush3.bf16.msra.mxu1 %v8587_v30  ;;  %v8641_v17 = vld [vmem:[%s13726_s5 + $0x540] sm:$0xff]  }
 0x239   : > { %9564 = vmatprep.subr.bf16.mxu0 %v8580_v61  ;;  %9596 = vmatprep.subr.bf16.mxu1 %v8596_v12  ;;  %v8657_v30 = vld [vmem:[%s13726_s5 + $0x5c0] sm:$0xff]  }
 0x23a   : > { %v8633_v61 = vld [vmem:[%s13726_s5 + $0x500] sm:$0xff]  }
 0x23b   : > { %v8649_v12 = vld [vmem:[%s13726_s5 + $0x580] sm:$0xff]  }
 0x23c   : > { %9566 = vmatpush3.bf16.msra.mxu0 %v8572_v39  ;;  %9598 = vmatpush3.bf16.msra.mxu1 %v8588_v53  ;;  %v8642_v39 = vld [vmem:[%s13726_s5 + $0x548] sm:$0xff]  }
 0x23d   : > { %9568 = vmatprep.subr.bf16.mxu0 %v8581_v43  ;;  %9600 = vmatprep.subr.bf16.mxu1 %v8597_v9  ;;  %v8658_v53 = vld [vmem:[%s13726_s5 + $0x5c8] sm:$0xff]  }
 0x23e   : > { %v8634_v43 = vld [vmem:[%s13726_s5 + $0x508] sm:$0xff]  }
 0x23f   : > { %v8650_v9 = vld [vmem:[%s13726_s5 + $0x588] sm:$0xff]  }
 0x240   : > { %9570 = vmatpush3.bf16.msra.mxu0 %v8573_v31  ;;  %9602 = vmatpush3.bf16.msra.mxu1 %v8589_v58  ;;  %v8643_v31 = vld [vmem:[%s13726_s5 + $0x550] sm:$0xff]  }
 0x241   : > { %9572 = vmatprep.subr.bf16.mxu0 %v8582_v40  ;;  %9604 = vmatprep.subr.bf16.mxu1 %v8598_v32  ;;  %v8659_v58 = vld [vmem:[%s13726_s5 + $0x5d0] sm:$0xff]  }
 0x242   : > { %v8635_v40 = vld [vmem:[%s13726_s5 + $0x510] sm:$0xff]  }
 0x243   : > { %v8651_v32 = vld [vmem:[%s13726_s5 + $0x590] sm:$0xff]  }
 0x244   : > { %9574 = vmatpush3.bf16.msra.mxu0 %v8574_v60  ;;  %9606 = vmatpush3.bf16.msra.mxu1 %v8590_v29  ;;  %v8644_v60 = vld [vmem:[%s13726_s5 + $0x558] sm:$0xff]  }
 0x245   : > { %9576 = vmatprep.subr.bf16.mxu0 %v8583_v14  ;;  %9608 = vmatprep.subr.bf16.mxu1 %v8599_v28  ;;  %v8660_v29 = vld [vmem:[%s13726_s5 + $0x5d8] sm:$0xff]  }
 0x246   : > { %v8636_v14 = vld [vmem:[%s13726_s5 + $0x518] sm:$0xff]  }
 0x247   : > { %v8652_v28 = vld [vmem:[%s13726_s5 + $0x598] sm:$0xff]  }
 0x248   : > { %9578 = vmatpush3.bf16.msra.mxu0 %v8575_v34  ;;  %9610 = vmatpush3.bf16.msra.mxu1 %v8591_v38  ;;  %v8645_v34 = vld [vmem:[%s13726_s5 + $0x560] sm:$0xff]  }
 0x249   : > { %9580 = vmatprep.subr.bf16.mxu0 %v8584_v2  ;;  %9612 = vmatprep.subr.bf16.mxu1 %v8600_v11  ;;  %v8661_v38 = vld [vmem:[%s13726_s5 + $0x5e0] sm:$0xff]  }
 0x24a   : > { %v8637_v2 = vld [vmem:[%s13726_s5 + $0x520] sm:$0xff]  }
 0x24b   : > { %v8653_v11 = vld [vmem:[%s13726_s5 + $0x5a0] sm:$0xff]  }
 0x24c   : > { %9582 = vmatpush3.bf16.msra.mxu0 %v8576_v47  ;;  %9614 = vmatpush3.bf16.msra.mxu1 %v8592_v8  ;;  %v8646_v47 = vld [vmem:[%s13726_s5 + $0x568] sm:$0xff]  }
 0x24d   : > { %9616 = vmatprep.subr.bf16.mxu0 %v8609_v41  ;;  %9648 = vmatprep.subr.bf16.mxu1 %v8625_v63  ;;  %v8662_v8 = vld [vmem:[%s13726_s5 + $0x5e8] sm:$0xff]  }
 0x24e   : > { %v8638_v41 = vld [vmem:[%s13726_s5 + $0x528] sm:$0xff]  }
 0x24f   : > { %2467 = vmatmul.mubr.f32.vlgmr.msra.gmra.mrb[12].mxu0 %v11607_v56  ;;  %2607 = vmatmul.mubr.f32.vlgmr.msra.gmra.mrb[12].mxu1 %v11607_v56  ;;  %v8654_v63 = vld [vmem:[%s13726_s5 + $0x5a8] sm:$0xff]  }
 0x250   : > { %2471 = vmatprep.mubr.f32.mxu0 %v11829_v52  ;;  %2611 = vmatprep.mubr.f32.mxu1 %v11829_v52 }
 0x251   : > { %9618 = vmatpush3.bf16.msra.mxu0 %v8601_v21  ;;  %9650 = vmatpush3.bf16.msra.mxu1 %v8617_v37  ;;  %v8647_v21 = vld [vmem:[%s13726_s5 + $0x570] sm:$0xff]  }
 0x252   : > { %9620 = vmatprep.subr.bf16.mxu0 %v8610_v0  ;;  %9652 = vmatprep.subr.bf16.mxu1 %v8626_v20  ;;  %v8663_v37 = vld [vmem:[%s13726_s5 + $0x5f0] sm:$0xff]  }
 0x253   : > { %2472 = vmatmul.mubr.f32.gmra.mrb[14].mxu0 %v11831_v19  ;;  %2612 = vmatmul.mubr.f32.gmra.mrb[14].mxu1 %v11831_v19  ;;  %v8639_v0 = vld [vmem:[%s13726_s5 + $0x530] sm:$0xff]  }
 0x254   : > { %2746 = vmatprep.mubr.f32.mxu0 %v11604_v42  ;;  %2886 = vmatprep.mubr.f32.mxu1 %v11604_v42  ;;  %v8655_v20 = vld [vmem:[%s13726_s5 + $0x5b0] sm:$0xff]  }
 0x255   : > { %9622 = vmatpush3.bf16.msra.mxu0 %v8602_v27  ;;  %9654 = vmatpush3.bf16.msra.mxu1 %v8618_v6  ;;  %v8648_v27 = vld [vmem:[%s13726_s5 + $0x578] sm:$0xff]  }
 0x256   : > { %9624 = vmatprep.subr.bf16.mxu0 %v8611_v25  ;;  %9656 = vmatprep.subr.bf16.mxu1 %v8627_v16  ;;  %v8664_v6 = vld [vmem:[%s13726_s5 + $0x5f8] sm:$0xff]  }
 0x257   : > { %v8640_v25 = vld [vmem:[%s13726_s5 + $0x538] sm:$0xff]  }
 0x258   : > { %v8656_v16 = vld [vmem:[%s13726_s5 + $0x5b8] sm:$0xff]  }
 0x259   : > { %9626 = vmatpush3.bf16.msra.mxu0 %v8603_v62  ;;  %9658 = vmatpush3.bf16.msra.mxu1 %v8619_v59  ;;  %v8673_v62 = vld [vmem:[%s13726_s5 + $0x640] sm:$0xff]  }
 0x25a   : > { %9628 = vmatprep.subr.bf16.mxu0 %v8612_v22  ;;  %9660 = vmatprep.subr.bf16.mxu1 %v8628_v55  ;;  %v8689_v59 = vld [vmem:[%s13726_s5 + $0x6c0] sm:$0xff]  }
 0x25b   : > { %v8665_v22 = vld [vmem:[%s13726_s5 + $0x600] sm:$0xff]  }
 0x25c   : > { %v8681_v55 = vld [vmem:[%s13726_s5 + $0x680] sm:$0xff]  }
 0x25d   : > { %9630 = vmatpush3.bf16.msra.mxu0 %v8604_v15  ;;  %9662 = vmatpush3.bf16.msra.mxu1 %v8620_v48  ;;  %v8674_v15 = vld [vmem:[%s13726_s5 + $0x648] sm:$0xff]  }
 0x25e   : > { %9632 = vmatprep.subr.bf16.mxu0 %v8613_v33  ;;  %9664 = vmatprep.subr.bf16.mxu1 %v8629_v45  ;;  %v8690_v48 = vld [vmem:[%s13726_s5 + $0x6c8] sm:$0xff]  }
 0x25f   : > { %v8666_v33 = vld [vmem:[%s13726_s5 + $0x608] sm:$0xff]  }
 0x260   : > { %v8682_v45 = vld [vmem:[%s13726_s5 + $0x688] sm:$0xff]  }
 0x261   : > { %9634 = vmatpush3.bf16.msra.mxu0 %v8605_v24  ;;  %9666 = vmatpush3.bf16.msra.mxu1 %v8621_v1  ;;  %v8675_v24 = vld [vmem:[%s13726_s5 + $0x650] sm:$0xff]  }
 0x262   : > { %9636 = vmatprep.subr.bf16.mxu0 %v8614_v23  ;;  %9668 = vmatprep.subr.bf16.mxu1 %v8630_v46  ;;  %v8691_v1 = vld [vmem:[%s13726_s5 + $0x6d0] sm:$0xff]  }
 0x263   : > { %v8667_v23 = vld [vmem:[%s13726_s5 + $0x610] sm:$0xff]  }
 0x264   : > { %v8761_v10 = vpop.f32.mrb[0].mxu0  ;;  %v8799_v5 = vpop.f32.mrb[0].mxu1  ;;  %v8683_v46 = vld [vmem:[%s13726_s5 + $0x690] sm:$0xff]  }
 0x265   : > { %9638 = vmatpush3.bf16.msra.mxu0 %v8606_v35  ;;  %9670 = vmatpush3.bf16.msra.mxu1 %v8622_v7  ;;  %v8762_v49 = vpop.f32.mrb[1].mxu0  ;;  %v8800_v3 = vpop.f32.mrb[1].mxu1  ;;  %v8676_v35 = vld [vmem:[%s13726_s5 + $0x658] sm:$0xff]  }
 0x266   : > { %v12127_v54 = vadd.f32 %v8762_v49, %v8761_v10  ;;  %v12129_v50 = vadd.f32 %v8800_v3, %v8799_v5  ;;  %9640 = vmatprep.subr.bf16.mxu0 %v8615_v26  ;;  %9672 = vmatprep.subr.bf16.mxu1 %v8631_v13  ;;  %v8692_v7 = vld [vmem:[%s13726_s5 + $0x6d8] sm:$0xff]   ;;  %v8677_v10 = vld [vmem:[%s13726_s5 + $0x660] sm:$0xff]  }
 0x267   : > { %v8668_v26 = vld [vmem:[%s13726_s5 + $0x618] sm:$0xff]   ;;  %v8693_v5 = vld [vmem:[%s13726_s5 + $0x6e0] sm:$0xff]  }
 0x268   : > { %v8684_v13 = vld [vmem:[%s13726_s5 + $0x698] sm:$0xff]   ;;  %v8669_v49 = vld [vmem:[%s13726_s5 + $0x620] sm:$0xff]  }
 0x269   : > { %9642 = vmatpush3.bf16.msra.mxu0 %v8607_v36  ;;  %9674 = vmatpush3.bf16.msra.mxu1 %v8623_v44  ;;  %v8685_v3 = vld [vmem:[%s13726_s5 + $0x6a0] sm:$0xff]   ;;  %v8678_v36 = vld [vmem:[%s13726_s5 + $0x668] sm:$0xff]  }
 0x26a   : > { %9644 = vmatprep.subr.bf16.mxu0 %v8616_v57  ;;  %9676 = vmatprep.subr.bf16.mxu1 %v8632_v18  ;;  %v8694_v44 = vld [vmem:[%s13726_s5 + $0x6e8] sm:$0xff]  }
 0x26b   : > { %v8670_v57 = vld [vmem:[%s13726_s5 + $0x628] sm:$0xff]  }
 0x26c   : > { %v8686_v18 = vld [vmem:[%s13726_s5 + $0x6a8] sm:$0xff]  }
 0x26d   : > { %9646 = vmatpush3.bf16.msra.mxu0 %v8608_v51  ;;  %9678 = vmatpush3.bf16.msra.mxu1 %v8624_v4  ;;  %v8679_v51 = vld [vmem:[%s13726_s5 + $0x670] sm:$0xff]  }
 0x26e   : > { %9680 = vmatprep.subr.bf16.mxu0 %v8641_v17  ;;  %9712 = vmatprep.subr.bf16.mxu1 %v8657_v30  ;;  %v8695_v4 = vld [vmem:[%s13726_s5 + $0x6f0] sm:$0xff]  }
 0x26f   : > { %v8671_v17 = vld [vmem:[%s13726_s5 + $0x630] sm:$0xff]  }
 0x270   : > { %2747 = vmatmul.mubr.f32.vlgmr.msra.gmra.mrb[16].mxu0 %v11607_v56  ;;  %2887 = vmatmul.mubr.f32.vlgmr.msra.gmra.mrb[16].mxu1 %v11607_v56  ;;  %v8687_v30 = vld [vmem:[%s13726_s5 + $0x6b0] sm:$0xff]  }
 0x271   : > { %2751 = vmatprep.mubr.f32.mxu0 %v11829_v52  ;;  %2891 = vmatprep.mubr.f32.mxu1 %v11829_v52 }
 0x272   : > { %9682 = vmatpush3.bf16.msra.mxu0 %v8633_v61  ;;  %9714 = vmatpush3.bf16.msra.mxu1 %v8649_v12  ;;  %v8680_v61 = vld [vmem:[%s13726_s5 + $0x678] sm:$0xff]  }
 0x273   : > { %9684 = vmatprep.subr.bf16.mxu0 %v8642_v39  ;;  %9716 = vmatprep.subr.bf16.mxu1 %v8658_v53  ;;  %v8696_v12 = vld [vmem:[%s13726_s5 + $0x6f8] sm:$0xff]  }
 0x274   : > { %2752 = vmatmul.mubr.f32.gmra.mrb[18].mxu0 %v11831_v19  ;;  %2892 = vmatmul.mubr.f32.gmra.mrb[18].mxu1 %v11831_v19  ;;  %v8672_v39 = vld [vmem:[%s13726_s5 + $0x638] sm:$0xff]  }
 0x275   : > { %3026 = vmatprep.mubr.f32.mxu0 %v11604_v42  ;;  %3166 = vmatprep.mubr.f32.mxu1 %v11604_v42  ;;  %v8688_v53 = vld [vmem:[%s13726_s5 + $0x6b8] sm:$0xff]  }
 0x276   : > { %9686 = vmatpush3.bf16.msra.mxu0 %v8634_v43  ;;  %9718 = vmatpush3.bf16.msra.mxu1 %v8650_v9  ;;  %v8705_v43 = vld [vmem:[%s13726_s5 + $0x740] sm:$0xff]  }
 0x277   : > { %9688 = vmatprep.subr.bf16.mxu0 %v8643_v31  ;;  %9720 = vmatprep.subr.bf16.mxu1 %v8659_v58  ;;  %v8721_v9 = vld [vmem:[%s13726_s5 + $0x7c0] sm:$0xff]  }
 0x278   : > { %v8697_v31 = vld [vmem:[%s13726_s5 + $0x700] sm:$0xff]  }
 0x279   : > { %v8713_v58 = vld [vmem:[%s13726_s5 + $0x780] sm:$0xff]  }
 0x27a   : > { %9690 = vmatpush3.bf16.msra.mxu0 %v8635_v40  ;;  %9722 = vmatpush3.bf16.msra.mxu1 %v8651_v32  ;;  %v8706_v40 = vld [vmem:[%s13726_s5 + $0x748] sm:$0xff]  }
 0x27b   : > { %9692 = vmatprep.subr.bf16.mxu0 %v8644_v60  ;;  %9724 = vmatprep.subr.bf16.mxu1 %v8660_v29  ;;  %v8722_v32 = vld [vmem:[%s13726_s5 + $0x7c8] sm:$0xff]  }
 0x27c   : > { %v8698_v60 = vld [vmem:[%s13726_s5 + $0x708] sm:$0xff]  }
 0x27d   : > { %v8714_v29 = vld [vmem:[%s13726_s5 + $0x788] sm:$0xff]  }
 0x27e   : > { %9694 = vmatpush3.bf16.msra.mxu0 %v8636_v14  ;;  %9726 = vmatpush3.bf16.msra.mxu1 %v8652_v28  ;;  %v8707_v14 = vld [vmem:[%s13726_s5 + $0x750] sm:$0xff]  }
 0x27f   : > { %9696 = vmatprep.subr.bf16.mxu0 %v8645_v34  ;;  %9728 = vmatprep.subr.bf16.mxu1 %v8661_v38  ;;  %v8723_v28 = vld [vmem:[%s13726_s5 + $0x7d0] sm:$0xff]  }
 0x280   : > { %v8699_v34 = vld [vmem:[%s13726_s5 + $0x710] sm:$0xff]  }
 0x281   : > { %v8715_v38 = vld [vmem:[%s13726_s5 + $0x790] sm:$0xff]  }
 0x282   : > { %9698 = vmatpush3.bf16.msra.mxu0 %v8637_v2  ;;  %9730 = vmatpush3.bf16.msra.mxu1 %v8653_v11  ;;  %v8708_v2 = vld [vmem:[%s13726_s5 + $0x758] sm:$0xff]  }
 0x283   : > { %9700 = vmatprep.subr.bf16.mxu0 %v8646_v47  ;;  %9732 = vmatprep.subr.bf16.mxu1 %v8662_v8  ;;  %v8700_v11 = vld [vmem:[%s13726_s5 + $0x718] sm:$0xff]   ;;  %v8709_v8 = vld [vmem:[%s13726_s5 + $0x760] sm:$0xff]  }
 0x284   : > { %v8716_v47 = vld [vmem:[%s13726_s5 + $0x798] sm:$0xff]  }
 0x286   : > { %9702 = vmatpush3.bf16.msra.mxu0 %v8638_v41  ;;  %9734 = vmatpush3.bf16.msra.mxu1 %v8654_v63  ;;  %v8725_v41 = vld [vmem:[%s13726_s5 + $0x7e0] sm:$0xff]  }
 0x287   : > { %9704 = vmatprep.subr.bf16.mxu0 %v8647_v21  ;;  %9736 = vmatprep.subr.bf16.mxu1 %v8663_v37  ;;  %v8701_v63 = vld [vmem:[%s13726_s5 + $0x720] sm:$0xff]   ;;  %v8710_v37 = vld [vmem:[%s13726_s5 + $0x768] sm:$0xff]  }
 0x288   : > { %v8717_v21 = vld [vmem:[%s13726_s5 + $0x7a0] sm:$0xff]  }
 0x28a   : > { %9706 = vmatpush3.bf16.msra.mxu0 %v8639_v0  ;;  %9738 = vmatpush3.bf16.msra.mxu1 %v8655_v20  ;;  %v8726_v0 = vld [vmem:[%s13726_s5 + $0x7e8] sm:$0xff]  }
 0x28b   : > { %9708 = vmatprep.subr.bf16.mxu0 %v8648_v27  ;;  %9740 = vmatprep.subr.bf16.mxu1 %v8664_v6  ;;  %v8702_v20 = vld [vmem:[%s13726_s5 + $0x728] sm:$0xff]   ;;  %v8711_v6 = vld [vmem:[%s13726_s5 + $0x770] sm:$0xff]  }
 0x28c   : > { %v8718_v27 = vld [vmem:[%s13726_s5 + $0x7a8] sm:$0xff]  }
 0x28e   : > { %9710 = vmatpush3.bf16.msra.mxu0 %v8640_v25  ;;  %9742 = vmatpush3.bf16.msra.mxu1 %v8656_v16  ;;  %v8727_v25 = vld [vmem:[%s13726_s5 + $0x7f0] sm:$0xff]  }
 0x28f   : > { %9744 = vmatprep.subr.bf16.mxu0 %v8673_v62  ;;  %9776 = vmatprep.subr.bf16.mxu1 %v8689_v59  ;;  %v8703_v16 = vld [vmem:[%s13726_s5 + $0x730] sm:$0xff]   ;;  %v8712_v59 = vld [vmem:[%s13726_s5 + $0x778] sm:$0xff]  }
 0x290   : > { %v8719_v62 = vld [vmem:[%s13726_s5 + $0x7b0] sm:$0xff]  }
 0x291   : > { %3027 = vmatmul.mubr.f32.vlgmr.msra.gmra.mrb[20].mxu0 %v11607_v56  ;;  %3167 = vmatmul.mubr.f32.vlgmr.msra.gmra.mrb[20].mxu1 %v11607_v56 }
 0x292   : > { %3031 = vmatprep.mubr.f32.mxu0 %v11829_v52  ;;  %3171 = vmatprep.mubr.f32.mxu1 %v11829_v52 }
 0x293   : > { %9746 = vmatpush3.bf16.msra.mxu0 %v8665_v22  ;;  %9778 = vmatpush3.bf16.msra.mxu1 %v8681_v55  ;;  %v8728_v22 = vld [vmem:[%s13726_s5 + $0x7f8] sm:$0xff]  }
 0x294   : > { %9748 = vmatprep.subr.bf16.mxu0 %v8674_v15  ;;  %9780 = vmatprep.subr.bf16.mxu1 %v8690_v48  ;;  %v8704_v55 = vld [vmem:[%s13726_s5 + $0x738] sm:$0xff]   ;;  %v10554_v48 = vmov 0.0|0.0  }
 0x295   : > { %3032 = vmatmul.mubr.f32.gmra.mrb[22].mxu0 %v11831_v19  ;;  %3172 = vmatmul.mubr.f32.gmra.mrb[22].mxu1 %v11831_v19  ;;  %v8720_v15 = vld [vmem:[%s13726_s5 + $0x7b8] sm:$0xff]  }
 0x296   : > { %3306 = vmatprep.mubr.f32.mxu0 %v11604_v42  ;;  %3446 = vmatprep.mubr.f32.mxu1 %v11604_v42 }
 0x297   : > { %9750 = vmatpush3.bf16.msra.mxu0 %v8666_v33  ;;  %9782 = vmatpush3.bf16.msra.mxu1 %v8682_v45 }
 0x298   : > { %9752 = vmatprep.subr.bf16.mxu0 %v8675_v24  ;;  %9784 = vmatprep.subr.bf16.mxu1 %v8691_v1 }
 0x29b   : > { %9754 = vmatpush3.bf16.msra.mxu0 %v8667_v23  ;;  %9786 = vmatpush3.bf16.msra.mxu1 %v8683_v46 }
 0x29c   : > { %9756 = vmatprep.subr.bf16.mxu0 %v8676_v35  ;;  %9788 = vmatprep.subr.bf16.mxu1 %v8692_v7 }
 0x29f   : > { %9758 = vmatpush3.bf16.msra.mxu0 %v8668_v26  ;;  %9790 = vmatpush3.bf16.msra.mxu1 %v8684_v13 }
 0x2a0   : > { %9760 = vmatprep.subr.bf16.mxu0 %v8677_v10  ;;  %9792 = vmatprep.subr.bf16.mxu1 %v8693_v5 }
 0x2a3   : > { %9762 = vmatpush3.bf16.msra.mxu0 %v8669_v49  ;;  %9794 = vmatpush3.bf16.msra.mxu1 %v8685_v3 }
 0x2a4   : > { %9764 = vmatprep.subr.bf16.mxu0 %v8678_v36  ;;  %9796 = vmatprep.subr.bf16.mxu1 %v8694_v44 }
 0x2a7   : > { %9766 = vmatpush3.bf16.msra.mxu0 %v8670_v57  ;;  %9798 = vmatpush3.bf16.msra.mxu1 %v8686_v18  ;;  %v12489_v18 = vld [vmem:[%s13724_s3 + $0x8] sm:$0xff] }
 0x2a8   : > { %9768 = vmatprep.subr.bf16.mxu0 %v8679_v51  ;;  %9800 = vmatprep.subr.bf16.mxu1 %v8695_v4 }
 0x2ab   : > { %9770 = vmatpush3.bf16.msra.mxu0 %v8671_v17  ;;  %9802 = vmatpush3.bf16.msra.mxu1 %v8687_v30 }
 0x2ac   : > { %9772 = vmatprep.subr.bf16.mxu0 %v8680_v61  ;;  %9804 = vmatprep.subr.bf16.mxu1 %v8696_v12 }
 0x2af   : > { %9774 = vmatpush3.bf16.msra.mxu0 %v8672_v39  ;;  %9806 = vmatpush3.bf16.msra.mxu1 %v8688_v53 }
 0x2b0   : > { %9808 = vmatprep.subr.bf16.mxu0 %v8705_v43  ;;  %9840 = vmatprep.subr.bf16.mxu1 %v8721_v9 }
 0x2b2   : > { %3307 = vmatmul.mubr.f32.vlgmr.msra.gmra.mrb[24].mxu0 %v11607_v56  ;;  %3447 = vmatmul.mubr.f32.vlgmr.msra.gmra.mrb[24].mxu1 %v11607_v56 }
 0x2b3   : > { %3311 = vmatprep.mubr.f32.mxu0 %v11829_v52  ;;  %3451 = vmatprep.mubr.f32.mxu1 %v11829_v52 }
 0x2b4   : > { %9810 = vmatpush3.bf16.msra.mxu0 %v8697_v31  ;;  %9842 = vmatpush3.bf16.msra.mxu1 %v8713_v58 }
 0x2b5   : > { %9812 = vmatprep.subr.bf16.mxu0 %v8706_v40  ;;  %9844 = vmatprep.subr.bf16.mxu1 %v8722_v32 }
 0x2b6   : > { %3312 = vmatmul.mubr.f32.gmra.mrb[26].mxu0 %v11831_v19  ;;  %3452 = vmatmul.mubr.f32.gmra.mrb[26].mxu1 %v11831_v19 }
 0x2b7   : > { %3586 = vmatprep.mubr.f32.mxu0 %v11604_v42  ;;  %3726 = vmatprep.mubr.f32.mxu1 %v11604_v42  ;;  %v8724_v42 = vld [vmem:[%s13726_s5 + $0x7d8] sm:$0xff]  }
 0x2b8   : > { %9814 = vmatpush3.bf16.msra.mxu0 %v8698_v60  ;;  %9846 = vmatpush3.bf16.msra.mxu1 %v8714_v29 }
 0x2b9   : > { %9816 = vmatprep.subr.bf16.mxu0 %v8707_v14  ;;  %9848 = vmatprep.subr.bf16.mxu1 %v8723_v28 }
 0x2bc   : > { %9818 = vmatpush3.bf16.msra.mxu0 %v8699_v34  ;;  %9850 = vmatpush3.bf16.msra.mxu1 %v8715_v38 }
 0x2bd   : > { %9820 = vmatprep.subr.bf16.mxu0 %v8708_v2  ;;  %9852 = vmatprep.subr.bf16.mxu1 %v8724_v42 }
 0x2c0   : > { %9822 = vmatpush3.bf16.msra.mxu0 %v8700_v11  ;;  %9854 = vmatpush3.bf16.msra.mxu1 %v8716_v47 }
 0x2c1   : > { %9824 = vmatprep.subr.bf16.mxu0 %v8709_v8  ;;  %9856 = vmatprep.subr.bf16.mxu1 %v8725_v41 }
 0x2c4   : > { %9826 = vmatpush3.bf16.msra.mxu0 %v8701_v63  ;;  %9858 = vmatpush3.bf16.msra.mxu1 %v8717_v21 }
 0x2c5   : > { %9828 = vmatprep.subr.bf16.mxu0 %v8710_v37  ;;  %9860 = vmatprep.subr.bf16.mxu1 %v8726_v0 }
 0x2c8   : > { %9830 = vmatpush3.bf16.msra.mxu0 %v8702_v20  ;;  %9862 = vmatpush3.bf16.msra.mxu1 %v8718_v27 }
 0x2c9   : > { %9832 = vmatprep.subr.bf16.mxu0 %v8711_v6  ;;  %9864 = vmatprep.subr.bf16.mxu1 %v8727_v25 }
 0x2cc   : > { %9834 = vmatpush3.bf16.msra.mxu0 %v8703_v16  ;;  %9866 = vmatpush3.bf16.msra.mxu1 %v8719_v62  ;;  %v4110_v16 = vld [vmem:[%s13725_s4] sm:$0xff] }
 0x2cd   : > { %9836 = vmatprep.subr.bf16.mxu0 %v8712_v59  ;;  %9868 = vmatprep.subr.bf16.mxu1 %v8728_v22  ;;  %v4112_v22 = vld [vmem:[%s13725_s4 + $0x10] sm:$0xff] }
 0x2ce   : > { %4116 = vperm.xlu1 %10078, %v4110_v16   ;;  %v10090_v16 = vld [vmem:[%s13727_s6 + $0x314] ss:$8 sps:$4 sm:$0xff]  }
 0x2d0   : > { %9838 = vmatpush3.bf16.msra.mxu0 %v8704_v55  ;;  %9870 = vmatpush3.bf16.msra.mxu1 %v8720_v15 }
 0x2d1   : > { %9871 = vmatprep.subr.bf16.mxu1 %v10554_v48  ;;  %9925 = vmatprep.subr.bf16.mxu0 %v10554_v48 }
 0x2d2   : > { %4126 = vperm.xlu1 %10078, %v4112_v22   ;;  %v10093_v22 = vld [vmem:[%s13727_s6 + $0x24] ss:$8 sps:$4 sm:$0xff]  }
 0x2d3   : > { %3587 = vmatmul.mubr.f32.vlgmr.msra.gmra.mrb[28].mxu0 %v11607_v56  ;;  %3727 = vmatmul.mubr.f32.vlgmr.msra.gmra.mrb[28].mxu1 %v11607_v56 }
 0x2d4   : > { %3591 = vmatprep.mubr.f32.mxu0 %v11829_v52  ;;  %3731 = vmatprep.mubr.f32.mxu1 %v11829_v52 }
 0x2d7   : > { %3592 = vmatmul.mubr.f32.gmra.mrb[30].mxu0 %v11831_v19  ;;  %3732 = vmatmul.mubr.f32.gmra.mrb[30].mxu1 %v11831_v19 }
 0x2d8   : > { %7159 = vmatprep.mubr.msk.f32.mxu1 %vm3745_vm1, %v12489_v18  ;;  %7167 = vmatprep.mubr.msk.f32.mxu0 %vm3745_vm1, %v12489_v18 }
 0x2dd   : > { %v8764_v33 = vpop.f32.mrb[2].mxu0  ;;  %v8802_v45 = vpop.f32.mrb[2].mxu1 }
 0x2de   : > { %v8765_v24 = vpop.f32.mrb[3].mxu0  ;;  %v8803_v1 = vpop.f32.mrb[3].mxu1 }
 0x2df   : > { %v8766_v23 = vadd.f32 %v8765_v24, %v8764_v33  ;;  %v8804_v46 = vadd.f32 %v8803_v1, %v8802_v45 }
 0x2e1   : > { %v9872_v35 = vpack.c.bf16 %v8766_v23, %v12127_v54  ;;  %v12471_v7 = vpack.c.bf16 %v8804_v46, %v12129_v50  ;;  %v8837_v56 = vpop.f32.mrb[4].mxu0  ;;  %v8875_v26 = vpop.f32.mrb[4].mxu1 }
 0x2e2   : > { %v8838_v13 = vpop.f32.mrb[5].mxu0  ;;  %v8876_v10 = vpop.f32.mrb[5].mxu1 }
 0x2e3   : > { %v8839_v52 = vadd.f32 %v8838_v13, %v8837_v56  ;;  %v12473_v5 = vadd.f32 %v8876_v10, %v8875_v26  ;;  %9873 = vmatpush1.bf16.msra.mxu1 %v9872_v35 }
 0x2e4   : > { %9874 = vmatprep.subr.bf16.mxu1 %v10554_v48 }
 0x2e5   : > { %v8840_v19 = vpop.f32.mrb[6].mxu0  ;;  %v8878_v49 = vpop.f32.mrb[6].mxu1 }
 0x2e6   : > { %v8841_v3 = vpop.f32.mrb[7].mxu0  ;;  %v8879_v36 = vpop.f32.mrb[7].mxu1 }
 0x2e7   : > { %v8842_v44 = vadd.f32 %v8841_v3, %v8840_v19  ;;  %v12476_v57 = vadd.f32 %v8879_v36, %v8878_v49  ;;  %9876 = vmatpush1.bf16.msra.mxu1 %v12471_v7 }
 0x2e8   : > { %9877 = vmatprep.subr.bf16.mxu1 %v10554_v48 }
 0x2e9   : > { %v12480_v54 = vpack.c.bf16 %v8842_v44, %v8839_v52  ;;  %v9905_v50 = vpack.c.bf16 %v12476_v57, %v12473_v5 }
 0x2eb   : > { %9879 = vmatpush1.bf16.msra.mxu1 %v12480_v54 }
 0x2ec   : > { %9880 = vmatprep.subr.bf16.mxu1 %v10554_v48 }
 0x301   : > { %v8913_v51 = vpop.f32.mrb[8].mxu0  ;;  %v8951_v4 = vpop.f32.mrb[8].mxu1 }
 0x302   : > { %v8914_v17 = vpop.f32.mrb[9].mxu0  ;;  %v8952_v30 = vpop.f32.mrb[9].mxu1 }
 0x303   : > { %v8915_v61 = vadd.f32 %v8914_v17, %v8913_v51  ;;  %v8953_v12 = vadd.f32 %v8952_v30, %v8951_v4  ;;  %v12534_v4 = vld [vmem:[%s13724_s3] sm:$0xff]  ;;  %v12540_v17 = vld [vmem:[%s13724_s3 + $0x18] sm:$0xff]  ;;  %v12550_v30 = vld [vmem:[%s13724_s3 + $0x10] sm:$0xff] }
 0x305   : > { %v8916_v39 = vpop.f32.mrb[10].mxu0  ;;  %v8954_v53 = vpop.f32.mrb[10].mxu1 }
 0x306   : > { %v8917_v43 = vpop.f32.mrb[11].mxu0  ;;  %v8955_v9 = vpop.f32.mrb[11].mxu1 }
 0x307   : > { %v8918_v31 = vadd.f32 %v8917_v43, %v8916_v39  ;;  %v8956_v58 = vadd.f32 %v8955_v9, %v8954_v53 }
 0x309   : > { %v9881_v40 = vpack.c.bf16 %v8918_v31, %v8915_v61  ;;  %v12495_v32 = vpack.c.bf16 %v8956_v58, %v8953_v12  ;;  %v12556_v61 = vld [vmem:[%s13724_s3 + $0x28] sm:$0xff]  ;;  %v12571_v12 = vld [vmem:[%s13724_s3 + $0x38] sm:$0xff] }
 0x30b   : > { %9882 = vmatpush1.bf16.msra.mxu1 %v9881_v40  ;;  %9927 = vmatpush1.bf16.msra.mxu0 %v9881_v40 }
 0x30c   : > { %9883 = vmatprep.subr.bf16.mxu1 %v10554_v48  ;;  %9928 = vmatprep.subr.bf16.mxu0 %v10554_v48 }
 0x30f   : > { %9885 = vmatpush1.bf16.msra.mxu1 %v12495_v32  ;;  %9930 = vmatpush1.bf16.msra.mxu0 %v12495_v32 }
 0x310   : > { %9886 = vmatprep.subr.bf16.mxu1 %v10554_v48  ;;  %9931 = vmatprep.subr.bf16.mxu0 %v10554_v48 }
 0x322   : > { %v8989_v60 = vpop.f32.mrb[12].mxu0  ;;  %v9027_v29 = vpop.f32.mrb[12].mxu1 }
 0x323   : > { %v8990_v14 = vpop.f32.mrb[13].mxu0  ;;  %v9028_v28 = vpop.f32.mrb[13].mxu1 }
 0x324   : > { %v8991_v34 = vadd.f32 %v8990_v14, %v8989_v60  ;;  %v9029_v38 = vadd.f32 %v9028_v28, %v9027_v29 }
 0x326   : > { %v8992_v2 = vpop.f32.mrb[14].mxu0  ;;  %v9030_v42 = vpop.f32.mrb[14].mxu1 }
 0x327   : > { %v8993_v11 = vpop.f32.mrb[15].mxu0  ;;  %v9031_v47 = vpop.f32.mrb[15].mxu1 }
 0x328   : > { %v8994_v8 = vadd.f32 %v8993_v11, %v8992_v2  ;;  %v9032_v41 = vadd.f32 %v9031_v47, %v9030_v42 }
 0x32a   : > { %v12503_v63 = vpack.c.bf16 %v8994_v8, %v8991_v34  ;;  %v12505_v21 = vpack.c.bf16 %v9032_v41, %v9029_v38 }
 0x32c   : > { %9888 = vmatpush1.bf16.msra.mxu1 %v12503_v63  ;;  %9933 = vmatpush1.bf16.msra.mxu0 %v12503_v63 }
 0x32d   : > { %9889 = vmatprep.subr.bf16.mxu1 %v10554_v48  ;;  %9934 = vmatprep.subr.bf16.mxu0 %v10554_v48 }
 0x343   : > { %v9065_v37 = vpop.f32.mrb[16].mxu0  ;;  %v9103_v0 = vpop.f32.mrb[16].mxu1 }
 0x344   : > { %v9066_v20 = vpop.f32.mrb[17].mxu0  ;;  %v9104_v27 = vpop.f32.mrb[17].mxu1 }
 0x345   : > { %v9067_v6 = vadd.f32 %v9066_v20, %v9065_v37  ;;  %v9105_v25 = vadd.f32 %v9104_v27, %v9103_v0  ;;  %v10081_v20 = vld [vmem:[%s13727_s6 + $0x4] ss:$8 sps:$4 sm:$0xff]   ;;  %v10082_v27 = vld [vmem:[%s13727_s6 + $0x300] ss:$8 sps:$4 sm:$0xff]  }
 0x347   : > { %v9068_v62 = vpop.f32.mrb[18].mxu0  ;;  %v9106_v59 = vpop.f32.mrb[18].mxu1 }
 0x348   : > { %v9069_v55 = vpop.f32.mrb[19].mxu0  ;;  %v9107_v15 = vpop.f32.mrb[19].mxu1 }
 0x349   : > { %v9070_v33 = vadd.f32 %v9069_v55, %v9068_v62  ;;  %v9108_v45 = vadd.f32 %v9107_v15, %v9106_v59  ;;  %v10085_v62 = vld [vmem:[%s13727_s6 + $0x10] ss:$8 sps:$4 sm:$0xff]   ;;  %v10096_v55 = vld [vmem:[%s13727_s6 + $0x324] ss:$8 sps:$4 sm:$0xff]   ;;  %v10091_v15 = vld [vmem:[%s13727_s6 + $0x20] ss:$8 sps:$4 sm:$0xff]  }
 0x34a   : > { %v10088_v59 = vld [vmem:[%s13727_s6 + $0x310] ss:$8 sps:$4 sm:$0xff]  }
 0x34b   : > { %v9890_v24 = vpack.c.bf16 %v9070_v33, %v9067_v6  ;;  %v12517_v1 = vpack.c.bf16 %v9108_v45, %v9105_v25  ;;  %v10084_v6 = vld [vmem:[%s13727_s6 + $0x304] ss:$8 sps:$4 sm:$0xff]   ;;  %v10087_v25 = vld [vmem:[%s13727_s6 + $0x14] ss:$8 sps:$4 sm:$0xff]   ;;  %v10094_v33 = vld [vmem:[%s13727_s6 + $0x320] ss:$8 sps:$4 sm:$0xff]  }
 0x34c   : > { %v10099_v45 = vld [vmem:[%s13727_s6 + $0x34] ss:$8 sps:$4 sm:$0xff]  }
 0x34d   : > { %9891 = vmatpush1.bf16.msra.mxu1 %v9890_v24  ;;  %9936 = vmatpush1.bf16.msra.mxu0 %v9890_v24  ;;  %v10102_v24 = vld [vmem:[%s13727_s6 + $0x334] ss:$8 sps:$4 sm:$0xff]  }
 0x34e   : > { %9892 = vmatprep.subr.bf16.mxu1 %v10554_v48  ;;  %9937 = vmatprep.subr.bf16.mxu0 %v10554_v48 }
 0x351   : > { %9894 = vmatpush1.bf16.msra.mxu1 %v12517_v1  ;;  %9939 = vmatpush1.bf16.msra.mxu0 %v12517_v1 }
 0x352   : > { %9895 = vmatprep.subr.bf16.mxu1 %v10554_v48  ;;  %9940 = vmatprep.subr.bf16.mxu0 %v10554_v48 }
 0x364   : > { %v9141_v23 = vpop.f32.mrb[20].mxu0  ;;  %v9179_v46 = vpop.f32.mrb[20].mxu1 }
 0x365   : > { %v9142_v35 = vpop.f32.mrb[21].mxu0  ;;  %v9180_v56 = vpop.f32.mrb[21].mxu1 }
 0x366   : > { %v9143_v26 = vadd.f32 %v9142_v35, %v9141_v23  ;;  %v9181_v13 = vadd.f32 %v9180_v56, %v9179_v46  ;;  %v10100_v23 = vld [vmem:[%s13727_s6 + $0x330] ss:$8 sps:$4 sm:$0xff]   ;;  %v10105_v46 = vld [vmem:[%s13727_s6 + $0x44] ss:$8 sps:$4 sm:$0xff]  }
 0x367   : > { %v10108_v56 = vld [vmem:[%s13727_s6 + $0x344] ss:$8 sps:$4 sm:$0xff]  }
 0x368   : > { %v9144_v10 = vpop.f32.mrb[22].mxu0  ;;  %v9182_v52 = vpop.f32.mrb[22].mxu1 }
 0x369   : > { %v9145_v19 = vpop.f32.mrb[23].mxu0  ;;  %v9183_v49 = vpop.f32.mrb[23].mxu1 }
 0x36a   : > { %v9146_v3 = vadd.f32 %v9145_v19, %v9144_v10  ;;  %v9184_v36 = vadd.f32 %v9183_v49, %v9182_v52  ;;  %v10106_v10 = vld [vmem:[%s13727_s6 + $0x340] ss:$8 sps:$4 sm:$0xff]   ;;  %v10111_v52 = vld [vmem:[%s13727_s6 + $0x54] ss:$8 sps:$4 sm:$0xff]  }
 0x36b   : > { %v10114_v49 = vld [vmem:[%s13727_s6 + $0x354] ss:$8 sps:$4 sm:$0xff]  }
 0x36c   : > { %v12525_v44 = vpack.c.bf16 %v9146_v3, %v9143_v26  ;;  %v12527_v51 = vpack.c.bf16 %v9184_v36, %v9181_v13  ;;  %v10103_v13 = vld [vmem:[%s13727_s6 + $0x40] ss:$8 sps:$4 sm:$0xff]   ;;  %v10109_v36 = vld [vmem:[%s13727_s6 + $0x50] ss:$8 sps:$4 sm:$0xff]  }
 0x36e   : > { %9897 = vmatpush1.bf16.msra.mxu1 %v12525_v44  ;;  %9942 = vmatpush1.bf16.msra.mxu0 %v12525_v44 }
 0x36f   : > { %9898 = vmatprep.subr.bf16.mxu1 %v10554_v48  ;;  %9943 = vmatprep.subr.bf16.mxu0 %v10554_v48 }
 0x371   : > { %3823 = vmatmul.mubr.f32.vlgmr.msra.gmra.mrb[32].mxu1 %v12534_v4 }
 0x372   : > { %9900 = vmatpush1.bf16.msra.mxu1 %v12471_v7  ;;  %7160 = vmatprep.mubr.msk.f32.mxu1 %vm3745_vm1, %v12540_v17  ;;  %v12565_v7 = vld [vmem:[%s13724_s3 + $0x20] sm:$0xff] }
 0x373   : > { %9901 = vmatprep.subr.bf16.mxu1 %v10554_v48 }
 0x375   : > { %3828 = vmatmul.mubr.f32.gmra.mrb[34].mxu1 %v12550_v30 }
 0x376   : > { %9903 = vmatpush1.bf16.msra.mxu1 %v12480_v54  ;;  %7161 = vmatprep.mubr.msk.f32.mxu1 %vm3745_vm1, %v12556_v61  ;;  %v12582_v54 = vld [vmem:[%s13724_s3 + $0x30] sm:$0xff] }
 0x377   : > { %9904 = vmatprep.subr.bf16.mxu1 %v10554_v48 }
 0x379   : > { %3833 = vmatmul.mubr.f32.gmra.mrb[36].mxu1 %v12565_v7 }
 0x37a   : > { %9906 = vmatpush1.bf16.msra.mxu1 %v9905_v50  ;;  %7162 = vmatprep.mubr.msk.f32.mxu1 %vm3745_vm1, %v12571_v12 }
 0x37b   : > { %9907 = vmatprep.subr.bf16.mxu1 %v10554_v48 }
 0x37d   : > { %3838 = vmatmul.mubr.f32.gmra.mrb[38].mxu1 %v12582_v54 }
 0x37e   : > { %9909 = vmatpush1.bf16.msra.mxu1 %v12495_v32  ;;  %7163 = vmatprep.mubr.msk.f32.mxu1 %vm3745_vm1, %v12489_v18 }
 0x37f   : > { %9910 = vmatprep.subr.bf16.mxu1 %v10554_v48 }
 0x382   : > { %9912 = vmatpush1.bf16.msra.mxu1 %v12503_v63 }
 0x383   : > { %9913 = vmatprep.subr.bf16.mxu1 %v10554_v48 }
 0x385   : > { %v9217_v5 = vpop.f32.mrb[24].mxu0  ;;  %v9255_v57 = vpop.f32.mrb[24].mxu1 }
 0x386   : > { %v9218_v50 = vpop.f32.mrb[25].mxu0  ;;  %v9256_v39 = vpop.f32.mrb[25].mxu1  ;;  %9915 = vmatpush1.bf16.msra.mxu1 %v12505_v21 }
 0x387   : > { %v9219_v53 = vadd.f32 %v9218_v50, %v9217_v5  ;;  %v9257_v43 = vadd.f32 %v9256_v39, %v9255_v57  ;;  %9916 = vmatprep.subr.bf16.mxu1 %v10554_v48  ;;  %v10126_v5 = vld [vmem:[%s13727_s6 + $0x374] ss:$8 sps:$4 sm:$0xff]   ;;  %v10121_v50 = vld [vmem:[%s13727_s6 + $0x70] ss:$8 sps:$4 sm:$0xff]  }
 0x388   : > { %v10124_v39 = vld [vmem:[%s13727_s6 + $0x370] ss:$8 sps:$4 sm:$0xff]  }
 0x389   : > { %v9220_v9 = vpop.f32.mrb[26].mxu0  ;;  %v9258_v31 = vpop.f32.mrb[26].mxu1 }
 0x38a   : > { %v9221_v58 = vpop.f32.mrb[27].mxu0  ;;  %v9259_v40 = vpop.f32.mrb[27].mxu1  ;;  %9918 = vmatpush1.bf16.msra.mxu1 %v12517_v1 }
 0x38b   : > { %v9222_v60 = vadd.f32 %v9221_v58, %v9220_v9  ;;  %v9260_v29 = vadd.f32 %v9259_v40, %v9258_v31  ;;  %9919 = vmatprep.subr.bf16.mxu1 %v10554_v48  ;;  %v10127_v9 = vld [vmem:[%s13727_s6 + $0x80] ss:$8 sps:$4 sm:$0xff]   ;;  %v10135_v58 = vld [vmem:[%s13727_s6 + $0x94] ss:$8 sps:$4 sm:$0xff]  }
 0x38c   : > { %v10130_v31 = vld [vmem:[%s13727_s6 + $0x380] ss:$8 sps:$4 sm:$0xff]   ;;  %v10138_v40 = vld [vmem:[%s13727_s6 + $0x394] ss:$8 sps:$4 sm:$0xff]  }
 0x38d   : > { %v9944_v14 = vpack.c.bf16 %v9222_v60, %v9219_v53  ;;  %v9947_v28 = vpack.c.bf16 %v9260_v29, %v9257_v43  ;;  %v10129_v53 = vld [vmem:[%s13727_s6 + $0x84] ss:$8 sps:$4 sm:$0xff]   ;;  %v10133_v60 = vld [vmem:[%s13727_s6 + $0x90] ss:$8 sps:$4 sm:$0xff]  }
 0x38e   : > { %9921 = vmatpush1.bf16.msra.mxu1 %v12525_v44  ;;  %v10132_v43 = vld [vmem:[%s13727_s6 + $0x384] ss:$8 sps:$4 sm:$0xff]   ;;  %v10136_v29 = vld [vmem:[%s13727_s6 + $0x390] ss:$8 sps:$4 sm:$0xff]  }
 0x38f   : > { %9945 = vmatpush1.bf16.msra.mxu0 %v9944_v14  ;;  %9922 = vmatprep.subr.bf16.mxu1 %v10554_v48 }
 0x390   : > { %9946 = vmatprep.subr.bf16.mxu0 %v10554_v48 }
 0x392   : > { %9924 = vmatpush1.bf16.msra.mxu1 %v12527_v51 }
 0x393   : > { %9948 = vmatpush1.bf16.msra.mxu0 %v9947_v28  ;;  %9952 = vmatprep.subr.bf16.mxu1 %v10554_v48 }
 0x394   : > { %9949 = vmatprep.subr.bf16.mxu0 %v10554_v48 }
 0x395   : > { %3908 = vmatmul.mubr.f32.vlgmr.msra.gmra.mrb[40].mxu1 %v12534_v4 }
 0x396   : > { %9954 = vmatpush1.bf16.msra.mxu1 %v12495_v32  ;;  %7164 = vmatprep.mubr.msk.f32.mxu1 %vm3745_vm1, %v12540_v17 }
 0x397   : > { %9955 = vmatprep.subr.bf16.mxu1 %v10554_v48 }
 0x399   : > { %3913 = vmatmul.mubr.f32.gmra.mrb[42].mxu1 %v12550_v30 }
 0x39a   : > { %9957 = vmatpush1.bf16.msra.mxu1 %v12503_v63  ;;  %7165 = vmatprep.mubr.msk.f32.mxu1 %vm3745_vm1, %v12556_v61 }
 0x39b   : > { %9958 = vmatprep.subr.bf16.mxu1 %v10554_v48 }
 0x39d   : > { %3918 = vmatmul.mubr.f32.gmra.mrb[44].mxu1 %v12565_v7 }
 0x39e   : > { %9960 = vmatpush1.bf16.msra.mxu1 %v12505_v21  ;;  %7166 = vmatprep.mubr.msk.f32.mxu1 %vm3745_vm1, %v12571_v12 }
 0x39f   : > { %9961 = vmatprep.subr.bf16.mxu1 %v10554_v48 }
 0x3a1   : > { %3923 = vmatmul.mubr.f32.gmra.mrb[46].mxu1 %v12582_v54 }
 0x3a2   : > { %9963 = vmatpush1.bf16.msra.mxu1 %v12517_v1  ;;  %7171 = vmatprep.mubr.msk.f32.mxu1 %vm3745_vm1, %v12489_v18  ;;  %v10097_v1 = vld [vmem:[%s13727_s6 + $0x30] ss:$8 sps:$4 sm:$0xff]  }
 0x3a3   : > { %9964 = vmatprep.subr.bf16.mxu1 %v10554_v48 }
 0x3a6   : > { %v9293_v32 = vpop.f32.mrb[28].mxu0  ;;  %v9331_v34 = vpop.f32.mrb[28].mxu1  ;;  %9966 = vmatpush1.bf16.msra.mxu1 %v12525_v44  ;;  %v10112_v44 = vld [vmem:[%s13727_s6 + $0x350] ss:$8 sps:$4 sm:$0xff]  }
 0x3a7   : > { %v9294_v38 = vpop.f32.mrb[29].mxu0  ;;  %v9332_v2 = vpop.f32.mrb[29].mxu1  ;;  %9967 = vmatprep.subr.bf16.mxu1 %v10554_v48 }
 0x3a8   : > { %v9295_v42 = vadd.f32 %v9294_v38, %v9293_v32  ;;  %v9333_v11 = vadd.f32 %v9332_v2, %v9331_v34 }
 0x3aa   : > { %v9296_v47 = vpop.f32.mrb[30].mxu0  ;;  %v9334_v8 = vpop.f32.mrb[30].mxu1  ;;  %9969 = vmatpush1.bf16.msra.mxu1 %v12527_v51  ;;  %v10117_v51 = vld [vmem:[%s13727_s6 + $0x64] ss:$8 sps:$4 sm:$0xff]  }
 0x3ab   : > { %v9297_v41 = vpop.f32.mrb[31].mxu0  ;;  %v9335_v63 = vpop.f32.mrb[31].mxu1  ;;  %9970 = vmatprep.subr.bf16.mxu1 %v10554_v48 }
 0x3ac   : > { %v9298_v18 = vadd.f32 %v9297_v41, %v9296_v47  ;;  %v9336_v21 = vadd.f32 %v9335_v63, %v9334_v8 }
 0x3ae   : > { %v9950_v37 = vpack.c.bf16 %v9298_v18, %v9295_v42  ;;  %v9977_v0 = vpack.c.bf16 %v9336_v21, %v9333_v11  ;;  %9972 = vmatpush1.bf16.msra.mxu1 %v9947_v28  ;;  %v10555_v21 = vmov 1966171168  }
 0x3af   : > { %9973 = vmatprep.subr.bf16.mxu1 %v10554_v48 }
 0x3b0   : > { %9951 = vmatpush1.bf16.msra.mxu0 %v9950_v37 }
 0x3b1   : > { %6212 = vmatprep.subr.bf16.mxu0 %v10084_v6 }
 0x3b2   : > { %9975 = vmatpush1.bf16.msra.mxu1 %v9950_v37  ;;  %v4149_v37 = vunpack.c.l.s4 %v10555_v21 }
 0x3b3   : > { %3997 = vmatmul.mubr.f32.vlgmr.msra.gmra.mrb[32].mxu0 %v12534_v4  ;;  %9976 = vmatprep.subr.bf16.mxu1 %v10554_v48  ;;  %v10079_v48 = vld [vmem:[%s13727_s6] ss:$8 sps:$4 sm:$0xff]  }
 0x3b4   : > { %7168 = vmatprep.mubr.msk.f32.mxu0 %vm3745_vm1, %v12540_v17  ;;  %6213 = vmatpush1.bf16.msra.mxu0 %v10082_v27  ;;  %v4150_v27 = vunpack.c.0.s8 %v4149_v37 }
 0x3b5   : > { %6214 = vmatprep.subr.bf16.mxu0 %v10090_v16 }
 0x3b6   : > { %9978 = vmatpush1.bf16.msra.mxu1 %v9977_v0 }
 0x3b7   : > { %4002 = vmatmul.mubr.f32.gmra.mrb[34].mxu0 %v12550_v30  ;;  %6089 = vmatprep.subr.bf16.mxu1 %v10081_v20 }
 0x3b8   : > { %7169 = vmatprep.mubr.msk.f32.mxu0 %vm3745_vm1, %v12556_v61  ;;  %6215 = vmatpush1.bf16.msra.mxu0 %v10088_v59 }
 0x3b9   : > { %4086 = vmatmul.mubr.f32.vlgmr.msra.gmra.mrb[48].mxu1 %v12534_v4  ;;  %6216 = vmatprep.subr.bf16.mxu0 %v10096_v55 }
 0x3ba   : > { %7172 = vmatprep.mubr.msk.f32.mxu1 %vm3745_vm1, %v12540_v17  ;;  %6090 = vmatpush1.bf16.msra.mxu1 %v10079_v48  ;;  %v10120_v17 = vld [vmem:[%s13727_s6 + $0x364] ss:$8 sps:$4 sm:$0xff]  }
 0x3bb   : > { %4007 = vmatmul.mubr.f32.gmra.mrb[36].mxu0 %v12565_v7  ;;  %6091 = vmatprep.subr.bf16.mxu1 %v10087_v25 }
 0x3bc   : > { %7170 = vmatprep.mubr.msk.f32.mxu0 %vm3745_vm1, %v12571_v12  ;;  %6217 = vmatpush1.bf16.msra.mxu0 %v10094_v33  ;;  %v10141_v33 = vld [vmem:[%s13727_s6 + $0xa4] ss:$8 sps:$4 sm:$0xff]  }
 0x3bd   : > { %4091 = vmatmul.mubr.f32.gmra.mrb[50].mxu1 %v12550_v30  ;;  %6218 = vmatprep.subr.bf16.mxu0 %v10102_v24 }
 0x3be   : > { %7173 = vmatprep.mubr.msk.f32.mxu1 %vm3745_vm1, %v12556_v61  ;;  %6092 = vmatpush1.bf16.msra.mxu1 %v10085_v62  ;;  %v10115_v61 = vld [vmem:[%s13727_s6 + $0x60] ss:$8 sps:$4 sm:$0xff]  }
 0x3bf   : > { %4012 = vmatmul.mubr.f32.gmra.mrb[38].mxu0 %v12582_v54  ;;  %6093 = vmatprep.subr.bf16.mxu1 %v10093_v22  ;;  %v4117_v22 = vpop.permute.xlu1 %4116 }
 0x3c0   : > { %6219 = vmatpush1.bf16.msra.mxu0 %v10100_v23 }
 0x3c1   : > { %4096 = vmatmul.mubr.f32.gmra.mrb[52].mxu1 %v12565_v7  ;;  %6220 = vmatprep.subr.bf16.mxu0 %v10108_v56  ;;  %v10118_v7 = vld [vmem:[%s13727_s6 + $0x360] ss:$8 sps:$4 sm:$0xff]   ;;  %v10144_v56 = vld [vmem:[%s13727_s6 + $0x3a4] ss:$8 sps:$4 sm:$0xff]  }
 0x3c2   : > { %7174 = vmatprep.mubr.msk.f32.mxu1 %vm3745_vm1, %v12571_v12  ;;  %6094 = vmatpush1.bf16.msra.mxu1 %v10091_v15  ;;  %v10123_v12 = vld [vmem:[%s13727_s6 + $0x74] ss:$8 sps:$4 sm:$0xff]   ;;  %v10139_v15 = vld [vmem:[%s13727_s6 + $0xa0] ss:$8 sps:$4 sm:$0xff]  }
 0x3c3   : > { %6095 = vmatprep.subr.bf16.mxu1 %v10099_v45  ;;  %v13867_v45 = vld [vmem:[#allocation6_spill] sm:$0xff] }
 0x3c4   : > { %6221 = vmatpush1.bf16.msra.mxu0 %v10106_v10  ;;  %v12787_v24 = vsub.s32 %v4150_v27, %v13867_v45  ;;  %v10157_v27 = vld [vmem:[%s13727_s6 + $0xd0] ss:$8 sps:$4 sm:$0xff]  }
 0x3c5   : > { %4101 = vmatmul.mubr.f32.gmra.mrb[54].mxu1 %v12582_v54  ;;  %6222 = vmatprep.subr.bf16.mxu0 %v10114_v49 }
 0x3c6   : > { %6096 = vmatpush1.bf16.msra.mxu1 %v10097_v1 }
 0x3c7   : > { %6097 = vmatprep.subr.bf16.mxu1 %v10105_v46 }
 0x3c8   : > { %6223 = vmatpush1.bf16.msra.mxu0 %v10112_v44  ;;  %v10145_v44 = vld [vmem:[%s13727_s6 + $0xb0] ss:$8 sps:$4 sm:$0xff]  }
 0x3c9   : > { %6224 = vmatprep.subr.bf16.mxu0 %v10120_v17 }
 0x3ca   : > { %6098 = vmatpush1.bf16.msra.mxu1 %v10103_v13  ;;  %v13868_v13 = vlaneseq }
 0x3cb   : > { %6099 = vmatprep.subr.bf16.mxu1 %v10111_v52 }
 0x3cc   : > { %6225 = vmatpush1.bf16.msra.mxu0 %v10118_v7  ;;  %vm12796_vm2 = vcmp.lt.s32.totalorder %v13868_v13, 64  ;;  %vm4173_vm3 = vcmp.ge.s32.totalorder %v13868_v13, 64  ;;  %vm4174_vm4 = vcmp.lt.s32.totalorder %v13868_v13, 128 }
 0x3cd   : > { %6226 = vmatprep.subr.bf16.mxu0 %v10126_v5  ;;  %vm12945_vm5 = vmand %vm4173_vm3, %vm4174_vm4 }
 0x3ce   : > { %6100 = vmatpush1.bf16.msra.mxu1 %v10109_v36 }
 0x3cf   : > { %6101 = vmatprep.subr.bf16.mxu1 %v10117_v51  ;;  %v10147_v51 = vld [vmem:[%s13727_s6 + $0xb4] ss:$8 sps:$4 sm:$0xff]  }
 0x3d0   : > { %6227 = vmatpush1.bf16.msra.mxu0 %v10124_v39 }
 0x3d1   : > { %6228 = vmatprep.subr.bf16.mxu0 %v10132_v43 }
 0x3d2   : > { %6102 = vmatpush1.bf16.msra.mxu1 %v10115_v61 }
 0x3d3   : > { %6103 = vmatprep.subr.bf16.mxu1 %v10123_v12  ;;  %v10148_v12 = vld [vmem:[%s13727_s6 + $0x3b0] ss:$8 sps:$4 sm:$0xff]  }
 0x3d4   : > { %6229 = vmatpush1.bf16.msra.mxu0 %v10130_v31 }
 0x3d5   : > { %6230 = vmatprep.subr.bf16.mxu0 %v10138_v40  ;;  %v10153_v40 = vld [vmem:[%s13727_s6 + $0xc4] ss:$8 sps:$4 sm:$0xff]  }
 0x3d6   : > { %6104 = vmatpush1.bf16.msra.mxu1 %v10121_v50 }
 0x3d7   : > { %6105 = vmatprep.subr.bf16.mxu1 %v10129_v53 }
 0x3d8   : > { %6231 = vmatpush1.bf16.msra.mxu0 %v10136_v29 }
 0x3d9   : > { %6232 = vmatprep.subr.bf16.mxu0 %v10144_v56 }
 0x3da   : > { %6106 = vmatpush1.bf16.msra.mxu1 %v10127_v9  ;;  %v4127_v9 = vpop.permute.xlu1 %4126 }
 0x3db   : > { %6107 = vmatprep.subr.bf16.mxu1 %v10135_v58  ;;  %v10151_v58 = vld [vmem:[%s13727_s6 + $0xc0] ss:$8 sps:$4 sm:$0xff]  }
 0x3de   : > { %6108 = vmatpush1.bf16.msra.mxu1 %v10133_v60 }
 0x3df   : > { %6109 = vmatprep.subr.bf16.mxu1 %v10141_v33  ;;  %v10160_v33 = vld [vmem:[%s13727_s6 + $0x3d0] ss:$8 sps:$4 sm:$0xff]  }
 0x3e2   : > { %6110 = vmatpush1.bf16.msra.mxu1 %v10139_v15 }
 0x3e3   : > { %6111 = vmatprep.subr.bf16.mxu1 %v10147_v51 }
 0x3e6   : > { %6112 = vmatpush1.bf16.msra.mxu1 %v10145_v44 }
 0x3e7   : > { %6113 = vmatprep.subr.bf16.mxu1 %v10153_v40  ;;  %v10177_v40 = vld [vmem:[%s13727_s6 + $0x104] ss:$8 sps:$4 sm:$0xff]  }
 0x3ea   : > { %6114 = vmatpush1.bf16.msra.mxu1 %v10151_v58 }
 0x444   : > { %v12699_v35 = vpop.f32.mrb[32].mxu1 }
 0x445   : > { %v3826_v26 = vpop.f32.mrb[33].mxu1 }
 0x448   : > { %v12713_v19 = vpop.f32.mrb[34].mxu1 }
 0x449   : > { %v3831_v3 = vpop.f32.mrb[35].mxu1 }
 0x44a   : > { %v4122_v3 = vpop.permute.xlu0 %4121 }
 0x44c   : > { %v12727_v4 = vpop.f32.mrb[36].mxu1 }
 0x44d   : > { %v3836_v30 = vpop.f32.mrb[37].mxu1 }
 0x44e   : > { %v4132_v21 = vpop.permute.xlu0 %4131 }
 0x450   : > { %v12741_v54 = vpop.f32.mrb[38].mxu1 }
 0x451   : > { %v3841_v57 = vpop.f32.mrb[39].mxu1 }
 0x468   : > { %v3909_v14 = vpop.f32.mrb[40].mxu1 }
 0x469   : > { %v3928_v28 = vmax.f32 %v12699_v35, %v3909_v14  ;;  %v3911_v32 = vpop.f32.mrb[41].mxu1  ;;  %v10142_v35 = vld [vmem:[%s13727_s6 + $0x3a0] ss:$8 sps:$4 sm:$0xff]  }
 0x46a   : > { %6233 = vmatpush1.bf16.msra.mxu0 %v10142_v35  ;;  %v10156_v32 = vld [vmem:[%s13727_s6 + $0x3c4] ss:$8 sps:$4 sm:$0xff]  }
 0x46c   : > { %v3914_v34 = vpop.f32.mrb[42].mxu1 }
 0x46d   : > { %v3929_v38 = vmax.f32 %v12713_v19, %v3914_v34  ;;  %v3916_v2 = vpop.f32.mrb[43].mxu1 }
 0x470   : > { %v3919_v42 = vpop.f32.mrb[44].mxu1 }
 0x471   : > { %v3930_v11 = vmax.f32 %v12727_v4, %v3919_v42  ;;  %v3921_v47 = vpop.f32.mrb[45].mxu1 }
 0x474   : > { %v3924_v8 = vpop.f32.mrb[46].mxu1 }
 0x475   : > { %v3931_v41 = vmax.f32 %v12741_v54, %v3924_v8  ;;  %v3926_v63 = vpop.f32.mrb[47].mxu1  ;;  %v10150_v54 = vld [vmem:[%s13727_s6 + $0x3b4] ss:$8 sps:$4 sm:$0xff]  }
 0x476   : > { %6234 = vmatprep.subr.bf16.mxu0 %v10150_v54  ;;  %v10169_v54 = vld [vmem:[%s13727_s6 + $0xf0] ss:$8 sps:$4 sm:$0xff]  }
 0x477   : > { %6235 = vmatpush1.bf16.msra.mxu0 %v10148_v12 }
 0x478   : > { %6236 = vmatprep.subr.bf16.mxu0 %v10156_v32 }
 0x486   : > { %v3998_v18 = vpop.f32.mrb[32].mxu0 }
 0x487   : > { %v4017_v0 = vmax.f32 %v3928_v28, %v3998_v18  ;;  %v4000_v48 = vpop.f32.mrb[33].mxu0 }
 0x48a   : > { %v4003_v20 = vpop.f32.mrb[34].mxu0 }
 0x48b   : > { %v4018_v6 = vmax.f32 %v3929_v38, %v4003_v20  ;;  %v4005_v25 = vpop.f32.mrb[35].mxu0 }
 0x48c   : > { %v4087_v16 = vpop.f32.mrb[48].mxu1 }
 0x48d   : > { %v4106_v62 = vmax.f32 %v4017_v0, %v4087_v16  ;;  %v4089_v59 = vpop.f32.mrb[49].mxu1 }
 0x48e   : > { %v4008_v55 = vpop.f32.mrb[36].mxu0  ;;  %v10162_v59 = vld [vmem:[%s13727_s6 + $0x3d4] ss:$8 sps:$4 sm:$0xff]  }
 0x48f   : > { %v4019_v1 = vmax.f32 %v3930_v11, %v4008_v55  ;;  %v4134_v23 = vadd.f32 %v4117_v22, %v4106_v62  ;;  %v4010_v46 = vpop.f32.mrb[37].mxu0  ;;  %v10154_v11 = vld [vmem:[%s13727_s6 + $0x3c0] ss:$8 sps:$4 sm:$0xff]  }
 0x490   : > { %v4092_v26 = vpop.f32.mrb[50].mxu1  ;;  %6237 = vmatpush1.bf16.msra.mxu0 %v10154_v11 }
 0x491   : > { %v4138_v52 = vmax.f32 %v4134_v23, 0.0  ;;  %v4107_v19 = vmax.f32 %v4018_v6, %v4092_v26  ;;  %v4094_v49 = vpop.f32.mrb[51].mxu1  ;;  %v10159_v6 = vld [vmem:[%s13727_s6 + $0xd4] ss:$8 sps:$4 sm:$0xff]   ;;  %6238 = vmatprep.subr.bf16.mxu0 %v10162_v59 }
 0x492   : > { %v4013_v36 = vpop.f32.mrb[38].mxu0  ;;  %6115 = vmatprep.subr.bf16.mxu1 %v10159_v6  ;;  %v13873_v59 = vld [vmem:[#allocation7_spill] sm:$0xff] }
 0x493   : > { %v4154_v4 = vrot.slane %v4138_v52, %v12787_v24  ;;  %v4185_v17 = vcombine.high %v4138_v52, %v4138_v52  ;;  %v4020_v30 = vmax.f32 %v3931_v41, %v4013_v36  ;;  %v4135_v61 = vadd.f32 %v4122_v3, %v4107_v19  ;;  %v4015_v7 = vpop.f32.mrb[39].mxu0  ;;  %4146 = vst.msk [vmem:[#allocation2] sm:$0x1] %vm12796_vm2, %v4138_v52  ;;  %v10163_v52 = vld [vmem:[%s13727_s6 + $0xe0] ss:$8 sps:$4 sm:$0xff]  }
 0x494   : > { %v4097_v5 = vpop.f32.mrb[52].mxu1  ;;  %6116 = vmatpush1.bf16.msra.mxu1 %v10157_v27  ;;  %v10165_v19 = vld [vmem:[%s13727_s6 + $0xe4] ss:$8 sps:$4 sm:$0xff]   ;;  %6239 = vmatpush1.bf16.msra.mxu0 %v10160_v33  ;;  %v4471_v27 = vsub.s32 6, %v13867_v45 }
 0x495   : > { %v4192_v57 = vrot.slane %v4185_v17, %v12787_v24  ;;  %v4139_v50 = vmax.f32 %v4135_v61, 0.0  ;;  %v4108_v39 = vmax.f32 %v4019_v1, %v4097_v5  ;;  %v4099_v53 = vpop.f32.mrb[53].mxu1  ;;  %v4155_v43 = vcombine.high %v4154_v4, %v4154_v4  ;;  %v10168_v36 = vld [vmem:[%s13727_s6 + $0x3e4] ss:$8 sps:$4 sm:$0xff]   ;;  %6117 = vmatprep.subr.bf16.mxu1 %v10165_v19  ;;  %v10171_v5 = vld [vmem:[%s13727_s6 + $0xf4] ss:$8 sps:$4 sm:$0xff]  }
 0x496   : > { %v4162_v31 = vrot.slane %v4154_v4, %v12787_v24  ;;  %v10166_v4 = vld [vmem:[%s13727_s6 + $0x3e0] ss:$8 sps:$4 sm:$0xff]   ;;  %6240 = vmatprep.subr.bf16.mxu0 %v10168_v36  ;;  %v10183_v36 = vld [vmem:[%s13727_s6 + $0x114] ss:$8 sps:$4 sm:$0xff]  }
 0x497   : > { %v4230_v60 = vrot.slane %v4139_v50, %v12787_v24  ;;  %v4258_v29 = vcombine.high %v4139_v50, %v4139_v50  ;;  %v4136_v14 = vadd.f32 %v4127_v9, %v4108_v39  ;;  %v4169_v28 = vrot.slane %v4155_v43, %v12787_v24  ;;  %4222 = vst.msk [vmem:[#allocation2 + $0x4] sm:$0x1] %vm12796_vm2, %v4139_v50  ;;  %v10174_v50 = vld [vmem:[%s13727_s6 + $0x3f4] ss:$8 sps:$4 sm:$0xff]   ;;  %v10172_v39 = vld [vmem:[%s13727_s6 + $0x3f0] ss:$8 sps:$4 sm:$0xff]  }
 0x498   : > { %v4102_v34 = vpop.f32.mrb[54].mxu1  ;;  %v4202_v38 = vcombine.high %v4192_v57, %v4192_v57  ;;  %v4177_v2 = vcombine.high %v4162_v31, %v4162_v31  ;;  %v4199_v42 = vrot.slane %v4192_v57, %v12787_v24  ;;  %6118 = vmatpush1.bf16.msra.mxu1 %v10163_v52  ;;  %6241 = vmatpush1.bf16.msra.mxu0 %v10166_v4  ;;  %v10178_v52 = vld [vmem:[%s13727_s6 + $0x400] ss:$8 sps:$4 sm:$0xff]  }
 0x499   : > { %v4265_v47 = vrot.slane %v4258_v29, %v12787_v24  ;;  %v4140_v8 = vmax.f32 %v4136_v14, 0.0  ;;  %v4109_v41 = vmax.f32 %v4020_v30, %v4102_v34  ;;  %4170 = vrot.lane.b32.xlu1 %v4169_v28, %s10556_s25  ;;  %v4180_v63 = vcombine.high %v4169_v28, %v4169_v28  ;;  %v4104_v18 = vpop.f32.mrb[55].mxu1  ;;  %6119 = vmatprep.subr.bf16.mxu1 %v10171_v5  ;;  %v10180_v29 = vld [vmem:[%s13727_s6 + $0x404] ss:$8 sps:$4 sm:$0xff]   ;;  %v10190_v5 = vld [vmem:[%s13727_s6 + $0x420] ss:$8 sps:$4 sm:$0xff]  }
 0x49a   : > { %v4209_v37 = vrot.slane %v4202_v38, %v12787_v24  ;;  %v4231_v0 = vcombine.high %v4230_v60, %v4230_v60  ;;  %4179 = vst.msk [vmem:[#allocation2 + $0x1] sm:$0x1] %vm12796_vm2, %v4177_v2  ;;  %4201 = vst.msk [vmem:[#allocation2 + $0x2] sm:$0x1] %vm12796_vm2, %v4199_v42  ;;  %v4214_v48 = vcombine.high %v4199_v42, %v4199_v42  ;;  %6242 = vmatprep.subr.bf16.mxu0 %v10174_v50  ;;  %v10198_v50 = vld [vmem:[%s13727_s6 + $0x434] ss:$8 sps:$4 sm:$0xff]  }
 0x49b   : > { %v4238_v20 = vrot.slane %v4230_v60, %v12787_v24  ;;  %v4303_v25 = vrot.slane %v4140_v8, %v12787_v24  ;;  %v4331_v16 = vcombine.high %v4140_v8, %v4140_v8  ;;  %v4137_v62 = vadd.f32 %v4132_v21, %v4109_v41  ;;  %4181 = vrot.lane.b32.xlu0 %v4180_v63, %s10556_s25 }
 0x49c   : > { %4295 = vst.msk [vmem:[#allocation2 + $0x8] sm:$0x1] %vm12796_vm2, %v4140_v8  ;;  %v4275_v22 = vcombine.high %v4265_v47, %v4265_v47  ;;  %4216 = vst.msk [vmem:[#allocation2 + $0x3] sm:$0x1] %vm12796_vm2, %v4214_v48  ;;  %v4272_v15 = vrot.slane %v4265_v47, %v12787_v24  ;;  %v4217_v46 = vcombine.high %v4209_v37, %v4209_v37  ;;  %6120 = vmatpush1.bf16.msra.mxu1 %v10169_v54  ;;  %v10187_v54 = vld [vmem:[%s13727_s6 + $0x120] ss:$8 sps:$4 sm:$0xff]  }
 0x49d   : > { %v4250_v55 = vcombine.high %v4238_v20, %v4238_v20  ;;  %v12862_v1 = vrot.slane %v4331_v16, %v12787_v24  ;;  %v4141_v23 = vmax.f32 %v4137_v62, 0.0  ;;  %4210 = vrot.lane.b32.xlu1 %v4209_v37, %s10556_s25  ;;  %v4245_v35 = vrot.slane %v4231_v0, %v12787_v24  ;;  %6243 = vmatpush1.bf16.msra.mxu0 %v10172_v39  ;;  %v10193_v39 = vld [vmem:[%s13727_s6 + $0x130] ss:$8 sps:$4 sm:$0xff]  }
 0x49e   : > { %4274 = vst.msk [vmem:[#allocation2 + $0x6] sm:$0x1] %vm12796_vm2, %v4272_v15  ;;  %v4287_v56 = vcombine.high %v4272_v15, %v4272_v15  ;;  %v4311_v26 = vrot.slane %v4303_v25, %v12787_v24  ;;  %v4282_v44 = vrot.slane %v4275_v22, %v12787_v24  ;;  %v4304_v7 = vcombine.high %v4303_v25, %v4303_v25  ;;  %v13874_v15 = vld [vmem:[#allocation8_spill] sm:$0xff]  ;;  %v10208_v47 = vld [vmem:[%s13727_s6 + $0x450] ss:$8 sps:$4 sm:$0xff]  }
 0x49f   : > { %4252 = vst.msk [vmem:[#allocation2 + $0x5] sm:$0x1] %vm12796_vm2, %v4250_v55  ;;  %v4376_v49 = vrot.slane %v4141_v23, %v12787_v24  ;;  %v4404_v3 = vcombine.high %v4141_v23, %v4141_v23  ;;  %4218 = vrot.lane.b32.xlu0 %v4217_v46, %s10556_s25  ;;  %4368 = vst.msk [vmem:[#allocation2 + $0xc] sm:$0x1] %vm12796_vm2, %v4141_v23  ;;  %v4345_v17 = vrot.slane %v12862_v1, %v12787_v24 }
 0x4a0   : > { %4289 = vst.msk [vmem:[#allocation2 + $0x7] sm:$0x1] %vm12796_vm2, %v4287_v56  ;;  %v4323_v51 = vcombine.high %v4311_v26, %v4311_v26  ;;  %v4253_v61 = vcombine.high %v4245_v35, %v4245_v35  ;;  %v4290_v9 = vcombine.high %v4282_v44, %v4282_v44  ;;  %v4318_v31 = vrot.slane %v4304_v7, %v12787_v24  ;;  %v10175_v56 = vld [vmem:[%s13727_s6 + $0x100] ss:$8 sps:$4 sm:$0xff]   ;;  %v10189_v7 = vld [vmem:[%s13727_s6 + $0x124] ss:$8 sps:$4 sm:$0xff]  }
 0x4a1   : > { %v4411_v30 = vrot.slane %v4404_v3, %v12787_v24  ;;  %4246 = vrot.lane.b32.xlu1 %v4245_v35, %s10556_s25  ;;  %4347 = vst.msk [vmem:[#allocation2 + $0xa] sm:$0x1] %vm12796_vm2, %v4345_v17  ;;  %v4360_v12 = vcombine.high %v4345_v17, %v4345_v17  ;;  %v4384_v57 = vrot.slane %v4376_v49, %v12787_v24  ;;  %v4475_v20 = vsub.s32 7, %v13867_v45  ;;  %v10181_v17 = vld [vmem:[%s13727_s6 + $0x110] ss:$8 sps:$4 sm:$0xff]  }
 0x4a2   : > { %4325 = vst.msk [vmem:[#allocation2 + $0x9] sm:$0x1] %vm12796_vm2, %v4323_v51  ;;  %v4348_v58 = vcombine.high %v12862_v1, %v12862_v1  ;;  %6130 = vmatprep.subr.bf16.mxu1 %v10177_v40  ;;  %v4326_v14 = vcombine.high %v4318_v31, %v4318_v31  ;;  %v4377_v32 = vcombine.high %v4376_v49, %v4376_v49  ;;  %v4459_v25 = vsub.s32 3, %v13867_v45 }
 0x4a3   : > { %4254 = vrot.lane.b32.xlu0 %v4253_v61, %s10556_s25  ;;  %4362 = vst.msk [vmem:[#allocation2 + $0xb] sm:$0x1] %vm12796_vm2, %v4360_v12  ;;  %v4396_v53 = vcombine.high %v4384_v57, %v4384_v57  ;;  %v4418_v43 = vrot.slane %v4411_v30, %v12787_v24  ;;  %6253 = vmatprep.subr.bf16.mxu0 %v10180_v29  ;;  %v10192_v12 = vld [vmem:[%s13727_s6 + $0x424] ss:$8 sps:$4 sm:$0xff]   ;;  %v10195_v57 = vld [vmem:[%s13727_s6 + $0x134] ss:$8 sps:$4 sm:$0xff]  }
 0x4a4   : > { %v4355_v28 = vrot.slane %v4348_v58, %v12787_v24  ;;  %v4391_v38 = vrot.slane %v4377_v32, %v12787_v24  ;;  %v4421_v2 = vcombine.high %v4411_v30, %v4411_v30  ;;  %v10184_v30 = vld [vmem:[%s13727_s6 + $0x410] ss:$8 sps:$4 sm:$0xff]   ;;  %v4463_v40 = vsub.s32 4, %v13867_v45 }
 0x4a5   : > { %4283 = vrot.lane.b32.xlu1 %v4282_v44, %s10556_s25  ;;  %4398 = vst.msk [vmem:[#allocation2 + $0xd] sm:$0x1] %vm12796_vm2, %v4396_v53  ;;  %4420 = vst.msk [vmem:[#allocation2 + $0xe] sm:$0x1] %vm12796_vm2, %v4418_v43  ;;  %v4433_v60 = vcombine.high %v4418_v43, %v4418_v43  ;;  %v10186_v44 = vld [vmem:[%s13727_s6 + $0x414] ss:$8 sps:$4 sm:$0xff]  }
 0x4a6   : > { %v4363_v34 = vcombine.high %v4355_v28, %v4355_v28  ;;  %v4399_v10 = vcombine.high %v4391_v38, %v4391_v38  ;;  %v4428_v42 = vrot.slane %v4421_v2, %v12787_v24  ;;  %v10196_v53 = vld [vmem:[%s13727_s6 + $0x430] ss:$8 sps:$4 sm:$0xff]   ;;  %v4467_v43 = vsub.s32 5, %v13867_v45  ;;  %v10372_v45 = vld [vmem:[%s13727_s6 + $0x614] ss:$8 sps:$4 sm:$0xff]  }
 0x4a7   : > { %4291 = vrot.lane.b32.xlu0 %v4290_v9, %s10556_s25  ;;  %4435 = vst.msk [vmem:[#allocation2 + $0xf] sm:$0x1] %vm12796_vm2, %v4433_v60  ;;  %v10201_v9 = vld [vmem:[%s13727_s6 + $0x144] ss:$8 sps:$4 sm:$0xff]  }
 0x4a8   : > { %v4436_v11 = vcombine.high %v4428_v42, %v4428_v42 }
 0x4a9   : > { %4319 = vrot.lane.b32.xlu1 %v4318_v31, %s10556_s25  ;;  %v10204_v31 = vld [vmem:[%s13727_s6 + $0x444] ss:$8 sps:$4 sm:$0xff]  }
 0x4ab   : > { %4327 = vrot.lane.b32.xlu0 %v4326_v14, %s10556_s25 }
 0x4ad   : > { %4356 = vrot.lane.b32.xlu1 %v4355_v28, %s10556_s25 }
 0x4af   : > { %4364 = vrot.lane.b32.xlu0 %v4363_v34, %s10556_s25  ;;  %v10199_v34 = vld [vmem:[%s13727_s6 + $0x140] ss:$8 sps:$4 sm:$0xff]  }
 0x4b1   : > { %4392 = vrot.lane.b32.xlu1 %v4391_v38, %s10556_s25  ;;  %v10202_v38 = vld [vmem:[%s13727_s6 + $0x440] ss:$8 sps:$4 sm:$0xff]  }
 0x4b3   : > { %4400 = vrot.lane.b32.xlu0 %v4399_v10, %s10556_s25  ;;  %v10207_v10 = vld [vmem:[%s13727_s6 + $0x154] ss:$8 sps:$4 sm:$0xff]  }
 0x4b5   : > { %4429 = vrot.lane.b32.xlu1 %v4428_v42, %s10556_s25  ;;  %v10210_v42 = vld [vmem:[%s13727_s6 + $0x454] ss:$8 sps:$4 sm:$0xff]  }
 0x4b7   : > { %4437 = vrot.lane.b32.xlu0 %v4436_v11, %s10556_s25  ;;  %v10205_v11 = vld [vmem:[%s13727_s6 + $0x150] ss:$8 sps:$4 sm:$0xff]  }
 0x50b   : > { %v4171_v8 = vpop.permute.xlu1 %4170 }
 0x50c   : > { %4176 = vst.msk [vmem:[#allocation2] sm:$0x1] %vm12945_vm5, %v4171_v8  ;;  %v10213_v8 = vld [vmem:[%s13727_s6 + $0x164] ss:$8 sps:$4 sm:$0xff]  }
 0x50d   : > { %v4182_v24 = vpop.permute.xlu0 %4181 }
 0x50e   : > { %4184 = vst.msk [vmem:[#allocation2 + $0x1] sm:$0x1] %vm12945_vm5, %v4182_v24  ;;  %v10216_v24 = vld [vmem:[%s13727_s6 + $0x464] ss:$8 sps:$4 sm:$0xff]  }
 0x50f   : > { %v4211_v41 = vpop.permute.xlu1 %4210 }
 0x510   : > { %4213 = vst.msk [vmem:[#allocation2 + $0x2] sm:$0x1] %vm12945_vm5, %v4211_v41  ;;  %v10211_v41 = vld [vmem:[%s13727_s6 + $0x160] ss:$8 sps:$4 sm:$0xff]  }
 0x511   : > { %v4219_v63 = vpop.permute.xlu0 %4218 }
 0x512   : > { %4221 = vst.msk [vmem:[#allocation2 + $0x3] sm:$0x1] %vm12945_vm5, %v4219_v63  ;;  %v10214_v63 = vld [vmem:[%s13727_s6 + $0x460] ss:$8 sps:$4 sm:$0xff]  }
 0x513   : > { %v4247_v13 = vpop.permute.xlu1 %4246 }
 0x514   : > { %4249 = vst.msk [vmem:[#allocation2 + $0x4] sm:$0x1] %vm12945_vm5, %v4247_v13  ;;  %v10219_v13 = vld [vmem:[%s13727_s6 + $0x174] ss:$8 sps:$4 sm:$0xff]  }
 0x515   : > { %v4255_v18 = vpop.permute.xlu0 %4254 }
 0x516   : > { %4257 = vst.msk [vmem:[#allocation2 + $0x5] sm:$0x1] %vm12945_vm5, %v4255_v18  ;;  %v10222_v18 = vld [vmem:[%s13727_s6 + $0x474] ss:$8 sps:$4 sm:$0xff]  }
 0x517   : > { %v4284_v21 = vpop.permute.xlu1 %4283 }
 0x518   : > { %4286 = vst.msk [vmem:[#allocation2 + $0x6] sm:$0x1] %vm12945_vm5, %v4284_v21  ;;  %v10217_v21 = vld [vmem:[%s13727_s6 + $0x170] ss:$8 sps:$4 sm:$0xff]  }
 0x519   : > { %v4292_v37 = vpop.permute.xlu0 %4291 }
 0x51a   : > { %4294 = vst.msk [vmem:[#allocation2 + $0x7] sm:$0x1] %vm12945_vm5, %v4292_v37  ;;  %v10220_v37 = vld [vmem:[%s13727_s6 + $0x470] ss:$8 sps:$4 sm:$0xff]  }
 0x51b   : > { %v4320_v0 = vpop.permute.xlu1 %4319 }
 0x51c   : > { %4322 = vst.msk [vmem:[#allocation2 + $0x8] sm:$0x1] %vm12945_vm5, %v4320_v0  ;;  %v10225_v0 = vld [vmem:[%s13727_s6 + $0x184] ss:$8 sps:$4 sm:$0xff]  }
 0x51d   : > { %v4328_v48 = vpop.permute.xlu0 %4327 }
 0x51e   : > { %4330 = vst.msk [vmem:[#allocation2 + $0x9] sm:$0x1] %vm12945_vm5, %v4328_v48  ;;  %v10228_v48 = vld [vmem:[%s13727_s6 + $0x484] ss:$8 sps:$4 sm:$0xff]  }
 0x51f   : > { %v4357_v6 = vpop.permute.xlu1 %4356 }
 0x520   : > { %4359 = vst.msk [vmem:[#allocation2 + $0xa] sm:$0x1] %vm12945_vm5, %v4357_v6  ;;  %v10231_v6 = vld [vmem:[%s13727_s6 + $0x194] ss:$8 sps:$4 sm:$0xff]  }
 0x521   : > { %v4365_v16 = vpop.permute.xlu0 %4364  ;;  %v12974_v62 = vld [vmem:[#allocation2] sm:$0xff] }
 0x522   : > { %4367 = vst.msk [vmem:[#allocation2 + $0xb] sm:$0x1] %vm12945_vm5, %v4365_v16  ;;  %v4452_v22 = vrot.slane %v12974_v62, %v13873_v59  ;;  %v4476_v55 = vrot.slane %v12974_v62, %v4475_v20  ;;  %v4448_v33 = vrot.slane %v12974_v62, %v13874_v15  ;;  %v4472_v1 = vrot.slane %v12974_v62, %v4471_v27  ;;  %v10234_v16 = vld [vmem:[%s13727_s6 + $0x494] ss:$8 sps:$4 sm:$0xff]  }
 0x523   : > { %v4393_v23 = vpop.permute.xlu1 %4392  ;;  %v4460_v46 = vrot.slane %v12974_v62, %v4459_v25 }
 0x524   : > { %4395 = vst.msk [vmem:[#allocation2 + $0xc] sm:$0x1] %vm12945_vm5, %v4393_v23  ;;  %v4526_v35 = vpack.c.bf16 %v4452_v22, %v4452_v22  ;;  %v4532_v26 = vpack.c.bf16 %v4476_v55, %v4476_v55  ;;  %v4525_v19 = vpack.c.bf16 %v4448_v33, %v4448_v33  ;;  %v4531_v49 = vpack.c.bf16 %v4472_v1, %v4472_v1  ;;  %v10229_v22 = vld [vmem:[%s13727_s6 + $0x190] ss:$8 sps:$4 sm:$0xff]   ;;  %v10237_v33 = vld [vmem:[%s13727_s6 + $0x1a4] ss:$8 sps:$4 sm:$0xff]  }
 0x525   : > { %v4401_v3 = vpop.permute.xlu0 %4400  ;;  %v4528_v4 = vpack.c.bf16 %v4460_v46, %v4460_v46  ;;  %v10232_v55 = vld [vmem:[%s13727_s6 + $0x490] ss:$8 sps:$4 sm:$0xff]   ;;  %v10240_v1 = vld [vmem:[%s13727_s6 + $0x4a4] ss:$8 sps:$4 sm:$0xff]   ;;  %v10235_v23 = vld [vmem:[%s13727_s6 + $0x1a0] ss:$8 sps:$4 sm:$0xff]  }
 0x526   : > { %4403 = vst.msk [vmem:[#allocation2 + $0xd] sm:$0x1] %vm12945_vm5, %v4401_v3  ;;  %6121 = vmatprep.mubr.bf16.mxu1 %v4526_v35  ;;  %6244 = vmatprep.mubr.bf16.mxu0 %v4532_v26  ;;  %v10238_v46 = vld [vmem:[%s13727_s6 + $0x4a0] ss:$8 sps:$4 sm:$0xff]   ;;  %v10243_v35 = vld [vmem:[%s13727_s6 + $0x1b4] ss:$8 sps:$4 sm:$0xff]  }
 0x527   : > { %6122 = vmatmul.mubr.bf16.vlgmr.msra.gmra.mrb[56].mxu1 %v4525_v19  ;;  %6245 = vmatmul.mubr.bf16.vlgmr.msra.gmra.mrb[40].mxu0 %v4531_v49  ;;  %v4430_v51 = vpop.permute.xlu1 %4429  ;;  %v10241_v26 = vld [vmem:[%s13727_s6 + $0x1b0] ss:$8 sps:$4 sm:$0xff]   ;;  %v10249_v19 = vld [vmem:[%s13727_s6 + $0x1c4] ss:$8 sps:$4 sm:$0xff]   ;;  %v10247_v3 = vld [vmem:[%s13727_s6 + $0x1c0] ss:$8 sps:$4 sm:$0xff]  }
 0x528   : > { %6131 = vmatpush1.bf16.msra.mxu1 %v10175_v56  ;;  %6254 = vmatpush1.bf16.msra.mxu0 %v10178_v52  ;;  %4432 = vst.msk [vmem:[#allocation2 + $0xe] sm:$0x1] %vm12945_vm5, %v4430_v51  ;;  %v10246_v56 = vld [vmem:[%s13727_s6 + $0x4b4] ss:$8 sps:$4 sm:$0xff]   ;;  %v10244_v52 = vld [vmem:[%s13727_s6 + $0x4b0] ss:$8 sps:$4 sm:$0xff]  }
 0x529   : > { %6162 = vmatprep.mubr.bf16.mxu1 %v4528_v4  ;;  %v4438_v61 = vpop.permute.xlu0 %4437  ;;  %6132 = vmatprep.subr.bf16.mxu1 %v10183_v36  ;;  %v10252_v49 = vld [vmem:[%s13727_s6 + $0x4c4] ss:$8 sps:$4 sm:$0xff]   ;;  %v10250_v36 = vld [vmem:[%s13727_s6 + $0x4c0] ss:$8 sps:$4 sm:$0xff]   ;;  %v10258_v51 = vld [vmem:[%s13727_s6 + $0x4d4] ss:$8 sps:$4 sm:$0xff]  }
 0x52a   : > { %4440 = vst.msk [vmem:[#allocation2 + $0xf] sm:$0x1] %vm12945_vm5, %v4438_v61  ;;  %6255 = vmatprep.subr.bf16.mxu0 %v10186_v44  ;;  %v10255_v44 = vld [vmem:[%s13727_s6 + $0x1d4] ss:$8 sps:$4 sm:$0xff]   ;;  %v10253_v4 = vld [vmem:[%s13727_s6 + $0x1d0] ss:$8 sps:$4 sm:$0xff]  }
 0x52b   : > { %v10264_v61 = vld [vmem:[%s13727_s6 + $0x4e4] ss:$8 sps:$4 sm:$0xff]  }
 0x52c   : > { %6133 = vmatpush1.bf16.msra.mxu1 %v10181_v17  ;;  %6256 = vmatpush1.bf16.msra.mxu0 %v10184_v30  ;;  %v10256_v17 = vld [vmem:[%s13727_s6 + $0x4d0] ss:$8 sps:$4 sm:$0xff]   ;;  %v10261_v30 = vld [vmem:[%s13727_s6 + $0x1e4] ss:$8 sps:$4 sm:$0xff]  }
 0x52d   : > { %6134 = vmatprep.subr.bf16.mxu1 %v10189_v7  ;;  %6257 = vmatprep.subr.bf16.mxu0 %v10192_v12  ;;  %v10259_v7 = vld [vmem:[%s13727_s6 + $0x1e0] ss:$8 sps:$4 sm:$0xff]  }
 0x52e   : > { %v10262_v12 = vld [vmem:[%s13727_s6 + $0x4e0] ss:$8 sps:$4 sm:$0xff]  }
 0x530   : > { %6135 = vmatpush1.bf16.msra.mxu1 %v10187_v54  ;;  %6258 = vmatpush1.bf16.msra.mxu0 %v10190_v5  ;;  %v10267_v54 = vld [vmem:[%s13727_s6 + $0x1f4] ss:$8 sps:$4 sm:$0xff]  }
 0x531   : > { %6136 = vmatprep.subr.bf16.mxu1 %v10195_v57  ;;  %6259 = vmatprep.subr.bf16.mxu0 %v10198_v50  ;;  %v13048_v58 = vld [vmem:[#allocation2 + $0x8] sm:$0xff]  ;;  %v10270_v5 = vld [vmem:[%s13727_s6 + $0x4f4] ss:$8 sps:$4 sm:$0xff]   ;;  %v10265_v57 = vld [vmem:[%s13727_s6 + $0x1f0] ss:$8 sps:$4 sm:$0xff]  }
 0x532   : > { %v4484_v60 = vrot.slane %v13048_v58, %v13873_v59  ;;  %v13056_v29 = vrot.slane %v13048_v58, %v4467_v43  ;;  %v13061_v14 = vrot.slane %v13048_v58, %v4463_v40  ;;  %v13066_v28 = vrot.slane %v13048_v58, %v4475_v20  ;;  %v10223_v20 = vld [vmem:[%s13727_s6 + $0x180] ss:$8 sps:$4 sm:$0xff]   ;;  %v10268_v50 = vld [vmem:[%s13727_s6 + $0x4f0] ss:$8 sps:$4 sm:$0xff]  }
 0x533   : > { %v13071_v32 = vrot.slane %v13048_v58, %v4471_v27  ;;  %v10226_v27 = vld [vmem:[%s13727_s6 + $0x480] ss:$8 sps:$4 sm:$0xff]  }
 0x534   : > { %6137 = vmatpush1.bf16.msra.mxu1 %v10193_v39  ;;  %6260 = vmatpush1.bf16.msra.mxu0 %v10196_v53  ;;  %v4534_v2 = vpack.c.bf16 %v4484_v60, %v4484_v60  ;;  %v13875_v39 = vld [vmem:[#allocation9_spill] sm:$0xff] }
 0x535   : > { %6138 = vmatprep.subr.bf16.mxu1 %v10201_v9  ;;  %6261 = vmatprep.subr.bf16.mxu0 %v10204_v31  ;;  %v4456_v53 = vrot.slane %v12974_v62, %v13875_v39  ;;  %v10273_v9 = vld [vmem:[%s13727_s6 + $0x204] ss:$8 sps:$4 sm:$0xff]   ;;  %v4480_v31 = vrot.slane %v13048_v58, %v13874_v15 }
 0x536   : > { %6285 = vmatprep.mubr.bf16.mxu0 %v4534_v2  ;;  %v10276_v60 = vld [vmem:[%s13727_s6 + $0x504] ss:$8 sps:$4 sm:$0xff]   ;;  %v10271_v2 = vld [vmem:[%s13727_s6 + $0x200] ss:$8 sps:$4 sm:$0xff]  }
 0x538   : > { %6139 = vmatpush1.bf16.msra.mxu1 %v10199_v34  ;;  %6262 = vmatpush1.bf16.msra.mxu0 %v10202_v38  ;;  %v4468_v34 = vrot.slane %v12974_v62, %v4467_v43  ;;  %v4492_v38 = vrot.slane %v13048_v58, %v4459_v25  ;;  %v10279_v43 = vld [vmem:[%s13727_s6 + $0x214] ss:$8 sps:$4 sm:$0xff]  }
 0x539   : > { %6140 = vmatprep.subr.bf16.mxu1 %v10207_v10  ;;  %6263 = vmatprep.subr.bf16.mxu0 %v10210_v42  ;;  %v4527_v10 = vpack.c.bf16 %v4456_v53, %v4456_v53  ;;  %v4533_v42 = vpack.c.bf16 %v4480_v31, %v4480_v31  ;;  %v10282_v25 = vld [vmem:[%s13727_s6 + $0x514] ss:$8 sps:$4 sm:$0xff]   ;;  %v10340_v31 = vld [vmem:[%s13727_s6 + $0x5b0] ss:$8 sps:$4 sm:$0xff]  }
 0x53a   : > { %v10342_v53 = vld [vmem:[%s13727_s6 + $0x5b4] ss:$8 sps:$4 sm:$0xff]  }
 0x53c   : > { %6141 = vmatpush1.bf16.msra.mxu1 %v10205_v11  ;;  %6264 = vmatpush1.bf16.msra.mxu0 %v10208_v47  ;;  %v10274_v11 = vld [vmem:[%s13727_s6 + $0x500] ss:$8 sps:$4 sm:$0xff]   ;;  %v4530_v47 = vpack.c.bf16 %v4468_v34, %v4468_v34  ;;  %v10348_v34 = vld [vmem:[%s13727_s6 + $0x5c4] ss:$8 sps:$4 sm:$0xff]  }
 0x53d   : > { %6142 = vmatprep.subr.bf16.mxu1 %v10213_v8  ;;  %6265 = vmatprep.subr.bf16.mxu0 %v10216_v24  ;;  %v4536_v8 = vpack.c.bf16 %v4492_v38, %v4492_v38  ;;  %v10277_v24 = vld [vmem:[%s13727_s6 + $0x210] ss:$8 sps:$4 sm:$0xff]   ;;  %v10343_v38 = vld [vmem:[%s13727_s6 + $0x2c0] ss:$8 sps:$4 sm:$0xff]  }
 0x540   : > { %6143 = vmatpush1.bf16.msra.mxu1 %v10211_v41  ;;  %6266 = vmatpush1.bf16.msra.mxu0 %v10214_v63  ;;  %v10280_v41 = vld [vmem:[%s13727_s6 + $0x510] ss:$8 sps:$4 sm:$0xff]   ;;  %v10285_v63 = vld [vmem:[%s13727_s6 + $0x224] ss:$8 sps:$4 sm:$0xff]  }
 0x541   : > { %6144 = vmatprep.subr.bf16.mxu1 %v10219_v13  ;;  %6267 = vmatprep.subr.bf16.mxu0 %v10222_v18  ;;  %v10288_v13 = vld [vmem:[%s13727_s6 + $0x524] ss:$8 sps:$4 sm:$0xff]   ;;  %v10283_v18 = vld [vmem:[%s13727_s6 + $0x220] ss:$8 sps:$4 sm:$0xff]  }
 0x544   : > { %6145 = vmatpush1.bf16.msra.mxu1 %v10217_v21  ;;  %6268 = vmatpush1.bf16.msra.mxu0 %v10220_v37  ;;  %v10286_v21 = vld [vmem:[%s13727_s6 + $0x520] ss:$8 sps:$4 sm:$0xff]   ;;  %v10291_v37 = vld [vmem:[%s13727_s6 + $0x234] ss:$8 sps:$4 sm:$0xff]  }
 0x545   : > { %6146 = vmatprep.subr.bf16.mxu1 %v10225_v0  ;;  %6269 = vmatprep.subr.bf16.mxu0 %v10228_v48  ;;  %v10294_v0 = vld [vmem:[%s13727_s6 + $0x534] ss:$8 sps:$4 sm:$0xff]   ;;  %v10289_v48 = vld [vmem:[%s13727_s6 + $0x230] ss:$8 sps:$4 sm:$0xff]  }
 0x548   : > { %6147 = vmatpush1.bf16.msra.mxu1 %v10223_v20  ;;  %6270 = vmatpush1.bf16.msra.mxu0 %v10226_v27  ;;  %v10292_v20 = vld [vmem:[%s13727_s6 + $0x530] ss:$8 sps:$4 sm:$0xff]   ;;  %v10297_v27 = vld [vmem:[%s13727_s6 + $0x244] ss:$8 sps:$4 sm:$0xff]  }
 0x549   : > { %6148 = vmatprep.subr.bf16.mxu1 %v10231_v6  ;;  %6271 = vmatprep.subr.bf16.mxu0 %v10234_v16  ;;  %v10300_v6 = vld [vmem:[%s13727_s6 + $0x544] ss:$8 sps:$4 sm:$0xff]   ;;  %v10295_v16 = vld [vmem:[%s13727_s6 + $0x240] ss:$8 sps:$4 sm:$0xff]  }
 0x54c   : > { %6149 = vmatpush1.bf16.msra.mxu1 %v10229_v22  ;;  %6272 = vmatpush1.bf16.msra.mxu0 %v10232_v55  ;;  %v10298_v22 = vld [vmem:[%s13727_s6 + $0x540] ss:$8 sps:$4 sm:$0xff]   ;;  %v10303_v55 = vld [vmem:[%s13727_s6 + $0x254] ss:$8 sps:$4 sm:$0xff]  }
 0x54d   : > { %6150 = vmatprep.subr.bf16.mxu1 %v10237_v33  ;;  %6273 = vmatprep.subr.bf16.mxu0 %v10240_v1  ;;  %v10306_v33 = vld [vmem:[%s13727_s6 + $0x554] ss:$8 sps:$4 sm:$0xff]   ;;  %v10301_v1 = vld [vmem:[%s13727_s6 + $0x250] ss:$8 sps:$4 sm:$0xff]  }
 0x550   : > { %6151 = vmatpush1.bf16.msra.mxu1 %v10235_v23  ;;  %6274 = vmatpush1.bf16.msra.mxu0 %v10238_v46  ;;  %v10304_v23 = vld [vmem:[%s13727_s6 + $0x550] ss:$8 sps:$4 sm:$0xff]   ;;  %v10309_v46 = vld [vmem:[%s13727_s6 + $0x264] ss:$8 sps:$4 sm:$0xff]  }
 0x551   : > { %6152 = vmatprep.subr.bf16.mxu1 %v10243_v35  ;;  %6275 = vmatprep.subr.bf16.mxu0 %v10246_v56  ;;  %v10312_v35 = vld [vmem:[%s13727_s6 + $0x564] ss:$8 sps:$4 sm:$0xff]   ;;  %v10307_v56 = vld [vmem:[%s13727_s6 + $0x260] ss:$8 sps:$4 sm:$0xff]  }
 0x554   : > { %6153 = vmatpush1.bf16.msra.mxu1 %v10241_v26  ;;  %6276 = vmatpush1.bf16.msra.mxu0 %v10244_v52  ;;  %v10310_v26 = vld [vmem:[%s13727_s6 + $0x560] ss:$8 sps:$4 sm:$0xff]   ;;  %v10315_v52 = vld [vmem:[%s13727_s6 + $0x274] ss:$8 sps:$4 sm:$0xff]  }
 0x555   : > { %6154 = vmatprep.subr.bf16.mxu1 %v10249_v19  ;;  %6277 = vmatprep.subr.bf16.mxu0 %v10252_v49  ;;  %v10318_v19 = vld [vmem:[%s13727_s6 + $0x574] ss:$8 sps:$4 sm:$0xff]   ;;  %v10313_v49 = vld [vmem:[%s13727_s6 + $0x270] ss:$8 sps:$4 sm:$0xff]  }
 0x558   : > { %6155 = vmatpush1.bf16.msra.mxu1 %v10247_v3  ;;  %6278 = vmatpush1.bf16.msra.mxu0 %v10250_v36  ;;  %v10316_v3 = vld [vmem:[%s13727_s6 + $0x570] ss:$8 sps:$4 sm:$0xff]   ;;  %v10321_v36 = vld [vmem:[%s13727_s6 + $0x284] ss:$8 sps:$4 sm:$0xff]  }
 0x559   : > { %6156 = vmatprep.subr.bf16.mxu1 %v10255_v44  ;;  %6279 = vmatprep.subr.bf16.mxu0 %v10258_v51  ;;  %v10324_v44 = vld [vmem:[%s13727_s6 + $0x584] ss:$8 sps:$4 sm:$0xff]   ;;  %v10319_v51 = vld [vmem:[%s13727_s6 + $0x280] ss:$8 sps:$4 sm:$0xff]  }
 0x55c   : > { %6157 = vmatpush1.bf16.msra.mxu1 %v10253_v4  ;;  %6280 = vmatpush1.bf16.msra.mxu0 %v10256_v17  ;;  %v10322_v4 = vld [vmem:[%s13727_s6 + $0x580] ss:$8 sps:$4 sm:$0xff]   ;;  %v10327_v17 = vld [vmem:[%s13727_s6 + $0x294] ss:$8 sps:$4 sm:$0xff]  }
 0x55d   : > { %6158 = vmatprep.subr.bf16.mxu1 %v10261_v30  ;;  %6281 = vmatprep.subr.bf16.mxu0 %v10264_v61  ;;  %v10330_v30 = vld [vmem:[%s13727_s6 + $0x594] ss:$8 sps:$4 sm:$0xff]   ;;  %v10325_v61 = vld [vmem:[%s13727_s6 + $0x290] ss:$8 sps:$4 sm:$0xff]  }
 0x560   : > { %6159 = vmatpush1.bf16.msra.mxu1 %v10259_v7  ;;  %6282 = vmatpush1.bf16.msra.mxu0 %v10262_v12  ;;  %v10328_v7 = vld [vmem:[%s13727_s6 + $0x590] ss:$8 sps:$4 sm:$0xff]   ;;  %v10333_v12 = vld [vmem:[%s13727_s6 + $0x2a4] ss:$8 sps:$4 sm:$0xff]  }
 0x561   : > { %6160 = vmatprep.subr.bf16.mxu1 %v10267_v54  ;;  %6283 = vmatprep.subr.bf16.mxu0 %v10270_v5  ;;  %v10336_v54 = vld [vmem:[%s13727_s6 + $0x5a4] ss:$8 sps:$4 sm:$0xff]   ;;  %v10331_v5 = vld [vmem:[%s13727_s6 + $0x2a0] ss:$8 sps:$4 sm:$0xff]  }
 0x564   : > { %6161 = vmatpush1.bf16.msra.mxu1 %v10265_v57  ;;  %6284 = vmatpush1.bf16.msra.mxu0 %v10268_v50  ;;  %v10334_v57 = vld [vmem:[%s13727_s6 + $0x5a0] ss:$8 sps:$4 sm:$0xff]   ;;  %v10339_v50 = vld [vmem:[%s13727_s6 + $0x2b4] ss:$8 sps:$4 sm:$0xff]  }
 0x565   : > { %6171 = vmatprep.subr.bf16.mxu1 %v10273_v9  ;;  %6294 = vmatprep.subr.bf16.mxu0 %v10276_v60  ;;  %v10337_v9 = vld [vmem:[%s13727_s6 + $0x2b0] ss:$8 sps:$4 sm:$0xff]   ;;  %v10345_v60 = vld [vmem:[%s13727_s6 + $0x2c4] ss:$8 sps:$4 sm:$0xff]  }
 0x567   : > { %6163 = vmatmul.mubr.bf16.vlgmr.msra.gmra.mrb[56].mxu1 %v4527_v10  ;;  %6286 = vmatmul.mubr.bf16.vlgmr.msra.gmra.mrb[40].mxu0 %v4533_v42  ;;  %v10351_v10 = vld [vmem:[%s13727_s6 + $0x2d4] ss:$8 sps:$4 sm:$0xff]  }
 0x568   : > { %6172 = vmatpush1.bf16.msra.mxu1 %v10271_v2  ;;  %6203 = vmatprep.mubr.bf16.mxu1 %v4530_v47  ;;  %v10346_v2 = vld [vmem:[%s13727_s6 + $0x5c0] ss:$8 sps:$4 sm:$0xff]   ;;  %v10354_v42 = vld [vmem:[%s13727_s6 + $0x5d4] ss:$8 sps:$4 sm:$0xff]   ;;  %v10352_v47 = vld [vmem:[%s13727_s6 + $0x5d0] ss:$8 sps:$4 sm:$0xff]  }
 0x569   : > { %6295 = vmatpush1.bf16.msra.mxu0 %v10274_v11  ;;  %6326 = vmatprep.mubr.bf16.mxu0 %v4536_v8  ;;  %v10349_v11 = vld [vmem:[%s13727_s6 + $0x2d0] ss:$8 sps:$4 sm:$0xff]   ;;  %v10355_v8 = vld [vmem:[%s13727_s6 + $0x2e0] ss:$8 sps:$4 sm:$0xff]  }
 0x56a   : > { %6173 = vmatprep.subr.bf16.mxu1 %v10279_v43  ;;  %6296 = vmatprep.subr.bf16.mxu0 %v10282_v25  ;;  %v10357_v43 = vld [vmem:[%s13727_s6 + $0x2e4] ss:$8 sps:$4 sm:$0xff]  }
 0x56b   : > { %v10360_v25 = vld [vmem:[%s13727_s6 + $0x5e4] ss:$8 sps:$4 sm:$0xff]  }
 0x56c   : > { %6174 = vmatpush1.bf16.msra.mxu1 %v10277_v24  ;;  %v10358_v24 = vld [vmem:[%s13727_s6 + $0x5e0] ss:$8 sps:$4 sm:$0xff]  }
 0x56d   : > { %6297 = vmatpush1.bf16.msra.mxu0 %v10280_v41  ;;  %6175 = vmatprep.subr.bf16.mxu1 %v10285_v63  ;;  %v10363_v41 = vld [vmem:[%s13727_s6 + $0x2f4] ss:$8 sps:$4 sm:$0xff]  }
 0x56e   : > { %6298 = vmatprep.subr.bf16.mxu0 %v10288_v13  ;;  %v10366_v63 = vld [vmem:[%s13727_s6 + $0x5f4] ss:$8 sps:$4 sm:$0xff]   ;;  %v10361_v13 = vld [vmem:[%s13727_s6 + $0x2f0] ss:$8 sps:$4 sm:$0xff]  }
 0x570   : > { %6176 = vmatpush1.bf16.msra.mxu1 %v10283_v18  ;;  %v10364_v18 = vld [vmem:[%s13727_s6 + $0x5f0] ss:$8 sps:$4 sm:$0xff]  }
 0x571   : > { %6299 = vmatpush1.bf16.msra.mxu0 %v10286_v21  ;;  %6177 = vmatprep.subr.bf16.mxu1 %v10291_v37  ;;  %v4464_v21 = vrot.slane %v12974_v62, %v4463_v40  ;;  %v4488_v37 = vrot.slane %v13048_v58, %v13875_v39  ;;  %v4538_v62 = vpack.c.bf16 %v13056_v29, %v13056_v29  ;;  %v10370_v58 = vld [vmem:[%s13727_s6 + $0x610] ss:$8 sps:$4 sm:$0xff]   ;;  %v10375_v40 = vld [vmem:[%s13727_s6 + $0x624] ss:$8 sps:$4 sm:$0xff]   ;;  %v10373_v39 = vld [vmem:[%s13727_s6 + $0x620] ss:$8 sps:$4 sm:$0xff]  }
 0x572   : > { %6300 = vmatprep.subr.bf16.mxu0 %v10294_v0  ;;  %v10369_v0 = vld [vmem:[%s13727_s6 + $0x604] ss:$8 sps:$4 sm:$0xff]   ;;  %v10378_v29 = vld [vmem:[%s13727_s6 + $0x634] ss:$8 sps:$4 sm:$0xff]  }
 0x574   : > { %6178 = vmatpush1.bf16.msra.mxu1 %v10289_v48  ;;  %v4529_v48 = vpack.c.bf16 %v4464_v21, %v4464_v21  ;;  %v10468_v21 = vld [vmem:[%s13729_s8 + $0x10] sm:$0xff]  }
 0x575   : > { %6301 = vmatpush1.bf16.msra.mxu0 %v10292_v20  ;;  %6179 = vmatprep.subr.bf16.mxu1 %v10297_v27  ;;  %v10367_v20 = vld [vmem:[%s13727_s6 + $0x600] ss:$8 sps:$4 sm:$0xff]   ;;  %v4535_v27 = vpack.c.bf16 %v4488_v37, %v4488_v37 }
 0x576   : > { %6302 = vmatprep.subr.bf16.mxu0 %v10300_v6  ;;  %v10376_v6 = vld [vmem:[%s13727_s6 + $0x630] ss:$8 sps:$4 sm:$0xff]   ;;  %v10439_v37 = vld [vmem:[%s13727_s6 + $0x780] ss:$8 sps:$4 sm:$0xff]  }
 0x578   : > { %6180 = vmatpush1.bf16.msra.mxu1 %v10295_v16  ;;  %v10381_v16 = vld [vmem:[%s13727_s6 + $0x644] ss:$8 sps:$4 sm:$0xff]  }
 0x579   : > { %6303 = vmatpush1.bf16.msra.mxu0 %v10298_v22  ;;  %6181 = vmatprep.subr.bf16.mxu1 %v10303_v55  ;;  %v10379_v22 = vld [vmem:[%s13727_s6 + $0x640] ss:$8 sps:$4 sm:$0xff]   ;;  %v10384_v55 = vld [vmem:[%s13727_s6 + $0x654] ss:$8 sps:$4 sm:$0xff]  }
 0x57a   : > { %6304 = vmatprep.subr.bf16.mxu0 %v10306_v33  ;;  %v10382_v33 = vld [vmem:[%s13727_s6 + $0x650] ss:$8 sps:$4 sm:$0xff]  }
 0x57c   : > { %6182 = vmatpush1.bf16.msra.mxu1 %v10301_v1  ;;  %v10387_v1 = vld [vmem:[%s13727_s6 + $0x664] ss:$8 sps:$4 sm:$0xff]  }
 0x57d   : > { %6305 = vmatpush1.bf16.msra.mxu0 %v10304_v23  ;;  %6183 = vmatprep.subr.bf16.mxu1 %v10309_v46  ;;  %v10385_v23 = vld [vmem:[%s13727_s6 + $0x660] ss:$8 sps:$4 sm:$0xff]   ;;  %v10390_v46 = vld [vmem:[%s13727_s6 + $0x674] ss:$8 sps:$4 sm:$0xff]  }
 0x57e   : > { %6306 = vmatprep.subr.bf16.mxu0 %v10312_v35  ;;  %v10388_v35 = vld [vmem:[%s13727_s6 + $0x670] ss:$8 sps:$4 sm:$0xff]  }
 0x580   : > { %6184 = vmatpush1.bf16.msra.mxu1 %v10307_v56  ;;  %v10393_v56 = vld [vmem:[%s13727_s6 + $0x684] ss:$8 sps:$4 sm:$0xff]  }
 0x581   : > { %6307 = vmatpush1.bf16.msra.mxu0 %v10310_v26  ;;  %6185 = vmatprep.subr.bf16.mxu1 %v10315_v52  ;;  %v10391_v26 = vld [vmem:[%s13727_s6 + $0x680] ss:$8 sps:$4 sm:$0xff]   ;;  %v10396_v52 = vld [vmem:[%s13727_s6 + $0x694] ss:$8 sps:$4 sm:$0xff]  }
 0x582   : > { %6308 = vmatprep.subr.bf16.mxu0 %v10318_v19  ;;  %v10394_v19 = vld [vmem:[%s13727_s6 + $0x690] ss:$8 sps:$4 sm:$0xff]  }
 0x584   : > { %6186 = vmatpush1.bf16.msra.mxu1 %v10313_v49  ;;  %v10399_v49 = vld [vmem:[%s13727_s6 + $0x6a4] ss:$8 sps:$4 sm:$0xff]  }
 0x585   : > { %6309 = vmatpush1.bf16.msra.mxu0 %v10316_v3  ;;  %6187 = vmatprep.subr.bf16.mxu1 %v10321_v36  ;;  %v10397_v3 = vld [vmem:[%s13727_s6 + $0x6a0] ss:$8 sps:$4 sm:$0xff]   ;;  %v10402_v36 = vld [vmem:[%s13727_s6 + $0x6b4] ss:$8 sps:$4 sm:$0xff]  }
 0x586   : > { %6310 = vmatprep.subr.bf16.mxu0 %v10324_v44  ;;  %v10400_v44 = vld [vmem:[%s13727_s6 + $0x6b0] ss:$8 sps:$4 sm:$0xff]  }
 0x588   : > { %6188 = vmatpush1.bf16.msra.mxu1 %v10319_v51  ;;  %v10405_v51 = vld [vmem:[%s13727_s6 + $0x6c4] ss:$8 sps:$4 sm:$0xff]  }
 0x589   : > { %6311 = vmatpush1.bf16.msra.mxu0 %v10322_v4  ;;  %6189 = vmatprep.subr.bf16.mxu1 %v10327_v17  ;;  %v10403_v4 = vld [vmem:[%s13727_s6 + $0x6c0] ss:$8 sps:$4 sm:$0xff]   ;;  %v10408_v17 = vld [vmem:[%s13727_s6 + $0x6d4] ss:$8 sps:$4 sm:$0xff]  }
 0x58a   : > { %6312 = vmatprep.subr.bf16.mxu0 %v10330_v30  ;;  %v10406_v30 = vld [vmem:[%s13727_s6 + $0x6d0] ss:$8 sps:$4 sm:$0xff]  }
 0x58c   : > { %6190 = vmatpush1.bf16.msra.mxu1 %v10325_v61  ;;  %v10411_v61 = vld [vmem:[%s13727_s6 + $0x6e4] ss:$8 sps:$4 sm:$0xff]  }
 0x58d   : > { %6313 = vmatpush1.bf16.msra.mxu0 %v10328_v7  ;;  %6191 = vmatprep.subr.bf16.mxu1 %v10333_v12  ;;  %v10409_v7 = vld [vmem:[%s13727_s6 + $0x6e0] ss:$8 sps:$4 sm:$0xff]   ;;  %v10414_v12 = vld [vmem:[%s13727_s6 + $0x6f4] ss:$8 sps:$4 sm:$0xff]  }
 0x58e   : > { %6314 = vmatprep.subr.bf16.mxu0 %v10336_v54  ;;  %v10412_v54 = vld [vmem:[%s13727_s6 + $0x6f0] ss:$8 sps:$4 sm:$0xff]  }
 0x590   : > { %6192 = vmatpush1.bf16.msra.mxu1 %v10331_v5  ;;  %v10417_v5 = vld [vmem:[%s13727_s6 + $0x704] ss:$8 sps:$4 sm:$0xff]  }
 0x591   : > { %6315 = vmatpush1.bf16.msra.mxu0 %v10334_v57  ;;  %6193 = vmatprep.subr.bf16.mxu1 %v10339_v50  ;;  %v10415_v57 = vld [vmem:[%s13727_s6 + $0x700] ss:$8 sps:$4 sm:$0xff]   ;;  %v4537_v50 = vpack.c.bf16 %v13061_v14, %v13061_v14  ;;  %v10423_v14 = vld [vmem:[%s13727_s6 + $0x724] ss:$8 sps:$4 sm:$0xff]  }
 0x592   : > { %6316 = vmatprep.subr.bf16.mxu0 %v10342_v53  ;;  %v10420_v53 = vld [vmem:[%s13727_s6 + $0x714] ss:$8 sps:$4 sm:$0xff]  }
 0x594   : > { %6194 = vmatpush1.bf16.msra.mxu1 %v10337_v9  ;;  %v4540_v9 = vpack.c.bf16 %v13066_v28, %v13066_v28  ;;  %v10426_v28 = vld [vmem:[%s13727_s6 + $0x734] ss:$8 sps:$4 sm:$0xff]  }
 0x595   : > { %6317 = vmatpush1.bf16.msra.mxu0 %v10340_v31  ;;  %6195 = vmatprep.subr.bf16.mxu1 %v10345_v60  ;;  %v10418_v31 = vld [vmem:[%s13727_s6 + $0x710] ss:$8 sps:$4 sm:$0xff]   ;;  %v10421_v60 = vld [vmem:[%s13727_s6 + $0x720] ss:$8 sps:$4 sm:$0xff]  }
 0x596   : > { %6318 = vmatprep.subr.bf16.mxu0 %v10348_v34  ;;  %v10424_v34 = vld [vmem:[%s13727_s6 + $0x730] ss:$8 sps:$4 sm:$0xff]  }
 0x598   : > { %6196 = vmatpush1.bf16.msra.mxu1 %v10343_v38  ;;  %v10429_v38 = vld [vmem:[%s13727_s6 + $0x744] ss:$8 sps:$4 sm:$0xff]  }
 0x599   : > { %6319 = vmatpush1.bf16.msra.mxu0 %v10346_v2  ;;  %6197 = vmatprep.subr.bf16.mxu1 %v10351_v10  ;;  %v10427_v2 = vld [vmem:[%s13727_s6 + $0x740] ss:$8 sps:$4 sm:$0xff]   ;;  %v10432_v10 = vld [vmem:[%s13727_s6 + $0x754] ss:$8 sps:$4 sm:$0xff]  }
 0x59a   : > { %6320 = vmatprep.subr.bf16.mxu0 %v10354_v42  ;;  %v10430_v42 = vld [vmem:[%s13727_s6 + $0x750] ss:$8 sps:$4 sm:$0xff]  }
 0x59c   : > { %6198 = vmatpush1.bf16.msra.mxu1 %v10349_v11  ;;  %v10435_v11 = vld [vmem:[%s13727_s6 + $0x764] ss:$8 sps:$4 sm:$0xff]  }
 0x59d   : > { %6321 = vmatpush1.bf16.msra.mxu0 %v10352_v47  ;;  %6199 = vmatprep.subr.bf16.mxu1 %v10357_v43  ;;  %v10433_v47 = vld [vmem:[%s13727_s6 + $0x760] ss:$8 sps:$4 sm:$0xff]  }
 0x59e   : > { %6322 = vmatprep.subr.bf16.mxu0 %v10360_v25  ;;  %v10463_v43 = vld [vmem:[%s13729_s8 + $0x40] sm:$0xff]  }
 0x59f   : > { %v10464_v25 = vld [vmem:[%s13729_s8] sm:$0xff]  }
 0x5a0   : > { %6200 = vmatpush1.bf16.msra.mxu1 %v10355_v8  ;;  %v10465_v8 = vld [vmem:[%s13729_s8 + $0x48] sm:$0xff]  }
 0x5a1   : > { %6323 = vmatpush1.bf16.msra.mxu0 %v10358_v24  ;;  %6201 = vmatprep.subr.bf16.mxu1 %v10363_v41  ;;  %v10438_v24 = vld [vmem:[%s13727_s6 + $0x774] ss:$8 sps:$4 sm:$0xff]   ;;  %v10466_v41 = vld [vmem:[%s13729_s8 + $0x8] sm:$0xff]  }
 0x5a2   : > { %6324 = vmatprep.subr.bf16.mxu0 %v10366_v63  ;;  %v10436_v63 = vld [vmem:[%s13727_s6 + $0x770] ss:$8 sps:$4 sm:$0xff]  }
 0x5a4   : > { %6202 = vmatpush1.bf16.msra.mxu1 %v10361_v13  ;;  %v10467_v13 = vld [vmem:[%s13729_s8 + $0x50] sm:$0xff]  }
 0x5a5   : > { %6325 = vmatpush1.bf16.msra.mxu0 %v10364_v18  ;;  %9337 = vmatprep.subr.bf16.mxu1 %v10463_v43  ;;  %v10441_v18 = vld [vmem:[%s13727_s6 + $0x784] ss:$8 sps:$4 sm:$0xff]  }
 0x5a6   : > { %6335 = vmatprep.subr.bf16.mxu0 %v10369_v0  ;;  %v10469_v0 = vld [vmem:[%s13729_s8 + $0x58] sm:$0xff]  }
 0x5a7   : > { %6204 = vmatmul.mubr.bf16.vlgmr.msra.gmra.mrb[56].mxu1 %v4529_v48  ;;  %v10444_v48 = vld [vmem:[%s13727_s6 + $0x794] ss:$8 sps:$4 sm:$0xff]  }
 0x5a8   : > { %6327 = vmatmul.mubr.bf16.vlgmr.msra.gmra.mrb[40].mxu0 %v4535_v27  ;;  %9338 = vmatpush3.bf16.msra.mxu1 %v10464_v25  ;;  %v10442_v27 = vld [vmem:[%s13727_s6 + $0x790] ss:$8 sps:$4 sm:$0xff]  }
 0x5a9   : > { %6336 = vmatpush1.bf16.msra.mxu0 %v10367_v20  ;;  %6367 = vmatprep.mubr.bf16.mxu0 %v4538_v62  ;;  %v10470_v20 = vld [vmem:[%s13729_s8 + $0x18] sm:$0xff]   ;;  %v10447_v62 = vld [vmem:[%s13727_s6 + $0x7a4] ss:$8 sps:$4 sm:$0xff]  }
 0x5aa   : > { %6337 = vmatprep.subr.bf16.mxu0 %v10372_v45  ;;  %9339 = vmatprep.subr.bf16.mxu1 %v10465_v8  ;;  %v10471_v45 = vld [vmem:[%s13729_s8 + $0x60] sm:$0xff]  }
 0x5ac   : > { %9340 = vmatpush3.bf16.msra.mxu1 %v10466_v41 }
 0x5ad   : > { %6338 = vmatpush1.bf16.msra.mxu0 %v10370_v58  ;;  %9341 = vmatprep.subr.bf16.mxu1 %v10467_v13  ;;  %v10472_v58 = vld [vmem:[%s13729_s8 + $0x20] sm:$0xff]  }
 0x5ae   : > { %6339 = vmatprep.subr.bf16.mxu0 %v10375_v40  ;;  %v10445_v40 = vld [vmem:[%s13727_s6 + $0x7a0] ss:$8 sps:$4 sm:$0xff]  }
 0x5b0   : > { %9342 = vmatpush3.bf16.msra.mxu1 %v10468_v21 }
 0x5b1   : > { %6340 = vmatpush1.bf16.msra.mxu0 %v10373_v39  ;;  %9343 = vmatprep.subr.bf16.mxu1 %v10469_v0  ;;  %v10473_v39 = vld [vmem:[%s13729_s8 + $0x68] sm:$0xff]  }
 0x5b2   : > { %6341 = vmatprep.subr.bf16.mxu0 %v10378_v29  ;;  %v10450_v29 = vld [vmem:[%s13727_s6 + $0x7b4] ss:$8 sps:$4 sm:$0xff]  }
 0x5b4   : > { %9344 = vmatpush3.bf16.msra.mxu1 %v10470_v20 }
 0x5b5   : > { %6342 = vmatpush1.bf16.msra.mxu0 %v10376_v6  ;;  %9345 = vmatprep.subr.bf16.mxu1 %v10471_v45  ;;  %v10474_v6 = vld [vmem:[%s13729_s8 + $0x28] sm:$0xff]  }
 0x5b6   : > { %6343 = vmatprep.subr.bf16.mxu0 %v10381_v16  ;;  %v10448_v16 = vld [vmem:[%s13727_s6 + $0x7b0] ss:$8 sps:$4 sm:$0xff]  }
 0x5b8   : > { %9346 = vmatpush3.bf16.msra.mxu1 %v10472_v58 }
 0x5b9   : > { %6344 = vmatpush1.bf16.msra.mxu0 %v10379_v22  ;;  %9347 = vmatprep.subr.bf16.mxu1 %v10473_v39  ;;  %v10453_v22 = vld [vmem:[%s13727_s6 + $0x7c4] ss:$8 sps:$4 sm:$0xff]  }
 0x5ba   : > { %6345 = vmatprep.subr.bf16.mxu0 %v10384_v55  ;;  %v10451_v55 = vld [vmem:[%s13727_s6 + $0x7c0] ss:$8 sps:$4 sm:$0xff]  }
 0x5bc   : > { %9348 = vmatpush3.bf16.msra.mxu1 %v10474_v6 }
 0x5bd   : > { %6346 = vmatpush1.bf16.msra.mxu0 %v10382_v33  ;;  %v10456_v33 = vld [vmem:[%s13727_s6 + $0x7d4] ss:$8 sps:$4 sm:$0xff]  }
 0x5be   : > { %6347 = vmatprep.subr.bf16.mxu0 %v10387_v1  ;;  %v10454_v1 = vld [vmem:[%s13727_s6 + $0x7d0] ss:$8 sps:$4 sm:$0xff]  }
 0x5c1   : > { %6348 = vmatpush1.bf16.msra.mxu0 %v10385_v23  ;;  %v10459_v23 = vld [vmem:[%s13727_s6 + $0x7e4] ss:$8 sps:$4 sm:$0xff]  }
 0x5c2   : > { %6349 = vmatprep.subr.bf16.mxu0 %v10390_v46  ;;  %v10457_v46 = vld [vmem:[%s13727_s6 + $0x7e0] ss:$8 sps:$4 sm:$0xff]  }
 0x5c5   : > { %6350 = vmatpush1.bf16.msra.mxu0 %v10388_v35  ;;  %v10462_v35 = vld [vmem:[%s13727_s6 + $0x7f4] ss:$8 sps:$4 sm:$0xff]  }
 0x5c6   : > { %6351 = vmatprep.subr.bf16.mxu0 %v10393_v56  ;;  %v10460_v56 = vld [vmem:[%s13727_s6 + $0x7f0] ss:$8 sps:$4 sm:$0xff]  }
 0x5c9   : > { %6352 = vmatpush1.bf16.msra.mxu0 %v10391_v26  ;;  %v4539_v26 = vpack.c.bf16 %v13071_v32, %v13071_v32  ;;  %v10478_v32 = vld [vmem:[%s13729_s8 + $0x38] sm:$0xff]  }
 0x5ca   : > { %6353 = vmatprep.subr.bf16.mxu0 %v10396_v52 }
 0x5cd   : > { %6354 = vmatpush1.bf16.msra.mxu0 %v10394_v19 }
 0x5ce   : > { %6355 = vmatprep.subr.bf16.mxu0 %v10399_v49  ;;  %v10475_v49 = vld [vmem:[%s13729_s8 + $0x70] sm:$0xff]  }
 0x5cf   : > { %9349 = vmatprep.subr.bf16.mxu1 %v10475_v49 }
 0x5d1   : > { %6356 = vmatpush1.bf16.msra.mxu0 %v10397_v3 }
 0x5d2   : > { %6357 = vmatprep.subr.bf16.mxu0 %v10402_v36  ;;  %v10476_v36 = vld [vmem:[%s13729_s8 + $0x30] sm:$0xff]  }
 0x5d3   : > { %9350 = vmatpush3.bf16.msra.mxu1 %v10476_v36 }
 0x5d5   : > { %6358 = vmatpush1.bf16.msra.mxu0 %v10400_v44 }
 0x5d6   : > { %6359 = vmatprep.subr.bf16.mxu0 %v10405_v51  ;;  %v10477_v51 = vld [vmem:[%s13729_s8 + $0x78] sm:$0xff]  }
 0x5d7   : > { %9351 = vmatprep.subr.bf16.mxu1 %v10477_v51 }
 0x5d8   : > { %9352 = vmatpush3.bf16.msra.mxu1 %v10478_v32 }
 0x5d9   : > { %6360 = vmatpush1.bf16.msra.mxu0 %v10403_v4  ;;  %v4797_v4 = vld [vmem:[%s13728_s7] sm:$0x3] }
 0x5da   : > { %6361 = vmatprep.subr.bf16.mxu0 %v10408_v17  ;;  %v6082_v17 = vrot.slane %v4797_v4, %v13874_v15 }
 0x5dd   : > { %6362 = vmatpush1.bf16.msra.mxu0 %v10406_v30  ;;  %v6086_v30 = vrot.slane %v4797_v4, %v13873_v59  ;;  %v6453_v59 = vld [vmem:[%s13730_s9] sm:$0x1] }
 0x5de   : > { %6363 = vmatprep.subr.bf16.mxu0 %v10411_v61 }
 0x5e1   : > { %6364 = vmatpush1.bf16.msra.mxu0 %v10409_v7 }
 0x5e2   : > { %6365 = vmatprep.subr.bf16.mxu0 %v10414_v12 }
 0x5e5   : > { %6366 = vmatpush1.bf16.msra.mxu0 %v10412_v54 }
 0x5e6   : > { %6376 = vmatprep.subr.bf16.mxu0 %v10417_v5 }
 0x5e8   : > { %6368 = vmatmul.mubr.bf16.vlgmr.msra.gmra.mrb[40].mxu0 %v4537_v50 }
 0x5e9   : > { %6377 = vmatpush1.bf16.msra.mxu0 %v10415_v57  ;;  %6408 = vmatprep.mubr.bf16.mxu0 %v4540_v9 }
 0x5ea   : > { %6378 = vmatprep.subr.bf16.mxu0 %v10420_v53 }
 0x5ed   : > { %6379 = vmatpush1.bf16.msra.mxu0 %v10418_v31 }
 0x5ee   : > { %6380 = vmatprep.subr.bf16.mxu0 %v10423_v14 }
 0x5f1   : > { %6381 = vmatpush1.bf16.msra.mxu0 %v10421_v60 }
 0x5f2   : > { %6382 = vmatprep.subr.bf16.mxu0 %v10426_v28 }
 0x5f5   : > { %6383 = vmatpush1.bf16.msra.mxu0 %v10424_v34 }
 0x5f6   : > { %6384 = vmatprep.subr.bf16.mxu0 %v10429_v38 }
 0x5f9   : > { %6385 = vmatpush1.bf16.msra.mxu0 %v10427_v2 }
 0x5fa   : > { %6386 = vmatprep.subr.bf16.mxu0 %v10432_v10 }
 0x5fd   : > { %6387 = vmatpush1.bf16.msra.mxu0 %v10430_v42 }
 0x5fe   : > { %6388 = vmatprep.subr.bf16.mxu0 %v10435_v11 }
 0x601   : > { %6389 = vmatpush1.bf16.msra.mxu0 %v10433_v47 }
 0x602   : > { %6390 = vmatprep.subr.bf16.mxu0 %v10438_v24 }
 0x605   : > { %6391 = vmatpush1.bf16.msra.mxu0 %v10436_v63 }
 0x606   : > { %6392 = vmatprep.subr.bf16.mxu0 %v10441_v18 }
 0x609   : > { %6393 = vmatpush1.bf16.msra.mxu0 %v10439_v37 }
 0x60a   : > { %6394 = vmatprep.subr.bf16.mxu0 %v10444_v48 }
 0x60d   : > { %6395 = vmatpush1.bf16.msra.mxu0 %v10442_v27 }
 0x60e   : > { %6396 = vmatprep.subr.bf16.mxu0 %v10447_v62 }
 0x611   : > { %6397 = vmatpush1.bf16.msra.mxu0 %v10445_v40 }
 0x612   : > { %6398 = vmatprep.subr.bf16.mxu0 %v10450_v29 }
 0x615   : > { %6399 = vmatpush1.bf16.msra.mxu0 %v10448_v16 }
 0x616   : > { %6400 = vmatprep.subr.bf16.mxu0 %v10453_v22 }
 0x619   : > { %6401 = vmatpush1.bf16.msra.mxu0 %v10451_v55 }
 0x61a   : > { %6402 = vmatprep.subr.bf16.mxu0 %v10456_v33 }
 0x61d   : > { %6403 = vmatpush1.bf16.msra.mxu0 %v10454_v1 }
 0x61e   : > { %6404 = vmatprep.subr.bf16.mxu0 %v10459_v23 }
 0x621   : > { %6405 = vmatpush1.bf16.msra.mxu0 %v10457_v46 }
 0x622   : > { %6406 = vmatprep.subr.bf16.mxu0 %v10462_v35 }
 0x625   : > { %6407 = vmatpush1.bf16.msra.mxu0 %v10460_v56 }
 0x628   : > { %6409 = vmatmul.mubr.bf16.vlgmr.msra.gmra.mrb[40].mxu0 %v4539_v26 }
 0x67a   : > { %v6205_v52 = vpop.f32.mrb[56].mxu1 }
 0x67b   : > { %v6207_v19 = vpop.f32.mrb[57].mxu1  ;;  %v9979_v61 = vadd.f32 %v6205_v52, %v6082_v17 }
 0x67c   : > { %v6209_v3 = vpop.f32.mrb[58].mxu1  ;;  %v9981_v7 = vadd.f32 %v6207_v19, %v6086_v30 }
 0x67d   : > { %v6210_v44 = vpop.f32.mrb[59].mxu1 }
 0x6fb   : > { %v6410_v12 = vpop.f32.mrb[40].mxu0 }
 0x6fc   : > { %v9980_v54 = vadd.f32 %v9979_v61, %v6410_v12  ;;  %v6412_v5 = vpop.f32.mrb[41].mxu0 }
 0x6fd   : > { %v9982_v57 = vadd.f32 %v9981_v7, %v6412_v5  ;;  %v6414_v50 = vpop.f32.mrb[42].mxu0 }
 0x6fe   : > { %v6417_v53 = vmax.f32 %v9980_v54, 0.0  ;;  %v6415_v9 = vpop.f32.mrb[43].mxu0 }
 0x6ff   : > { %v6418_v31 = vmax.f32 %v9982_v57, 0.0 }
 0x700   : > { %v6419_v60 = vpack.c.bf16 %v6417_v53, %v6417_v53 }
 0x701   : > { %v6420_v14 = vpack.c.bf16 %v6418_v31, %v6418_v31 }
 0x703   : > { %6582 = vmatprep.mubr.bf16.mxu1 %v6420_v14 }
 0x704   : > { %6583 = vmatmul.mubr.bf16.vlgmr.msra.gmra.mrb[60].mxu1 %v6419_v60 }
 0x7d7   : > { %v9353_v15 = vpop.f32.mrb[60].mxu1 }
 0x7d8   : > { %v9354_v28 = vpop.f32.mrb[61].mxu1 }
 0x7d9   : > { %v9355_v34 = vadd.f32 %v9354_v28, %v9353_v15  ;;  %v9356_v38 = vpop.f32.mrb[62].mxu1 }
 0x7da   : > { %v9357_v2 = vpop.f32.mrb[63].mxu1 }
 0x7db   : > { %v6585_v10 = vadd.f32 %v9355_v34, %v6453_v59 }
 0x7dd   : > { %6591 = vst.msk [vmem:[%s351_s0] sm:$0x1] %vm6590_vm6, %v6585_v10 }
 0x7de   : > { %10493 = shalt.err (!%p10490_p3)
}
 0x7df   : > { %s10494_s26 = scalar_lea.hbm %s13679_s20, 16  ;;  %s10498_s0 = scalar_lea.hbm %s13731_s10, 32 }
 0x7e0   : > { %p10495_p4 = scmp.ne.s32.totalorder %s13679_s20, %s10494_s26  ;;  %p10499_p9 = scmp.lt.u32.totalorder %s13679_s20, %s13731_s10 }
 0x7e1   : > { %p10500_p10 = scmp.lt.u32.totalorder %s10498_s0, %s10494_s26  ;;  %p10502_p12 = scmp.lt.u32.totalorder %s10494_s26, %s13679_s20 }
 0x7e2   : > { %p10496_p7 = pnand %p10495_p4, %p10651_p5 }
 0x7e3   : > { %p10501_p11 = por %p10500_p10, %p10499_p9 }
 0x7e4   : > { %p10497_p8 = pneg %p10496_p7 }
 0x7e5   : > { %p10503_p13 = por %p10502_p12, %p10501_p11 }
 0x7e7   : > { %p10504_p0 = pnand %p10503_p13, %p10497_p8 }
 0x7e9   : > { %10507 = shalt.err (!%p10504_p0)
}
 0x7ea   : > { %10008 = dma.vmem_to_hbm [thread:$0]  (%p10651_p5), %s13681_s30, 16, %s13679_s20, %s6593_s12  }
 0x7eb PF: > { %p10014_p1 = scmp.ge.s32.totalorder %s10542_s16, 2  ;;  %s6617_s17 = sand.u32 1, %s10530_s13  }
 0x7ec   : > { %s6618_s18 = scalar_lea.sflag [#allocation4], %s6617_s17 }
 0x7ed   : > { %p10011_p2 = pnand %p10014_p1, %p10655_p6 }
 0x7ef   : > { %10525 = dma.done.wait (!%p10011_p2), %s6618_s18, 16  }
 0x7f0   : > { %10527 = vsyncadd (!%p10011_p2), %s6618_s18, 4294967280  ;;  %p20_p3 = scmp.ge.s32.totalorder %s10638_s19, 4   ;;  %s13876_s13 = smov %s10534_s14 }
 0x7f1   : > { %s13877_s14 = smov %s10538_s15  ;;  %s13878_s15 = smov %s10649_s22 }
 0x7f2   : > { %s13879_s16 = smov %s10638_s19  ;;  %22 = sbr.rel (!%p20_p3) target bundleno = 5 (0x5), region = 117 }
 0x7f9   :  { %6622 = vsyncpa [#allocation4], 1 }
 0x7fa   :  { %6624 = vsyncpa [#allocation4 + $0x1], 1 }

</bundles_post_ra>
